<compile_context>
chip_gen: v7x
topology: tpu7x:2x2x1
jax: 0.10.0
libtpu: 0.0.40
codegen_flags: <defaults>
</compile_context>

<pallas_src>
import functools

import jax
import jax.numpy as jnp
from jax import lax
from jax.experimental import pallas as pl
from jax.experimental.pallas import tpu as pltpu


# ----------------------------------------------------------------------------
# Pallas kernel: recurrent part of one LSTM direction, one time chunk per
# grid step. Grid = (T // chunk,), sequential ("arbitrary"); h/c carried in
# VMEM scratch across grid steps. PyTorch gate order: i, f, g, o.
# ----------------------------------------------------------------------------
def _lstm_rec_kernel(gx_ref, whh_ref, out_ref, h_sc, c_sc, *, chunk, reverse):
    """gx_ref : (chunk, 4, B, H) f32  precomputed x@W_ih + (b_ih+b_hh), gate-major
       whh_ref: (4, H, H)        bf16 recurrent weights, one (H,H) per gate
       out_ref: (chunk, B, H)    f32  hidden states
       h_sc/c_sc: (B, H)         f32  state carried across grid steps
    """
    tc = pl.program_id(0)

    @pl.when(tc == 0)
    def _():
        h_sc[...] = jnp.zeros_like(h_sc)
        c_sc[...] = jnp.zeros_like(c_sc)

    # Hoist per-gate recurrent weights out of the time loop.
    w_i = whh_ref[0]
    w_f = whh_ref[1]
    w_g = whh_ref[2]
    w_o = whh_ref[3]

    def step(s, carry):
        h_prev, c_prev = carry
        local = (chunk - 1 - s) if reverse else s
        gx = gx_ref[local]                      # (4, B, H) f32, lane-dense slabs
        hb = h_prev.astype(jnp.bfloat16)        # bf16 MXU operand; f32 accumulate
        i_g = jax.nn.sigmoid(
            gx[0] + jnp.dot(hb, w_i, preferred_element_type=jnp.float32))
        f_g = jax.nn.sigmoid(
            gx[1] + jnp.dot(hb, w_f, preferred_element_type=jnp.float32))
        g_g = jnp.tanh(
            gx[2] + jnp.dot(hb, w_g, preferred_element_type=jnp.float32))
        o_g = jax.nn.sigmoid(
            gx[3] + jnp.dot(hb, w_o, preferred_element_type=jnp.float32))
        c_new = f_g * c_prev + i_g * g_g
        h_new = o_g * jnp.tanh(c_new)
        out_ref[local] = h_new
        return h_new, c_new

    h_f, c_f = lax.fori_loop(0, chunk, step, (h_sc[...], c_sc[...]),
                             unroll=True)
    h_sc[...] = h_f
    c_sc[...] = c_f


def _lstm_direction(gx, whh4, *, reverse, chunk):
    """Run the recurrent part of one LSTM direction.

    gx:    (T, 4, B, H) f32  precomputed gate inputs (natural time order)
    whh4:  (4, H, H)    bf16 per-gate recurrent weights (transposed PyTorch)
    returns (T, B, H) f32 hidden states in natural time order.
    """
    T, _, B, H = gx.shape
    nc = T // chunk

    if reverse:
        gx_map = lambda tc: (nc - 1 - tc, 0, 0, 0)
        out_map = lambda tc: (nc - 1 - tc, 0, 0)
    else:
        gx_map = lambda tc: (tc, 0, 0, 0)
        out_map = lambda tc: (tc, 0, 0)

    kernel = functools.partial(_lstm_rec_kernel, chunk=chunk, reverse=reverse)
    return pl.pallas_call(
        kernel,
        out_shape=jax.ShapeDtypeStruct((T, B, H), jnp.float32),
        grid_spec=pltpu.PrefetchScalarGridSpec(
            num_scalar_prefetch=0,
            grid=(nc,),
            in_specs=[
                pl.BlockSpec((chunk, 4, B, H), gx_map),
                pl.BlockSpec((4, H, H), lambda tc: (0, 0, 0)),
            ],
            out_specs=pl.BlockSpec((chunk, B, H), out_map),
            scratch_shapes=[
                pltpu.VMEM((B, H), jnp.float32),   # h state
                pltpu.VMEM((B, H), jnp.float32),   # c state
            ],
        ),
        compiler_params=pltpu.CompilerParams(
            dimension_semantics=("arbitrary",),
            vmem_limit_bytes=64 * 1024 * 1024,
        ),
    )(gx, whh4)


# ----------------------------------------------------------------------------
# Hoisted input projection: one big bf16 MXU matmul per layer/direction
# (no time dependency), with bias folded in. Output layout (T, 4, B, H).
# ----------------------------------------------------------------------------
def _gates_x(x_tbd, wih_gdh, b_gh):
    gx = jnp.einsum('tbd,gdh->tgbh',
                    x_tbd.astype(jnp.bfloat16), wih_gdh,
                    preferred_element_type=jnp.float32)
    return gx + b_gh[None, :, None, :]


def _pick_chunk(T, max_chunk=16):
    for c in range(min(T, max_chunk), 0, -1):
        if T % c == 0:
            return c
    return 1


# ----------------------------------------------------------------------------
# Full module forward: (B, C, T) -> (B, 2C, T). Activations stay time-major
# across layers; only one transpose in and one out.
# ----------------------------------------------------------------------------
def bilstm_transformer_forward(x, kernel_params, *, max_chunk=16):
    B, C, T = x.shape
    chunk = _pick_chunk(T, max_chunk)

    h = jnp.transpose(x, (2, 0, 1)).astype(jnp.float32)   # (T, B, C) time-major
    for p in kernel_params:
        gx_f = _gates_x(h, p['wih_f'], p['b_f'])
        gx_b = _gates_x(h, p['wih_b'], p['b_b'])
        out_f = _lstm_direction(gx_f, p['whh_f'], reverse=False, chunk=chunk)
        out_b = _lstm_direction(gx_b, p['whh_b'], reverse=True, chunk=chunk)
        h = jnp.concatenate([out_f, out_b], axis=-1)       # (T, B, 2H)

    return jnp.transpose(h, (1, 2, 0))                     # (B, 2H, T)


# ----------------------------------------------------------------------------
# Parameters: raw PyTorch-layout weights + kernel-layout preparation.
# PyTorch LSTM init: U(-1/sqrt(H), 1/sqrt(H)); gate row order (i, f, g, o).
# ----------------------------------------------------------------------------
def make_raw_params(key, input_size, hidden, num_layers, use_bias=True):
    bound = 1.0 / float(hidden) ** 0.5
    layers = []
    for layer in range(num_layers):
        d_in = input_size if layer == 0 else 2 * hidden
        lp = {}
        for tag in ('f', 'b'):
            key, k1, k2, k3, k4 = jax.random.split(key, 5)
            lp['w_ih_' + tag] = jax.random.uniform(
                k1, (4 * hidden, d_in), jnp.float32, -bound, bound)
            lp['w_hh_' + tag] = jax.random.uniform(
                k2, (4 * hidden, hidden), jnp.float32, -bound, bound)
            if use_bias:
                lp['b_ih_' + tag] = jax.random.uniform(
                    k3, (4 * hidden,), jnp.float32, -bound, bound)
                lp['b_hh_' + tag] = jax.random.uniform(
                    k4, (4 * hidden,), jnp.float32, -bound, bound)
            else:
                lp['b_ih_' + tag] = jnp.zeros((4 * hidden,), jnp.float32)
                lp['b_hh_' + tag] = jnp.zeros((4 * hidden,), jnp.float32)
        layers.append(lp)
    return layers


def prep_kernel_params(raw, hidden):
    """PyTorch layout -> kernel layout (per-gate, transposed, bf16 weights)."""
    out = []
    for lp in raw:
        kp = {}
        for tag in ('f', 'b'):
            w_ih = lp['w_ih_' + tag]              # (4H, D)
            w_hh = lp['w_hh_' + tag]              # (4H, H)
            d_in = w_ih.shape[1]
            kp['wih_' + tag] = jnp.transpose(
                w_ih.reshape(4, hidden, d_in), (0, 2, 1)).astype(jnp.bfloat16)
            kp['whh_' + tag] = jnp.transpose(
                w_hh.reshape(4, hidden, hidden), (0, 2, 1)).astype(jnp.bfloat16)
            kp['b_' + tag] = (lp['b_ih_' + tag]
                              + lp['b_hh_' + tag]).reshape(4, hidden)
        out.append(kp)
    return out


# ----------------------------------------------------------------------------
# Pure-JAX f32 reference (lax.scan) for correctness.
# ----------------------------------------------------------------------------
def _ref_direction(x_tbd, w_ih, w_hh, b_ih, b_hh):
    T, B, _ = x_tbd.shape
    H = w_hh.shape[1]
    wih_t = w_ih.T
    whh_t = w_hh.T
    b = (b_ih + b_hh)[None, :]

    def step(carry, x_t):
        h, c = carry
        gates = x_t @ wih_t + h @ whh_t + b
        i, f, g, o = jnp.split(gates, 4, axis=-1)
        i = jax.nn.sigmoid(i)
        f = jax.nn.sigmoid(f)
        g = jnp.tanh(g)
        o = jax.nn.sigmoid(o)
        c = f * c + i * g
        h = o * jnp.tanh(c)
        return (h, c), h

    init = (jnp.zeros((B, H), jnp.float32), jnp.zeros((B, H), jnp.float32))
    _, hs = lax.scan(step, init, x_tbd)
    return hs


def _ref_forward(x, raw):
    h = jnp.transpose(x, (2, 0, 1))
    for lp in raw:
        out_f = _ref_direction(h, lp['w_ih_f'], lp['w_hh_f'],
                               lp['b_ih_f'], lp['b_hh_f'])
        out_b = _ref_direction(h[::-1], lp['w_ih_b'], lp['w_hh_b'],
                               lp['b_ih_b'], lp['b_hh_b'])[::-1]
        h = jnp.concatenate([out_f, out_b], axis=-1)
    return jnp.transpose(h, (1, 2, 0))


if __name__ == "__main__":
    # Small shapes consistent with the module: x is (batch, input_size, seq).
    batch = 2
    input_size = 32       # stands in for the option default 1025
    seq_len = 8
    num_trans_layers = 2  # stands in for the option default 9
    hidden = input_size   # hidden_size == input_size in the module

    key = jax.random.PRNGKey(0)
    kx, kp = jax.random.split(key)
    x = jax.random.normal(kx, (batch, input_size, seq_len), jnp.float32)

    raw_params = make_raw_params(kp, input_size, hidden, num_trans_layers,
                                 use_bias=True)
    kernel_params = prep_kernel_params(raw_params, hidden)

    fwd = jax.jit(bilstm_transformer_forward)
    out = jax.block_until_ready(fwd(x, kernel_params))

    assert out.shape == (batch, 2 * input_size, seq_len), out.shape

    ref = jax.block_until_ready(_ref_forward(x, raw_params))
    max_err = float(jnp.max(jnp.abs(out - ref)))
    # Loose tolerance accounts for bf16 matmul operands (f32 accumulation).
    assert jnp.allclose(out, ref, rtol=5e-2, atol=5e-2), max_err

    print("KERNEL_OK")
</pallas_src>

<mosaic_0001>
module attributes {stable_mosaic.version = 11 : i64} {
  func.func @_lstm_rec_kernel(%arg0: i32, %arg1: memref<8x4x2x32xf32, #tpu.memory_space<vmem>>, %arg2: memref<4x32x32xbf16, #tpu.memory_space<vmem>>, %arg3: memref<8x2x32xf32, #tpu.memory_space<vmem>>, %arg4: memref<2x32xf32, #tpu.memory_space<vmem>>, %arg5: memref<2x32xf32, #tpu.memory_space<vmem>>) attributes {dimension_semantics = [#tpu.dimension_semantics<arbitrary>], iteration_bounds = array<i64: 1>, scalar_prefetch = 0 : i64, scratch_operands = 2 : i64, tpu.core_type = #tpu.core_type<tc>, window_params = [{transform_indices = @transform_0, window_bounds = array<i64: 8, 4, 2, 32>}, {pipeline_mode = #tpu.pipeline_mode<synchronous>, transform_indices = @transform_1, window_bounds = array<i64: 4, 32, 32>}, {transform_indices = @transform_2, window_bounds = array<i64: 8, 2, 32>}]} {
    %c0_i32 = arith.constant 0 : i32
    %0 = arith.cmpi eq, %arg0, %c0_i32 : i32
    %1 = arith.extui %0 : i1 to i32
    %c0_i32_0 = arith.constant 0 : i32
    %2 = arith.cmpi ne, %1, %c0_i32_0 : i32
    scf.if %2 {
      %cst_121 = arith.constant 0.000000e+00 : f32
      %383 = vector.broadcast %cst_121 : f32 to vector<2x32xf32>
      %c0_122 = arith.constant 0 : index
      %c0_123 = arith.constant 0 : index
      %384 = vector.load %arg4[%c0_122, %c0_123] : memref<2x32xf32, #tpu.memory_space<vmem>>, vector<2x32xf32>
      tpu.vector_store %arg4[%c0_122, %c0_123], %383 {strides = array<i32>} : memref<2x32xf32, #tpu.memory_space<vmem>>, vector<2x32xf32>,
      %cst_124 = arith.constant 0.000000e+00 : f32
      %385 = vector.broadcast %cst_124 : f32 to vector<2x32xf32>
      %c0_125 = arith.constant 0 : index
      %c0_126 = arith.constant 0 : index
      %386 = vector.load %arg5[%c0_125, %c0_126] : memref<2x32xf32, #tpu.memory_space<vmem>>, vector<2x32xf32>
      tpu.vector_store %arg5[%c0_125, %c0_126], %385 {strides = array<i32>} : memref<2x32xf32, #tpu.memory_space<vmem>>, vector<2x32xf32>,
    } else {
    }
    %c0 = arith.constant 0 : index
    %c0_1 = arith.constant 0 : index
    %c0_2 = arith.constant 0 : index
    %3 = vector.load %arg2[%c0, %c0_1, %c0_2] : memref<4x32x32xbf16, #tpu.memory_space<vmem>>, vector<1x32x32xbf16>
    %4 = vector.shape_cast %3 : vector<1x32x32xbf16> to vector<32x32xbf16>
    %c1 = arith.constant 1 : index
    %c0_3 = arith.constant 0 : index
    %c0_4 = arith.constant 0 : index
    %5 = vector.load %arg2[%c1, %c0_3, %c0_4] : memref<4x32x32xbf16, #tpu.memory_space<vmem>>, vector<1x32x32xbf16>
    %6 = vector.shape_cast %5 : vector<1x32x32xbf16> to vector<32x32xbf16>
    %c2 = arith.constant 2 : index
    %c0_5 = arith.constant 0 : index
    %c0_6 = arith.constant 0 : index
    %7 = vector.load %arg2[%c2, %c0_5, %c0_6] : memref<4x32x32xbf16, #tpu.memory_space<vmem>>, vector<1x32x32xbf16>
    %8 = vector.shape_cast %7 : vector<1x32x32xbf16> to vector<32x32xbf16>
    %c3 = arith.constant 3 : index
    %c0_7 = arith.constant 0 : index
    %c0_8 = arith.constant 0 : index
    %9 = vector.load %arg2[%c3, %c0_7, %c0_8] : memref<4x32x32xbf16, #tpu.memory_space<vmem>>, vector<1x32x32xbf16>
    %10 = vector.shape_cast %9 : vector<1x32x32xbf16> to vector<32x32xbf16>
    %c0_9 = arith.constant 0 : index
    %c0_10 = arith.constant 0 : index
    %11 = vector.load %arg4[%c0_9, %c0_10] : memref<2x32xf32, #tpu.memory_space<vmem>>, vector<2x32xf32>
    %c0_11 = arith.constant 0 : index
    %c0_12 = arith.constant 0 : index
    %12 = vector.load %arg5[%c0_11, %c0_12] : memref<2x32xf32, #tpu.memory_space<vmem>>, vector<2x32xf32>
    %c0_i32_13 = arith.constant 0 : i32
    %c7_i32 = arith.constant 7 : i32
    %13 = arith.subi %c7_i32, %c0_i32_13 : i32
    %14 = arith.index_cast %13 : i32 to index
    %c0_14 = arith.constant 0 : index
    %c0_15 = arith.constant 0 : index
    %c0_16 = arith.constant 0 : index
    %15 = vector.load %arg1[%14, %c0_14, %c0_15, %c0_16] : memref<8x4x2x32xf32, #tpu.memory_space<vmem>>, vector<1x4x2x32xf32>
    %16 = vector.shape_cast %15 : vector<1x4x2x32xf32> to vector<4x2x32xf32>
    %17 = arith.truncf %11 : vector<2x32xf32> to vector<2x32xbf16>
    %18 = vector.extract_strided_slice %16 {offsets = [0, 0, 0], sizes = [1, 2, 32], strides = [1, 1, 1]} : vector<4x2x32xf32> to vector<1x2x32xf32>
    %19 = vector.shape_cast %18 : vector<1x2x32xf32> to vector<2x32xf32>
    %cst = arith.constant dense<0.000000e+00> : vector<2x32xf32>
    %20 = tpu.matmul %17, %4, %cst {dimension_numbers = #tpu.dot_dimension_numbers<[1], [0], [0], [1], [0, 0, 1, 1], [], []>} : vector<2x32xbf16>, vector<32x32xbf16>, vector<2x32xf32> -> vector<2x32xf32>
    %21 = arith.addf %19, %20 : vector<2x32xf32>
    %22 = arith.negf %21 : vector<2x32xf32>
    %23 = math.exp %22 : vector<2x32xf32>
    %cst_17 = arith.constant 1.000000e+00 : f32
    %24 = vector.broadcast %cst_17 : f32 to vector<2x32xf32>
    %25 = arith.addf %24, %23 : vector<2x32xf32>
    %26 = arith.divf %24, %25 : vector<2x32xf32>
    %27 = vector.extract_strided_slice %16 {offsets = [1, 0, 0], sizes = [1, 2, 32], strides = [1, 1, 1]} : vector<4x2x32xf32> to vector<1x2x32xf32>
    %28 = vector.shape_cast %27 : vector<1x2x32xf32> to vector<2x32xf32>
    %cst_18 = arith.constant dense<0.000000e+00> : vector<2x32xf32>
    %29 = tpu.matmul %17, %6, %cst_18 {dimension_numbers = #tpu.dot_dimension_numbers<[1], [0], [0], [1], [0, 0, 1, 1], [], []>} : vector<2x32xbf16>, vector<32x32xbf16>, vector<2x32xf32> -> vector<2x32xf32>
    %30 = arith.addf %28, %29 : vector<2x32xf32>
    %31 = arith.negf %30 : vector<2x32xf32>
    %32 = math.exp %31 : vector<2x32xf32>
    %cst_19 = arith.constant 1.000000e+00 : f32
    %33 = vector.broadcast %cst_19 : f32 to vector<2x32xf32>
    %34 = arith.addf %33, %32 : vector<2x32xf32>
    %35 = arith.divf %33, %34 : vector<2x32xf32>
    %36 = vector.extract_strided_slice %16 {offsets = [2, 0, 0], sizes = [1, 2, 32], strides = [1, 1, 1]} : vector<4x2x32xf32> to vector<1x2x32xf32>
    %37 = vector.shape_cast %36 : vector<1x2x32xf32> to vector<2x32xf32>
    %cst_20 = arith.constant dense<0.000000e+00> : vector<2x32xf32>
    %38 = tpu.matmul %17, %8, %cst_20 {dimension_numbers = #tpu.dot_dimension_numbers<[1], [0], [0], [1], [0, 0, 1, 1], [], []>} : vector<2x32xbf16>, vector<32x32xbf16>, vector<2x32xf32> -> vector<2x32xf32>
    %39 = arith.addf %37, %38 : vector<2x32xf32>
    %40 = math.tanh %39 : vector<2x32xf32>
    %41 = vector.extract_strided_slice %16 {offsets = [3, 0, 0], sizes = [1, 2, 32], strides = [1, 1, 1]} : vector<4x2x32xf32> to vector<1x2x32xf32>
    %42 = vector.shape_cast %41 : vector<1x2x32xf32> to vector<2x32xf32>
    %cst_21 = arith.constant dense<0.000000e+00> : vector<2x32xf32>
    %43 = tpu.matmul %17, %10, %cst_21 {dimension_numbers = #tpu.dot_dimension_numbers<[1], [0], [0], [1], [0, 0, 1, 1], [], []>} : vector<2x32xbf16>, vector<32x32xbf16>, vector<2x32xf32> -> vector<2x32xf32>
    %44 = arith.addf %42, %43 : vector<2x32xf32>
    %45 = arith.negf %44 : vector<2x32xf32>
    %46 = math.exp %45 : vector<2x32xf32>
    %cst_22 = arith.constant 1.000000e+00 : f32
    %47 = vector.broadcast %cst_22 : f32 to vector<2x32xf32>
    %48 = arith.addf %47, %46 : vector<2x32xf32>
    %49 = arith.divf %47, %48 : vector<2x32xf32>
    %50 = arith.mulf %35, %12 : vector<2x32xf32>
    %51 = arith.mulf %26, %40 : vector<2x32xf32>
    %52 = arith.addf %50, %51 : vector<2x32xf32>
    %53 = math.tanh %52 : vector<2x32xf32>
    %54 = arith.mulf %49, %53 : vector<2x32xf32>
    %55 = arith.index_cast %13 : i32 to index
    %c0_23 = arith.constant 0 : index
    %c0_24 = arith.constant 0 : index
    %56 = vector.load %arg3[%55, %c0_23, %c0_24] : memref<8x2x32xf32, #tpu.memory_space<vmem>>, vector<1x2x32xf32>
    %57 = vector.shape_cast %56 : vector<1x2x32xf32> to vector<2x32xf32>
    %58 = vector.shape_cast %54 : vector<2x32xf32> to vector<1x2x32xf32>
    tpu.vector_store %arg3[%55, %c0_23, %c0_24], %58 {strides = array<i32>} : memref<8x2x32xf32, #tpu.memory_space<vmem>>, vector<1x2x32xf32>,
    %c1_i32 = arith.constant 1 : i32
    %c7_i32_25 = arith.constant 7 : i32
    %59 = arith.subi %c7_i32_25, %c1_i32 : i32
    %60 = arith.index_cast %59 : i32 to index
    %c0_26 = arith.constant 0 : index
    %c0_27 = arith.constant 0 : index
    %c0_28 = arith.constant 0 : index
    %61 = vector.load %arg1[%60, %c0_26, %c0_27, %c0_28] : memref<8x4x2x32xf32, #tpu.memory_space<vmem>>, vector<1x4x2x32xf32>
    %62 = vector.shape_cast %61 : vector<1x4x2x32xf32> to vector<4x2x32xf32>
    %63 = arith.truncf %54 : vector<2x32xf32> to vector<2x32xbf16>
    %64 = vector.extract_strided_slice %62 {offsets = [0, 0, 0], sizes = [1, 2, 32], strides = [1, 1, 1]} : vector<4x2x32xf32> to vector<1x2x32xf32>
    %65 = vector.shape_cast %64 : vector<1x2x32xf32> to vector<2x32xf32>
    %cst_29 = arith.constant dense<0.000000e+00> : vector<2x32xf32>
    %66 = tpu.matmul %63, %4, %cst_29 {dimension_numbers = #tpu.dot_dimension_numbers<[1], [0], [0], [1], [0, 0, 1, 1], [], []>} : vector<2x32xbf16>, vector<32x32xbf16>, vector<2x32xf32> -> vector<2x32xf32>
    %67 = arith.addf %65, %66 : vector<2x32xf32>
    %68 = arith.negf %67 : vector<2x32xf32>
    %69 = math.exp %68 : vector<2x32xf32>
    %cst_30 = arith.constant 1.000000e+00 : f32
    %70 = vector.broadcast %cst_30 : f32 to vector<2x32xf32>
    %71 = arith.addf %70, %69 : vector<2x32xf32>
    %72 = arith.divf %70, %71 : vector<2x32xf32>
    %73 = vector.extract_strided_slice %62 {offsets = [1, 0, 0], sizes = [1, 2, 32], strides = [1, 1, 1]} : vector<4x2x32xf32> to vector<1x2x32xf32>
    %74 = vector.shape_cast %73 : vector<1x2x32xf32> to vector<2x32xf32>
    %cst_31 = arith.constant dense<0.000000e+00> : vector<2x32xf32>
    %75 = tpu.matmul %63, %6, %cst_31 {dimension_numbers = #tpu.dot_dimension_numbers<[1], [0], [0], [1], [0, 0, 1, 1], [], []>} : vector<2x32xbf16>, vector<32x32xbf16>, vector<2x32xf32> -> vector<2x32xf32>
    %76 = arith.addf %74, %75 : vector<2x32xf32>
    %77 = arith.negf %76 : vector<2x32xf32>
    %78 = math.exp %77 : vector<2x32xf32>
    %cst_32 = arith.constant 1.000000e+00 : f32
    %79 = vector.broadcast %cst_32 : f32 to vector<2x32xf32>
    %80 = arith.addf %79, %78 : vector<2x32xf32>
    %81 = arith.divf %79, %80 : vector<2x32xf32>
    %82 = vector.extract_strided_slice %62 {offsets = [2, 0, 0], sizes = [1, 2, 32], strides = [1, 1, 1]} : vector<4x2x32xf32> to vector<1x2x32xf32>
    %83 = vector.shape_cast %82 : vector<1x2x32xf32> to vector<2x32xf32>
    %cst_33 = arith.constant dense<0.000000e+00> : vector<2x32xf32>
    %84 = tpu.matmul %63, %8, %cst_33 {dimension_numbers = #tpu.dot_dimension_numbers<[1], [0], [0], [1], [0, 0, 1, 1], [], []>} : vector<2x32xbf16>, vector<32x32xbf16>, vector<2x32xf32> -> vector<2x32xf32>
    %85 = arith.addf %83, %84 : vector<2x32xf32>
    %86 = math.tanh %85 : vector<2x32xf32>
    %87 = vector.extract_strided_slice %62 {offsets = [3, 0, 0], sizes = [1, 2, 32], strides = [1, 1, 1]} : vector<4x2x32xf32> to vector<1x2x32xf32>
    %88 = vector.shape_cast %87 : vector<1x2x32xf32> to vector<2x32xf32>
    %cst_34 = arith.constant dense<0.000000e+00> : vector<2x32xf32>
    %89 = tpu.matmul %63, %10, %cst_34 {dimension_numbers = #tpu.dot_dimension_numbers<[1], [0], [0], [1], [0, 0, 1, 1], [], []>} : vector<2x32xbf16>, vector<32x32xbf16>, vector<2x32xf32> -> vector<2x32xf32>
    %90 = arith.addf %88, %89 : vector<2x32xf32>
    %91 = arith.negf %90 : vector<2x32xf32>
    %92 = math.exp %91 : vector<2x32xf32>
    %cst_35 = arith.constant 1.000000e+00 : f32
    %93 = vector.broadcast %cst_35 : f32 to vector<2x32xf32>
    %94 = arith.addf %93, %92 : vector<2x32xf32>
    %95 = arith.divf %93, %94 : vector<2x32xf32>
    %96 = arith.mulf %81, %52 : vector<2x32xf32>
    %97 = arith.mulf %72, %86 : vector<2x32xf32>
    %98 = arith.addf %96, %97 : vector<2x32xf32>
    %99 = math.tanh %98 : vector<2x32xf32>
    %100 = arith.mulf %95, %99 : vector<2x32xf32>
    %101 = arith.index_cast %59 : i32 to index
    %c0_36 = arith.constant 0 : index
    %c0_37 = arith.constant 0 : index
    %102 = vector.load %arg3[%101, %c0_36, %c0_37] : memref<8x2x32xf32, #tpu.memory_space<vmem>>, vector<1x2x32xf32>
    %103 = vector.shape_cast %102 : vector<1x2x32xf32> to vector<2x32xf32>
    %104 = vector.shape_cast %100 : vector<2x32xf32> to vector<1x2x32xf32>
    tpu.vector_store %arg3[%101, %c0_36, %c0_37], %104 {strides = array<i32>} : memref<8x2x32xf32, #tpu.memory_space<vmem>>, vector<1x2x32xf32>,
    %c2_i32 = arith.constant 2 : i32
    %c7_i32_38 = arith.constant 7 : i32
    %105 = arith.subi %c7_i32_38, %c2_i32 : i32
    %106 = arith.index_cast %105 : i32 to index
    %c0_39 = arith.constant 0 : index
    %c0_40 = arith.constant 0 : index
    %c0_41 = arith.constant 0 : index
    %107 = vector.load %arg1[%106, %c0_39, %c0_40, %c0_41] : memref<8x4x2x32xf32, #tpu.memory_space<vmem>>, vector<1x4x2x32xf32>
    %108 = vector.shape_cast %107 : vector<1x4x2x32xf32> to vector<4x2x32xf32>
    %109 = arith.truncf %100 : vector<2x32xf32> to vector<2x32xbf16>
    %110 = vector.extract_strided_slice %108 {offsets = [0, 0, 0], sizes = [1, 2, 32], strides = [1, 1, 1]} : vector<4x2x32xf32> to vector<1x2x32xf32>
    %111 = vector.shape_cast %110 : vector<1x2x32xf32> to vector<2x32xf32>
    %cst_42 = arith.constant dense<0.000000e+00> : vector<2x32xf32>
    %112 = tpu.matmul %109, %4, %cst_42 {dimension_numbers = #tpu.dot_dimension_numbers<[1], [0], [0], [1], [0, 0, 1, 1], [], []>} : vector<2x32xbf16>, vector<32x32xbf16>, vector<2x32xf32> -> vector<2x32xf32>
    %113 = arith.addf %111, %112 : vector<2x32xf32>
    %114 = arith.negf %113 : vector<2x32xf32>
    %115 = math.exp %114 : vector<2x32xf32>
    %cst_43 = arith.constant 1.000000e+00 : f32
    %116 = vector.broadcast %cst_43 : f32 to vector<2x32xf32>
    %117 = arith.addf %116, %115 : vector<2x32xf32>
    %118 = arith.divf %116, %117 : vector<2x32xf32>
    %119 = vector.extract_strided_slice %108 {offsets = [1, 0, 0], sizes = [1, 2, 32], strides = [1, 1, 1]} : vector<4x2x32xf32> to vector<1x2x32xf32>
    %120 = vector.shape_cast %119 : vector<1x2x32xf32> to vector<2x32xf32>
    %cst_44 = arith.constant dense<0.000000e+00> : vector<2x32xf32>
    %121 = tpu.matmul %109, %6, %cst_44 {dimension_numbers = #tpu.dot_dimension_numbers<[1], [0], [0], [1], [0, 0, 1, 1], [], []>} : vector<2x32xbf16>, vector<32x32xbf16>, vector<2x32xf32> -> vector<2x32xf32>
    %122 = arith.addf %120, %121 : vector<2x32xf32>
    %123 = arith.negf %122 : vector<2x32xf32>
    %124 = math.exp %123 : vector<2x32xf32>
    %cst_45 = arith.constant 1.000000e+00 : f32
    %125 = vector.broadcast %cst_45 : f32 to vector<2x32xf32>
    %126 = arith.addf %125, %124 : vector<2x32xf32>
    %127 = arith.divf %125, %126 : vector<2x32xf32>
    %128 = vector.extract_strided_slice %108 {offsets = [2, 0, 0], sizes = [1, 2, 32], strides = [1, 1, 1]} : vector<4x2x32xf32> to vector<1x2x32xf32>
    %129 = vector.shape_cast %128 : vector<1x2x32xf32> to vector<2x32xf32>
    %cst_46 = arith.constant dense<0.000000e+00> : vector<2x32xf32>
    %130 = tpu.matmul %109, %8, %cst_46 {dimension_numbers = #tpu.dot_dimension_numbers<[1], [0], [0], [1], [0, 0, 1, 1], [], []>} : vector<2x32xbf16>, vector<32x32xbf16>, vector<2x32xf32> -> vector<2x32xf32>
    %131 = arith.addf %129, %130 : vector<2x32xf32>
    %132 = math.tanh %131 : vector<2x32xf32>
    %133 = vector.extract_strided_slice %108 {offsets = [3, 0, 0], sizes = [1, 2, 32], strides = [1, 1, 1]} : vector<4x2x32xf32> to vector<1x2x32xf32>
    %134 = vector.shape_cast %133 : vector<1x2x32xf32> to vector<2x32xf32>
    %cst_47 = arith.constant dense<0.000000e+00> : vector<2x32xf32>
    %135 = tpu.matmul %109, %10, %cst_47 {dimension_numbers = #tpu.dot_dimension_numbers<[1], [0], [0], [1], [0, 0, 1, 1], [], []>} : vector<2x32xbf16>, vector<32x32xbf16>, vector<2x32xf32> -> vector<2x32xf32>
    %136 = arith.addf %134, %135 : vector<2x32xf32>
    %137 = arith.negf %136 : vector<2x32xf32>
    %138 = math.exp %137 : vector<2x32xf32>
    %cst_48 = arith.constant 1.000000e+00 : f32
    %139 = vector.broadcast %cst_48 : f32 to vector<2x32xf32>
    %140 = arith.addf %139, %138 : vector<2x32xf32>
    %141 = arith.divf %139, %140 : vector<2x32xf32>
    %142 = arith.mulf %127, %98 : vector<2x32xf32>
    %143 = arith.mulf %118, %132 : vector<2x32xf32>
    %144 = arith.addf %142, %143 : vector<2x32xf32>
    %145 = math.tanh %144 : vector<2x32xf32>
    %146 = arith.mulf %141, %145 : vector<2x32xf32>
    %147 = arith.index_cast %105 : i32 to index
    %c0_49 = arith.constant 0 : index
    %c0_50 = arith.constant 0 : index
    %148 = vector.load %arg3[%147, %c0_49, %c0_50] : memref<8x2x32xf32, #tpu.memory_space<vmem>>, vector<1x2x32xf32>
    %149 = vector.shape_cast %148 : vector<1x2x32xf32> to vector<2x32xf32>
    %150 = vector.shape_cast %146 : vector<2x32xf32> to vector<1x2x32xf32>
    tpu.vector_store %arg3[%147, %c0_49, %c0_50], %150 {strides = array<i32>} : memref<8x2x32xf32, #tpu.memory_space<vmem>>, vector<1x2x32xf32>,
    %c3_i32 = arith.constant 3 : i32
    %c7_i32_51 = arith.constant 7 : i32
    %151 = arith.subi %c7_i32_51, %c3_i32 : i32
    %152 = arith.index_cast %151 : i32 to index
    %c0_52 = arith.constant 0 : index
    %c0_53 = arith.constant 0 : index
    %c0_54 = arith.constant 0 : index
    %153 = vector.load %arg1[%152, %c0_52, %c0_53, %c0_54] : memref<8x4x2x32xf32, #tpu.memory_space<vmem>>, vector<1x4x2x32xf32>
    %154 = vector.shape_cast %153 : vector<1x4x2x32xf32> to vector<4x2x32xf32>
    %155 = arith.truncf %146 : vector<2x32xf32> to vector<2x32xbf16>
    %156 = vector.extract_strided_slice %154 {offsets = [0, 0, 0], sizes = [1, 2, 32], strides = [1, 1, 1]} : vector<4x2x32xf32> to vector<1x2x32xf32>
    %157 = vector.shape_cast %156 : vector<1x2x32xf32> to vector<2x32xf32>
    %cst_55 = arith.constant dense<0.000000e+00> : vector<2x32xf32>
    %158 = tpu.matmul %155, %4, %cst_55 {dimension_numbers = #tpu.dot_dimension_numbers<[1], [0], [0], [1], [0, 0, 1, 1], [], []>} : vector<2x32xbf16>, vector<32x32xbf16>, vector<2x32xf32> -> vector<2x32xf32>
    %159 = arith.addf %157, %158 : vector<2x32xf32>
    %160 = arith.negf %159 : vector<2x32xf32>
    %161 = math.exp %160 : vector<2x32xf32>
    %cst_56 = arith.constant 1.000000e+00 : f32
    %162 = vector.broadcast %cst_56 : f32 to vector<2x32xf32>
    %163 = arith.addf %162, %161 : vector<2x32xf32>
    %164 = arith.divf %162, %163 : vector<2x32xf32>
    %165 = vector.extract_strided_slice %154 {offsets = [1, 0, 0], sizes = [1, 2, 32], strides = [1, 1, 1]} : vector<4x2x32xf32> to vector<1x2x32xf32>
    %166 = vector.shape_cast %165 : vector<1x2x32xf32> to vector<2x32xf32>
    %cst_57 = arith.constant dense<0.000000e+00> : vector<2x32xf32>
    %167 = tpu.matmul %155, %6, %cst_57 {dimension_numbers = #tpu.dot_dimension_numbers<[1], [0], [0], [1], [0, 0, 1, 1], [], []>} : vector<2x32xbf16>, vector<32x32xbf16>, vector<2x32xf32> -> vector<2x32xf32>
    %168 = arith.addf %166, %167 : vector<2x32xf32>
    %169 = arith.negf %168 : vector<2x32xf32>
    %170 = math.exp %169 : vector<2x32xf32>
    %cst_58 = arith.constant 1.000000e+00 : f32
    %171 = vector.broadcast %cst_58 : f32 to vector<2x32xf32>
    %172 = arith.addf %171, %170 : vector<2x32xf32>
    %173 = arith.divf %171, %172 : vector<2x32xf32>
    %174 = vector.extract_strided_slice %154 {offsets = [2, 0, 0], sizes = [1, 2, 32], strides = [1, 1, 1]} : vector<4x2x32xf32> to vector<1x2x32xf32>
    %175 = vector.shape_cast %174 : vector<1x2x32xf32> to vector<2x32xf32>
    %cst_59 = arith.constant dense<0.000000e+00> : vector<2x32xf32>
    %176 = tpu.matmul %155, %8, %cst_59 {dimension_numbers = #tpu.dot_dimension_numbers<[1], [0], [0], [1], [0, 0, 1, 1], [], []>} : vector<2x32xbf16>, vector<32x32xbf16>, vector<2x32xf32> -> vector<2x32xf32>
    %177 = arith.addf %175, %176 : vector<2x32xf32>
    %178 = math.tanh %177 : vector<2x32xf32>
    %179 = vector.extract_strided_slice %154 {offsets = [3, 0, 0], sizes = [1, 2, 32], strides = [1, 1, 1]} : vector<4x2x32xf32> to vector<1x2x32xf32>
    %180 = vector.shape_cast %179 : vector<1x2x32xf32> to vector<2x32xf32>
    %cst_60 = arith.constant dense<0.000000e+00> : vector<2x32xf32>
    %181 = tpu.matmul %155, %10, %cst_60 {dimension_numbers = #tpu.dot_dimension_numbers<[1], [0], [0], [1], [0, 0, 1, 1], [], []>} : vector<2x32xbf16>, vector<32x32xbf16>, vector<2x32xf32> -> vector<2x32xf32>
    %182 = arith.addf %180, %181 : vector<2x32xf32>
    %183 = arith.negf %182 : vector<2x32xf32>
    %184 = math.exp %183 : vector<2x32xf32>
    %cst_61 = arith.constant 1.000000e+00 : f32
    %185 = vector.broadcast %cst_61 : f32 to vector<2x32xf32>
    %186 = arith.addf %185, %184 : vector<2x32xf32>
    %187 = arith.divf %185, %186 : vector<2x32xf32>
    %188 = arith.mulf %173, %144 : vector<2x32xf32>
    %189 = arith.mulf %164, %178 : vector<2x32xf32>
    %190 = arith.addf %188, %189 : vector<2x32xf32>
    %191 = math.tanh %190 : vector<2x32xf32>
    %192 = arith.mulf %187, %191 : vector<2x32xf32>
    %193 = arith.index_cast %151 : i32 to index
    %c0_62 = arith.constant 0 : index
    %c0_63 = arith.constant 0 : index
    %194 = vector.load %arg3[%193, %c0_62, %c0_63] : memref<8x2x32xf32, #tpu.memory_space<vmem>>, vector<1x2x32xf32>
    %195 = vector.shape_cast %194 : vector<1x2x32xf32> to vector<2x32xf32>
    %196 = vector.shape_cast %192 : vector<2x32xf32> to vector<1x2x32xf32>
    tpu.vector_store %arg3[%193, %c0_62, %c0_63], %196 {strides = array<i32>} : memref<8x2x32xf32, #tpu.memory_space<vmem>>, vector<1x2x32xf32>,
    %c4_i32 = arith.constant 4 : i32
    %c7_i32_64 = arith.constant 7 : i32
    %197 = arith.subi %c7_i32_64, %c4_i32 : i32
    %198 = arith.index_cast %197 : i32 to index
    %c0_65 = arith.constant 0 : index
    %c0_66 = arith.constant 0 : index
    %c0_67 = arith.constant 0 : index
    %199 = vector.load %arg1[%198, %c0_65, %c0_66, %c0_67] : memref<8x4x2x32xf32, #tpu.memory_space<vmem>>, vector<1x4x2x32xf32>
    %200 = vector.shape_cast %199 : vector<1x4x2x32xf32> to vector<4x2x32xf32>
    %201 = arith.truncf %192 : vector<2x32xf32> to vector<2x32xbf16>
    %202 = vector.extract_strided_slice %200 {offsets = [0, 0, 0], sizes = [1, 2, 32], strides = [1, 1, 1]} : vector<4x2x32xf32> to vector<1x2x32xf32>
    %203 = vector.shape_cast %202 : vector<1x2x32xf32> to vector<2x32xf32>
    %cst_68 = arith.constant dense<0.000000e+00> : vector<2x32xf32>
    %204 = tpu.matmul %201, %4, %cst_68 {dimension_numbers = #tpu.dot_dimension_numbers<[1], [0], [0], [1], [0, 0, 1, 1], [], []>} : vector<2x32xbf16>, vector<32x32xbf16>, vector<2x32xf32> -> vector<2x32xf32>
    %205 = arith.addf %203, %204 : vector<2x32xf32>
    %206 = arith.negf %205 : vector<2x32xf32>
    %207 = math.exp %206 : vector<2x32xf32>
    %cst_69 = arith.constant 1.000000e+00 : f32
    %208 = vector.broadcast %cst_69 : f32 to vector<2x32xf32>
    %209 = arith.addf %208, %207 : vector<2x32xf32>
    %210 = arith.divf %208, %209 : vector<2x32xf32>
    %211 = vector.extract_strided_slice %200 {offsets = [1, 0, 0], sizes = [1, 2, 32], strides = [1, 1, 1]} : vector<4x2x32xf32> to vector<1x2x32xf32>
    %212 = vector.shape_cast %211 : vector<1x2x32xf32> to vector<2x32xf32>
    %cst_70 = arith.constant dense<0.000000e+00> : vector<2x32xf32>
    %213 = tpu.matmul %201, %6, %cst_70 {dimension_numbers = #tpu.dot_dimension_numbers<[1], [0], [0], [1], [0, 0, 1, 1], [], []>} : vector<2x32xbf16>, vector<32x32xbf16>, vector<2x32xf32> -> vector<2x32xf32>
    %214 = arith.addf %212, %213 : vector<2x32xf32>
    %215 = arith.negf %214 : vector<2x32xf32>
    %216 = math.exp %215 : vector<2x32xf32>
    %cst_71 = arith.constant 1.000000e+00 : f32
    %217 = vector.broadcast %cst_71 : f32 to vector<2x32xf32>
    %218 = arith.addf %217, %216 : vector<2x32xf32>
    %219 = arith.divf %217, %218 : vector<2x32xf32>
    %220 = vector.extract_strided_slice %200 {offsets = [2, 0, 0], sizes = [1, 2, 32], strides = [1, 1, 1]} : vector<4x2x32xf32> to vector<1x2x32xf32>
    %221 = vector.shape_cast %220 : vector<1x2x32xf32> to vector<2x32xf32>
    %cst_72 = arith.constant dense<0.000000e+00> : vector<2x32xf32>
    %222 = tpu.matmul %201, %8, %cst_72 {dimension_numbers = #tpu.dot_dimension_numbers<[1], [0], [0], [1], [0, 0, 1, 1], [], []>} : vector<2x32xbf16>, vector<32x32xbf16>, vector<2x32xf32> -> vector<2x32xf32>
    %223 = arith.addf %221, %222 : vector<2x32xf32>
    %224 = math.tanh %223 : vector<2x32xf32>
    %225 = vector.extract_strided_slice %200 {offsets = [3, 0, 0], sizes = [1, 2, 32], strides = [1, 1, 1]} : vector<4x2x32xf32> to vector<1x2x32xf32>
    %226 = vector.shape_cast %225 : vector<1x2x32xf32> to vector<2x32xf32>
    %cst_73 = arith.constant dense<0.000000e+00> : vector<2x32xf32>
    %227 = tpu.matmul %201, %10, %cst_73 {dimension_numbers = #tpu.dot_dimension_numbers<[1], [0], [0], [1], [0, 0, 1, 1], [], []>} : vector<2x32xbf16>, vector<32x32xbf16>, vector<2x32xf32> -> vector<2x32xf32>
    %228 = arith.addf %226, %227 : vector<2x32xf32>
    %229 = arith.negf %228 : vector<2x32xf32>
    %230 = math.exp %229 : vector<2x32xf32>
    %cst_74 = arith.constant 1.000000e+00 : f32
    %231 = vector.broadcast %cst_74 : f32 to vector<2x32xf32>
    %232 = arith.addf %231, %230 : vector<2x32xf32>
    %233 = arith.divf %231, %232 : vector<2x32xf32>
    %234 = arith.mulf %219, %190 : vector<2x32xf32>
    %235 = arith.mulf %210, %224 : vector<2x32xf32>
    %236 = arith.addf %234, %235 : vector<2x32xf32>
    %237 = math.tanh %236 : vector<2x32xf32>
    %238 = arith.mulf %233, %237 : vector<2x32xf32>
    %239 = arith.index_cast %197 : i32 to index
    %c0_75 = arith.constant 0 : index
    %c0_76 = arith.constant 0 : index
    %240 = vector.load %arg3[%239, %c0_75, %c0_76] : memref<8x2x32xf32, #tpu.memory_space<vmem>>, vector<1x2x32xf32>
    %241 = vector.shape_cast %240 : vector<1x2x32xf32> to vector<2x32xf32>
    %242 = vector.shape_cast %238 : vector<2x32xf32> to vector<1x2x32xf32>
    tpu.vector_store %arg3[%239, %c0_75, %c0_76], %242 {strides = array<i32>} : memref<8x2x32xf32, #tpu.memory_space<vmem>>, vector<1x2x32xf32>,
    %c5_i32 = arith.constant 5 : i32
    %c7_i32_77 = arith.constant 7 : i32
    %243 = arith.subi %c7_i32_77, %c5_i32 : i32
    %244 = arith.index_cast %243 : i32 to index
    %c0_78 = arith.constant 0 : index
    %c0_79 = arith.constant 0 : index
    %c0_80 = arith.constant 0 : index
    %245 = vector.load %arg1[%244, %c0_78, %c0_79, %c0_80] : memref<8x4x2x32xf32, #tpu.memory_space<vmem>>, vector<1x4x2x32xf32>
    %246 = vector.shape_cast %245 : vector<1x4x2x32xf32> to vector<4x2x32xf32>
    %247 = arith.truncf %238 : vector<2x32xf32> to vector<2x32xbf16>
    %248 = vector.extract_strided_slice %246 {offsets = [0, 0, 0], sizes = [1, 2, 32], strides = [1, 1, 1]} : vector<4x2x32xf32> to vector<1x2x32xf32>
    %249 = vector.shape_cast %248 : vector<1x2x32xf32> to vector<2x32xf32>
    %cst_81 = arith.constant dense<0.000000e+00> : vector<2x32xf32>
    %250 = tpu.matmul %247, %4, %cst_81 {dimension_numbers = #tpu.dot_dimension_numbers<[1], [0], [0], [1], [0, 0, 1, 1], [], []>} : vector<2x32xbf16>, vector<32x32xbf16>, vector<2x32xf32> -> vector<2x32xf32>
    %251 = arith.addf %249, %250 : vector<2x32xf32>
    %252 = arith.negf %251 : vector<2x32xf32>
    %253 = math.exp %252 : vector<2x32xf32>
    %cst_82 = arith.constant 1.000000e+00 : f32
    %254 = vector.broadcast %cst_82 : f32 to vector<2x32xf32>
    %255 = arith.addf %254, %253 : vector<2x32xf32>
    %256 = arith.divf %254, %255 : vector<2x32xf32>
    %257 = vector.extract_strided_slice %246 {offsets = [1, 0, 0], sizes = [1, 2, 32], strides = [1, 1, 1]} : vector<4x2x32xf32> to vector<1x2x32xf32>
    %258 = vector.shape_cast %257 : vector<1x2x32xf32> to vector<2x32xf32>
    %cst_83 = arith.constant dense<0.000000e+00> : vector<2x32xf32>
    %259 = tpu.matmul %247, %6, %cst_83 {dimension_numbers = #tpu.dot_dimension_numbers<[1], [0], [0], [1], [0, 0, 1, 1], [], []>} : vector<2x32xbf16>, vector<32x32xbf16>, vector<2x32xf32> -> vector<2x32xf32>
    %260 = arith.addf %258, %259 : vector<2x32xf32>
    %261 = arith.negf %260 : vector<2x32xf32>
    %262 = math.exp %261 : vector<2x32xf32>
    %cst_84 = arith.constant 1.000000e+00 : f32
    %263 = vector.broadcast %cst_84 : f32 to vector<2x32xf32>
    %264 = arith.addf %263, %262 : vector<2x32xf32>
    %265 = arith.divf %263, %264 : vector<2x32xf32>
    %266 = vector.extract_strided_slice %246 {offsets = [2, 0, 0], sizes = [1, 2, 32], strides = [1, 1, 1]} : vector<4x2x32xf32> to vector<1x2x32xf32>
    %267 = vector.shape_cast %266 : vector<1x2x32xf32> to vector<2x32xf32>
    %cst_85 = arith.constant dense<0.000000e+00> : vector<2x32xf32>
    %268 = tpu.matmul %247, %8, %cst_85 {dimension_numbers = #tpu.dot_dimension_numbers<[1], [0], [0], [1], [0, 0, 1, 1], [], []>} : vector<2x32xbf16>, vector<32x32xbf16>, vector<2x32xf32> -> vector<2x32xf32>
    %269 = arith.addf %267, %268 : vector<2x32xf32>
    %270 = math.tanh %269 : vector<2x32xf32>
    %271 = vector.extract_strided_slice %246 {offsets = [3, 0, 0], sizes = [1, 2, 32], strides = [1, 1, 1]} : vector<4x2x32xf32> to vector<1x2x32xf32>
    %272 = vector.shape_cast %271 : vector<1x2x32xf32> to vector<2x32xf32>
    %cst_86 = arith.constant dense<0.000000e+00> : vector<2x32xf32>
    %273 = tpu.matmul %247, %10, %cst_86 {dimension_numbers = #tpu.dot_dimension_numbers<[1], [0], [0], [1], [0, 0, 1, 1], [], []>} : vector<2x32xbf16>, vector<32x32xbf16>, vector<2x32xf32> -> vector<2x32xf32>
    %274 = arith.addf %272, %273 : vector<2x32xf32>
    %275 = arith.negf %274 : vector<2x32xf32>
    %276 = math.exp %275 : vector<2x32xf32>
    %cst_87 = arith.constant 1.000000e+00 : f32
    %277 = vector.broadcast %cst_87 : f32 to vector<2x32xf32>
    %278 = arith.addf %277, %276 : vector<2x32xf32>
    %279 = arith.divf %277, %278 : vector<2x32xf32>
    %280 = arith.mulf %265, %236 : vector<2x32xf32>
    %281 = arith.mulf %256, %270 : vector<2x32xf32>
    %282 = arith.addf %280, %281 : vector<2x32xf32>
    %283 = math.tanh %282 : vector<2x32xf32>
    %284 = arith.mulf %279, %283 : vector<2x32xf32>
    %285 = arith.index_cast %243 : i32 to index
    %c0_88 = arith.constant 0 : index
    %c0_89 = arith.constant 0 : index
    %286 = vector.load %arg3[%285, %c0_88, %c0_89] : memref<8x2x32xf32, #tpu.memory_space<vmem>>, vector<1x2x32xf32>
    %287 = vector.shape_cast %286 : vector<1x2x32xf32> to vector<2x32xf32>
    %288 = vector.shape_cast %284 : vector<2x32xf32> to vector<1x2x32xf32>
    tpu.vector_store %arg3[%285, %c0_88, %c0_89], %288 {strides = array<i32>} : memref<8x2x32xf32, #tpu.memory_space<vmem>>, vector<1x2x32xf32>,
    %c6_i32 = arith.constant 6 : i32
    %c7_i32_90 = arith.constant 7 : i32
    %289 = arith.subi %c7_i32_90, %c6_i32 : i32
    %290 = arith.index_cast %289 : i32 to index
    %c0_91 = arith.constant 0 : index
    %c0_92 = arith.constant 0 : index
    %c0_93 = arith.constant 0 : index
    %291 = vector.load %arg1[%290, %c0_91, %c0_92, %c0_93] : memref<8x4x2x32xf32, #tpu.memory_space<vmem>>, vector<1x4x2x32xf32>
    %292 = vector.shape_cast %291 : vector<1x4x2x32xf32> to vector<4x2x32xf32>
    %293 = arith.truncf %284 : vector<2x32xf32> to vector<2x32xbf16>
    %294 = vector.extract_strided_slice %292 {offsets = [0, 0, 0], sizes = [1, 2, 32], strides = [1, 1, 1]} : vector<4x2x32xf32> to vector<1x2x32xf32>
    %295 = vector.shape_cast %294 : vector<1x2x32xf32> to vector<2x32xf32>
    %cst_94 = arith.constant dense<0.000000e+00> : vector<2x32xf32>
    %296 = tpu.matmul %293, %4, %cst_94 {dimension_numbers = #tpu.dot_dimension_numbers<[1], [0], [0], [1], [0, 0, 1, 1], [], []>} : vector<2x32xbf16>, vector<32x32xbf16>, vector<2x32xf32> -> vector<2x32xf32>
    %297 = arith.addf %295, %296 : vector<2x32xf32>
    %298 = arith.negf %297 : vector<2x32xf32>
    %299 = math.exp %298 : vector<2x32xf32>
    %cst_95 = arith.constant 1.000000e+00 : f32
    %300 = vector.broadcast %cst_95 : f32 to vector<2x32xf32>
    %301 = arith.addf %300, %299 : vector<2x32xf32>
    %302 = arith.divf %300, %301 : vector<2x32xf32>
    %303 = vector.extract_strided_slice %292 {offsets = [1, 0, 0], sizes = [1, 2, 32], strides = [1, 1, 1]} : vector<4x2x32xf32> to vector<1x2x32xf32>
    %304 = vector.shape_cast %303 : vector<1x2x32xf32> to vector<2x32xf32>
    %cst_96 = arith.constant dense<0.000000e+00> : vector<2x32xf32>
    %305 = tpu.matmul %293, %6, %cst_96 {dimension_numbers = #tpu.dot_dimension_numbers<[1], [0], [0], [1], [0, 0, 1, 1], [], []>} : vector<2x32xbf16>, vector<32x32xbf16>, vector<2x32xf32> -> vector<2x32xf32>
    %306 = arith.addf %304, %305 : vector<2x32xf32>
    %307 = arith.negf %306 : vector<2x32xf32>
    %308 = math.exp %307 : vector<2x32xf32>
    %cst_97 = arith.constant 1.000000e+00 : f32
    %309 = vector.broadcast %cst_97 : f32 to vector<2x32xf32>
    %310 = arith.addf %309, %308 : vector<2x32xf32>
    %311 = arith.divf %309, %310 : vector<2x32xf32>
    %312 = vector.extract_strided_slice %292 {offsets = [2, 0, 0], sizes = [1, 2, 32], strides = [1, 1, 1]} : vector<4x2x32xf32> to vector<1x2x32xf32>
    %313 = vector.shape_cast %312 : vector<1x2x32xf32> to vector<2x32xf32>
    %cst_98 = arith.constant dense<0.000000e+00> : vector<2x32xf32>
    %314 = tpu.matmul %293, %8, %cst_98 {dimension_numbers = #tpu.dot_dimension_numbers<[1], [0], [0], [1], [0, 0, 1, 1], [], []>} : vector<2x32xbf16>, vector<32x32xbf16>, vector<2x32xf32> -> vector<2x32xf32>
    %315 = arith.addf %313, %314 : vector<2x32xf32>
    %316 = math.tanh %315 : vector<2x32xf32>
    %317 = vector.extract_strided_slice %292 {offsets = [3, 0, 0], sizes = [1, 2, 32], strides = [1, 1, 1]} : vector<4x2x32xf32> to vector<1x2x32xf32>
    %318 = vector.shape_cast %317 : vector<1x2x32xf32> to vector<2x32xf32>
    %cst_99 = arith.constant dense<0.000000e+00> : vector<2x32xf32>
    %319 = tpu.matmul %293, %10, %cst_99 {dimension_numbers = #tpu.dot_dimension_numbers<[1], [0], [0], [1], [0, 0, 1, 1], [], []>} : vector<2x32xbf16>, vector<32x32xbf16>, vector<2x32xf32> -> vector<2x32xf32>
    %320 = arith.addf %318, %319 : vector<2x32xf32>
    %321 = arith.negf %320 : vector<2x32xf32>
    %322 = math.exp %321 : vector<2x32xf32>
    %cst_100 = arith.constant 1.000000e+00 : f32
    %323 = vector.broadcast %cst_100 : f32 to vector<2x32xf32>
    %324 = arith.addf %323, %322 : vector<2x32xf32>
    %325 = arith.divf %323, %324 : vector<2x32xf32>
    %326 = arith.mulf %311, %282 : vector<2x32xf32>
    %327 = arith.mulf %302, %316 : vector<2x32xf32>
    %328 = arith.addf %326, %327 : vector<2x32xf32>
    %329 = math.tanh %328 : vector<2x32xf32>
    %330 = arith.mulf %325, %329 : vector<2x32xf32>
    %331 = arith.index_cast %289 : i32 to index
    %c0_101 = arith.constant 0 : index
    %c0_102 = arith.constant 0 : index
    %332 = vector.load %arg3[%331, %c0_101, %c0_102] : memref<8x2x32xf32, #tpu.memory_space<vmem>>, vector<1x2x32xf32>
    %333 = vector.shape_cast %332 : vector<1x2x32xf32> to vector<2x32xf32>
    %334 = vector.shape_cast %330 : vector<2x32xf32> to vector<1x2x32xf32>
    tpu.vector_store %arg3[%331, %c0_101, %c0_102], %334 {strides = array<i32>} : memref<8x2x32xf32, #tpu.memory_space<vmem>>, vector<1x2x32xf32>,
    %c7_i32_103 = arith.constant 7 : i32
    %c7_i32_104 = arith.constant 7 : i32
    %335 = arith.subi %c7_i32_104, %c7_i32_103 : i32
    %336 = arith.index_cast %335 : i32 to index
    %c0_105 = arith.constant 0 : index
    %c0_106 = arith.constant 0 : index
    %c0_107 = arith.constant 0 : index
    %337 = vector.load %arg1[%336, %c0_105, %c0_106, %c0_107] : memref<8x4x2x32xf32, #tpu.memory_space<vmem>>, vector<1x4x2x32xf32>
    %338 = vector.shape_cast %337 : vector<1x4x2x32xf32> to vector<4x2x32xf32>
    %339 = arith.truncf %330 : vector<2x32xf32> to vector<2x32xbf16>
    %340 = vector.extract_strided_slice %338 {offsets = [0, 0, 0], sizes = [1, 2, 32], strides = [1, 1, 1]} : vector<4x2x32xf32> to vector<1x2x32xf32>
    %341 = vector.shape_cast %340 : vector<1x2x32xf32> to vector<2x32xf32>
    %cst_108 = arith.constant dense<0.000000e+00> : vector<2x32xf32>
    %342 = tpu.matmul %339, %4, %cst_108 {dimension_numbers = #tpu.dot_dimension_numbers<[1], [0], [0], [1], [0, 0, 1, 1], [], []>} : vector<2x32xbf16>, vector<32x32xbf16>, vector<2x32xf32> -> vector<2x32xf32>
    %343 = arith.addf %341, %342 : vector<2x32xf32>
    %344 = arith.negf %343 : vector<2x32xf32>
    %345 = math.exp %344 : vector<2x32xf32>
    %cst_109 = arith.constant 1.000000e+00 : f32
    %346 = vector.broadcast %cst_109 : f32 to vector<2x32xf32>
    %347 = arith.addf %346, %345 : vector<2x32xf32>
    %348 = arith.divf %346, %347 : vector<2x32xf32>
    %349 = vector.extract_strided_slice %338 {offsets = [1, 0, 0], sizes = [1, 2, 32], strides = [1, 1, 1]} : vector<4x2x32xf32> to vector<1x2x32xf32>
    %350 = vector.shape_cast %349 : vector<1x2x32xf32> to vector<2x32xf32>
    %cst_110 = arith.constant dense<0.000000e+00> : vector<2x32xf32>
    %351 = tpu.matmul %339, %6, %cst_110 {dimension_numbers = #tpu.dot_dimension_numbers<[1], [0], [0], [1], [0, 0, 1, 1], [], []>} : vector<2x32xbf16>, vector<32x32xbf16>, vector<2x32xf32> -> vector<2x32xf32>
    %352 = arith.addf %350, %351 : vector<2x32xf32>
    %353 = arith.negf %352 : vector<2x32xf32>
    %354 = math.exp %353 : vector<2x32xf32>
    %cst_111 = arith.constant 1.000000e+00 : f32
    %355 = vector.broadcast %cst_111 : f32 to vector<2x32xf32>
    %356 = arith.addf %355, %354 : vector<2x32xf32>
    %357 = arith.divf %355, %356 : vector<2x32xf32>
    %358 = vector.extract_strided_slice %338 {offsets = [2, 0, 0], sizes = [1, 2, 32], strides = [1, 1, 1]} : vector<4x2x32xf32> to vector<1x2x32xf32>
    %359 = vector.shape_cast %358 : vector<1x2x32xf32> to vector<2x32xf32>
    %cst_112 = arith.constant dense<0.000000e+00> : vector<2x32xf32>
    %360 = tpu.matmul %339, %8, %cst_112 {dimension_numbers = #tpu.dot_dimension_numbers<[1], [0], [0], [1], [0, 0, 1, 1], [], []>} : vector<2x32xbf16>, vector<32x32xbf16>, vector<2x32xf32> -> vector<2x32xf32>
    %361 = arith.addf %359, %360 : vector<2x32xf32>
    %362 = math.tanh %361 : vector<2x32xf32>
    %363 = vector.extract_strided_slice %338 {offsets = [3, 0, 0], sizes = [1, 2, 32], strides = [1, 1, 1]} : vector<4x2x32xf32> to vector<1x2x32xf32>
    %364 = vector.shape_cast %363 : vector<1x2x32xf32> to vector<2x32xf32>
    %cst_113 = arith.constant dense<0.000000e+00> : vector<2x32xf32>
    %365 = tpu.matmul %339, %10, %cst_113 {dimension_numbers = #tpu.dot_dimension_numbers<[1], [0], [0], [1], [0, 0, 1, 1], [], []>} : vector<2x32xbf16>, vector<32x32xbf16>, vector<2x32xf32> -> vector<2x32xf32>
    %366 = arith.addf %364, %365 : vector<2x32xf32>
    %367 = arith.negf %366 : vector<2x32xf32>
    %368 = math.exp %367 : vector<2x32xf32>
    %cst_114 = arith.constant 1.000000e+00 : f32
    %369 = vector.broadcast %cst_114 : f32 to vector<2x32xf32>
    %370 = arith.addf %369, %368 : vector<2x32xf32>
    %371 = arith.divf %369, %370 : vector<2x32xf32>
    %372 = arith.mulf %357, %328 : vector<2x32xf32>
    %373 = arith.mulf %348, %362 : vector<2x32xf32>
    %374 = arith.addf %372, %373 : vector<2x32xf32>
    %375 = math.tanh %374 : vector<2x32xf32>
    %376 = arith.mulf %371, %375 : vector<2x32xf32>
    %377 = arith.index_cast %335 : i32 to index
    %c0_115 = arith.constant 0 : index
    %c0_116 = arith.constant 0 : index
    %378 = vector.load %arg3[%377, %c0_115, %c0_116] : memref<8x2x32xf32, #tpu.memory_space<vmem>>, vector<1x2x32xf32>
    %379 = vector.shape_cast %378 : vector<1x2x32xf32> to vector<2x32xf32>
    %380 = vector.shape_cast %376 : vector<2x32xf32> to vector<1x2x32xf32>
    tpu.vector_store %arg3[%377, %c0_115, %c0_116], %380 {strides = array<i32>} : memref<8x2x32xf32, #tpu.memory_space<vmem>>, vector<1x2x32xf32>,
    %c8_i32 = arith.constant 8 : i32
    %c0_117 = arith.constant 0 : index
    %c0_118 = arith.constant 0 : index
    %381 = vector.load %arg4[%c0_117, %c0_118] : memref<2x32xf32, #tpu.memory_space<vmem>>, vector<2x32xf32>
    tpu.vector_store %arg4[%c0_117, %c0_118], %376 {strides = array<i32>} : memref<2x32xf32, #tpu.memory_space<vmem>>, vector<2x32xf32>,
    %c0_119 = arith.constant 0 : index
    %c0_120 = arith.constant 0 : index
    %382 = vector.load %arg5[%c0_119, %c0_120] : memref<2x32xf32, #tpu.memory_space<vmem>>, vector<2x32xf32>
    tpu.vector_store %arg5[%c0_119, %c0_120], %374 {strides = array<i32>} : memref<2x32xf32, #tpu.memory_space<vmem>>, vector<2x32xf32>,
    return
  }
  func.func @transform_0(%arg0: i32) -> (i32, i32, i32, i32) {
    %c0_i32 = arith.constant 0 : i32
    %0 = arith.subi %c0_i32, %arg0 : i32
    %c0_i32_0 = arith.constant 0 : i32
    %c0_i32_1 = arith.constant 0 : i32
    %c0_i32_2 = arith.constant 0 : i32
    %c0_i32_3 = arith.constant 0 : i32
    return %0, %c0_i32_0, %c0_i32_1, %c0_i32_2 : i32, i32, i32, i32
  }
  func.func @transform_1(%arg0: i32) -> (i32, i32, i32) {
    %c0_i32 = arith.constant 0 : i32
    %c0_i32_0 = arith.constant 0 : i32
    %c0_i32_1 = arith.constant 0 : i32
    %c0_i32_2 = arith.constant 0 : i32
    return %c0_i32, %c0_i32_0, %c0_i32_1 : i32, i32, i32
  }
  func.func @transform_2(%arg0: i32) -> (i32, i32, i32) {
    %c0_i32 = arith.constant 0 : i32
    %0 = arith.subi %c0_i32, %arg0 : i32
    %c0_i32_0 = arith.constant 0 : i32
    %c0_i32_1 = arith.constant 0 : i32
    %c0_i32_2 = arith.constant 0 : i32
    return %0, %c0_i32_0, %c0_i32_1 : i32, i32, i32
  }
}

module attributes {stable_mosaic.version = 11 : i64} {
  func.func @_lstm_rec_kernel(%arg0: i32, %arg1: memref<8x4x2x32xf32, #tpu.memory_space<vmem>>, %arg2: memref<4x32x32xbf16, #tpu.memory_space<vmem>>, %arg3: memref<8x2x32xf32, #tpu.memory_space<vmem>>, %arg4: memref<2x32xf32, #tpu.memory_space<vmem>>, %arg5: memref<2x32xf32, #tpu.memory_space<vmem>>) attributes {dimension_semantics = [#tpu.dimension_semantics<arbitrary>], iteration_bounds = array<i64: 1>, scalar_prefetch = 0 : i64, scratch_operands = 2 : i64, tpu.core_type = #tpu.core_type<tc>, window_params = [{transform_indices = @transform_0, window_bounds = array<i64: 8, 4, 2, 32>}, {pipeline_mode = #tpu.pipeline_mode<synchronous>, transform_indices = @transform_1, window_bounds = array<i64: 4, 32, 32>}, {transform_indices = @transform_2, window_bounds = array<i64: 8, 2, 32>}]} {
    %c0_i32 = arith.constant 0 : i32
    %0 = arith.cmpi eq, %arg0, %c0_i32 : i32
    %1 = arith.extui %0 : i1 to i32
    %c0_i32_0 = arith.constant 0 : i32
    %2 = arith.cmpi ne, %1, %c0_i32_0 : i32
    scf.if %2 {
      %cst_113 = arith.constant 0.000000e+00 : f32
      %375 = vector.broadcast %cst_113 : f32 to vector<2x32xf32>
      %c0_114 = arith.constant 0 : index
      %c0_115 = arith.constant 0 : index
      %376 = vector.load %arg4[%c0_114, %c0_115] : memref<2x32xf32, #tpu.memory_space<vmem>>, vector<2x32xf32>
      tpu.vector_store %arg4[%c0_114, %c0_115], %375 {strides = array<i32>} : memref<2x32xf32, #tpu.memory_space<vmem>>, vector<2x32xf32>,
      %cst_116 = arith.constant 0.000000e+00 : f32
      %377 = vector.broadcast %cst_116 : f32 to vector<2x32xf32>
      %c0_117 = arith.constant 0 : index
      %c0_118 = arith.constant 0 : index
      %378 = vector.load %arg5[%c0_117, %c0_118] : memref<2x32xf32, #tpu.memory_space<vmem>>, vector<2x32xf32>
      tpu.vector_store %arg5[%c0_117, %c0_118], %377 {strides = array<i32>} : memref<2x32xf32, #tpu.memory_space<vmem>>, vector<2x32xf32>,
    } else {
    }
    %c0 = arith.constant 0 : index
    %c0_1 = arith.constant 0 : index
    %c0_2 = arith.constant 0 : index
    %3 = vector.load %arg2[%c0, %c0_1, %c0_2] : memref<4x32x32xbf16, #tpu.memory_space<vmem>>, vector<1x32x32xbf16>
    %4 = vector.shape_cast %3 : vector<1x32x32xbf16> to vector<32x32xbf16>
    %c1 = arith.constant 1 : index
    %c0_3 = arith.constant 0 : index
    %c0_4 = arith.constant 0 : index
    %5 = vector.load %arg2[%c1, %c0_3, %c0_4] : memref<4x32x32xbf16, #tpu.memory_space<vmem>>, vector<1x32x32xbf16>
    %6 = vector.shape_cast %5 : vector<1x32x32xbf16> to vector<32x32xbf16>
    %c2 = arith.constant 2 : index
    %c0_5 = arith.constant 0 : index
    %c0_6 = arith.constant 0 : index
    %7 = vector.load %arg2[%c2, %c0_5, %c0_6] : memref<4x32x32xbf16, #tpu.memory_space<vmem>>, vector<1x32x32xbf16>
    %8 = vector.shape_cast %7 : vector<1x32x32xbf16> to vector<32x32xbf16>
    %c3 = arith.constant 3 : index
    %c0_7 = arith.constant 0 : index
    %c0_8 = arith.constant 0 : index
    %9 = vector.load %arg2[%c3, %c0_7, %c0_8] : memref<4x32x32xbf16, #tpu.memory_space<vmem>>, vector<1x32x32xbf16>
    %10 = vector.shape_cast %9 : vector<1x32x32xbf16> to vector<32x32xbf16>
    %c0_9 = arith.constant 0 : index
    %c0_10 = arith.constant 0 : index
    %11 = vector.load %arg4[%c0_9, %c0_10] : memref<2x32xf32, #tpu.memory_space<vmem>>, vector<2x32xf32>
    %c0_11 = arith.constant 0 : index
    %c0_12 = arith.constant 0 : index
    %12 = vector.load %arg5[%c0_11, %c0_12] : memref<2x32xf32, #tpu.memory_space<vmem>>, vector<2x32xf32>
    %c0_i32_13 = arith.constant 0 : i32
    %13 = arith.index_cast %c0_i32_13 : i32 to index
    %c0_14 = arith.constant 0 : index
    %c0_15 = arith.constant 0 : index
    %c0_16 = arith.constant 0 : index
    %14 = vector.load %arg1[%13, %c0_14, %c0_15, %c0_16] : memref<8x4x2x32xf32, #tpu.memory_space<vmem>>, vector<1x4x2x32xf32>
    %15 = vector.shape_cast %14 : vector<1x4x2x32xf32> to vector<4x2x32xf32>
    %16 = arith.truncf %11 : vector<2x32xf32> to vector<2x32xbf16>
    %17 = vector.extract_strided_slice %15 {offsets = [0, 0, 0], sizes = [1, 2, 32], strides = [1, 1, 1]} : vector<4x2x32xf32> to vector<1x2x32xf32>
    %18 = vector.shape_cast %17 : vector<1x2x32xf32> to vector<2x32xf32>
    %cst = arith.constant dense<0.000000e+00> : vector<2x32xf32>
    %19 = tpu.matmul %16, %4, %cst {dimension_numbers = #tpu.dot_dimension_numbers<[1], [0], [0], [1], [0, 0, 1, 1], [], []>} : vector<2x32xbf16>, vector<32x32xbf16>, vector<2x32xf32> -> vector<2x32xf32>
    %20 = arith.addf %18, %19 : vector<2x32xf32>
    %21 = arith.negf %20 : vector<2x32xf32>
    %22 = math.exp %21 : vector<2x32xf32>
    %cst_17 = arith.constant 1.000000e+00 : f32
    %23 = vector.broadcast %cst_17 : f32 to vector<2x32xf32>
    %24 = arith.addf %23, %22 : vector<2x32xf32>
    %25 = arith.divf %23, %24 : vector<2x32xf32>
    %26 = vector.extract_strided_slice %15 {offsets = [1, 0, 0], sizes = [1, 2, 32], strides = [1, 1, 1]} : vector<4x2x32xf32> to vector<1x2x32xf32>
    %27 = vector.shape_cast %26 : vector<1x2x32xf32> to vector<2x32xf32>
    %cst_18 = arith.constant dense<0.000000e+00> : vector<2x32xf32>
    %28 = tpu.matmul %16, %6, %cst_18 {dimension_numbers = #tpu.dot_dimension_numbers<[1], [0], [0], [1], [0, 0, 1, 1], [], []>} : vector<2x32xbf16>, vector<32x32xbf16>, vector<2x32xf32> -> vector<2x32xf32>
    %29 = arith.addf %27, %28 : vector<2x32xf32>
    %30 = arith.negf %29 : vector<2x32xf32>
    %31 = math.exp %30 : vector<2x32xf32>
    %cst_19 = arith.constant 1.000000e+00 : f32
    %32 = vector.broadcast %cst_19 : f32 to vector<2x32xf32>
    %33 = arith.addf %32, %31 : vector<2x32xf32>
    %34 = arith.divf %32, %33 : vector<2x32xf32>
    %35 = vector.extract_strided_slice %15 {offsets = [2, 0, 0], sizes = [1, 2, 32], strides = [1, 1, 1]} : vector<4x2x32xf32> to vector<1x2x32xf32>
    %36 = vector.shape_cast %35 : vector<1x2x32xf32> to vector<2x32xf32>
    %cst_20 = arith.constant dense<0.000000e+00> : vector<2x32xf32>
    %37 = tpu.matmul %16, %8, %cst_20 {dimension_numbers = #tpu.dot_dimension_numbers<[1], [0], [0], [1], [0, 0, 1, 1], [], []>} : vector<2x32xbf16>, vector<32x32xbf16>, vector<2x32xf32> -> vector<2x32xf32>
    %38 = arith.addf %36, %37 : vector<2x32xf32>
    %39 = math.tanh %38 : vector<2x32xf32>
    %40 = vector.extract_strided_slice %15 {offsets = [3, 0, 0], sizes = [1, 2, 32], strides = [1, 1, 1]} : vector<4x2x32xf32> to vector<1x2x32xf32>
    %41 = vector.shape_cast %40 : vector<1x2x32xf32> to vector<2x32xf32>
    %cst_21 = arith.constant dense<0.000000e+00> : vector<2x32xf32>
    %42 = tpu.matmul %16, %10, %cst_21 {dimension_numbers = #tpu.dot_dimension_numbers<[1], [0], [0], [1], [0, 0, 1, 1], [], []>} : vector<2x32xbf16>, vector<32x32xbf16>, vector<2x32xf32> -> vector<2x32xf32>
    %43 = arith.addf %41, %42 : vector<2x32xf32>
    %44 = arith.negf %43 : vector<2x32xf32>
    %45 = math.exp %44 : vector<2x32xf32>
    %cst_22 = arith.constant 1.000000e+00 : f32
    %46 = vector.broadcast %cst_22 : f32 to vector<2x32xf32>
    %47 = arith.addf %46, %45 : vector<2x32xf32>
    %48 = arith.divf %46, %47 : vector<2x32xf32>
    %49 = arith.mulf %34, %12 : vector<2x32xf32>
    %50 = arith.mulf %25, %39 : vector<2x32xf32>
    %51 = arith.addf %49, %50 : vector<2x32xf32>
    %52 = math.tanh %51 : vector<2x32xf32>
    %53 = arith.mulf %48, %52 : vector<2x32xf32>
    %54 = arith.index_cast %c0_i32_13 : i32 to index
    %c0_23 = arith.constant 0 : index
    %c0_24 = arith.constant 0 : index
    %55 = vector.load %arg3[%54, %c0_23, %c0_24] : memref<8x2x32xf32, #tpu.memory_space<vmem>>, vector<1x2x32xf32>
    %56 = vector.shape_cast %55 : vector<1x2x32xf32> to vector<2x32xf32>
    %57 = vector.shape_cast %53 : vector<2x32xf32> to vector<1x2x32xf32>
    tpu.vector_store %arg3[%54, %c0_23, %c0_24], %57 {strides = array<i32>} : memref<8x2x32xf32, #tpu.memory_space<vmem>>, vector<1x2x32xf32>,
    %c1_i32 = arith.constant 1 : i32
    %58 = arith.index_cast %c1_i32 : i32 to index
    %c0_25 = arith.constant 0 : index
    %c0_26 = arith.constant 0 : index
    %c0_27 = arith.constant 0 : index
    %59 = vector.load %arg1[%58, %c0_25, %c0_26, %c0_27] : memref<8x4x2x32xf32, #tpu.memory_space<vmem>>, vector<1x4x2x32xf32>
    %60 = vector.shape_cast %59 : vector<1x4x2x32xf32> to vector<4x2x32xf32>
    %61 = arith.truncf %53 : vector<2x32xf32> to vector<2x32xbf16>
    %62 = vector.extract_strided_slice %60 {offsets = [0, 0, 0], sizes = [1, 2, 32], strides = [1, 1, 1]} : vector<4x2x32xf32> to vector<1x2x32xf32>
    %63 = vector.shape_cast %62 : vector<1x2x32xf32> to vector<2x32xf32>
    %cst_28 = arith.constant dense<0.000000e+00> : vector<2x32xf32>
    %64 = tpu.matmul %61, %4, %cst_28 {dimension_numbers = #tpu.dot_dimension_numbers<[1], [0], [0], [1], [0, 0, 1, 1], [], []>} : vector<2x32xbf16>, vector<32x32xbf16>, vector<2x32xf32> -> vector<2x32xf32>
    %65 = arith.addf %63, %64 : vector<2x32xf32>
    %66 = arith.negf %65 : vector<2x32xf32>
    %67 = math.exp %66 : vector<2x32xf32>
    %cst_29 = arith.constant 1.000000e+00 : f32
    %68 = vector.broadcast %cst_29 : f32 to vector<2x32xf32>
    %69 = arith.addf %68, %67 : vector<2x32xf32>
    %70 = arith.divf %68, %69 : vector<2x32xf32>
    %71 = vector.extract_strided_slice %60 {offsets = [1, 0, 0], sizes = [1, 2, 32], strides = [1, 1, 1]} : vector<4x2x32xf32> to vector<1x2x32xf32>
    %72 = vector.shape_cast %71 : vector<1x2x32xf32> to vector<2x32xf32>
    %cst_30 = arith.constant dense<0.000000e+00> : vector<2x32xf32>
    %73 = tpu.matmul %61, %6, %cst_30 {dimension_numbers = #tpu.dot_dimension_numbers<[1], [0], [0], [1], [0, 0, 1, 1], [], []>} : vector<2x32xbf16>, vector<32x32xbf16>, vector<2x32xf32> -> vector<2x32xf32>
    %74 = arith.addf %72, %73 : vector<2x32xf32>
    %75 = arith.negf %74 : vector<2x32xf32>
    %76 = math.exp %75 : vector<2x32xf32>
    %cst_31 = arith.constant 1.000000e+00 : f32
    %77 = vector.broadcast %cst_31 : f32 to vector<2x32xf32>
    %78 = arith.addf %77, %76 : vector<2x32xf32>
    %79 = arith.divf %77, %78 : vector<2x32xf32>
    %80 = vector.extract_strided_slice %60 {offsets = [2, 0, 0], sizes = [1, 2, 32], strides = [1, 1, 1]} : vector<4x2x32xf32> to vector<1x2x32xf32>
    %81 = vector.shape_cast %80 : vector<1x2x32xf32> to vector<2x32xf32>
    %cst_32 = arith.constant dense<0.000000e+00> : vector<2x32xf32>
    %82 = tpu.matmul %61, %8, %cst_32 {dimension_numbers = #tpu.dot_dimension_numbers<[1], [0], [0], [1], [0, 0, 1, 1], [], []>} : vector<2x32xbf16>, vector<32x32xbf16>, vector<2x32xf32> -> vector<2x32xf32>
    %83 = arith.addf %81, %82 : vector<2x32xf32>
    %84 = math.tanh %83 : vector<2x32xf32>
    %85 = vector.extract_strided_slice %60 {offsets = [3, 0, 0], sizes = [1, 2, 32], strides = [1, 1, 1]} : vector<4x2x32xf32> to vector<1x2x32xf32>
    %86 = vector.shape_cast %85 : vector<1x2x32xf32> to vector<2x32xf32>
    %cst_33 = arith.constant dense<0.000000e+00> : vector<2x32xf32>
    %87 = tpu.matmul %61, %10, %cst_33 {dimension_numbers = #tpu.dot_dimension_numbers<[1], [0], [0], [1], [0, 0, 1, 1], [], []>} : vector<2x32xbf16>, vector<32x32xbf16>, vector<2x32xf32> -> vector<2x32xf32>
    %88 = arith.addf %86, %87 : vector<2x32xf32>
    %89 = arith.negf %88 : vector<2x32xf32>
    %90 = math.exp %89 : vector<2x32xf32>
    %cst_34 = arith.constant 1.000000e+00 : f32
    %91 = vector.broadcast %cst_34 : f32 to vector<2x32xf32>
    %92 = arith.addf %91, %90 : vector<2x32xf32>
    %93 = arith.divf %91, %92 : vector<2x32xf32>
    %94 = arith.mulf %79, %51 : vector<2x32xf32>
    %95 = arith.mulf %70, %84 : vector<2x32xf32>
    %96 = arith.addf %94, %95 : vector<2x32xf32>
    %97 = math.tanh %96 : vector<2x32xf32>
    %98 = arith.mulf %93, %97 : vector<2x32xf32>
    %99 = arith.index_cast %c1_i32 : i32 to index
    %c0_35 = arith.constant 0 : index
    %c0_36 = arith.constant 0 : index
    %100 = vector.load %arg3[%99, %c0_35, %c0_36] : memref<8x2x32xf32, #tpu.memory_space<vmem>>, vector<1x2x32xf32>
    %101 = vector.shape_cast %100 : vector<1x2x32xf32> to vector<2x32xf32>
    %102 = vector.shape_cast %98 : vector<2x32xf32> to vector<1x2x32xf32>
    tpu.vector_store %arg3[%99, %c0_35, %c0_36], %102 {strides = array<i32>} : memref<8x2x32xf32, #tpu.memory_space<vmem>>, vector<1x2x32xf32>,
    %c2_i32 = arith.constant 2 : i32
    %103 = arith.index_cast %c2_i32 : i32 to index
    %c0_37 = arith.constant 0 : index
    %c0_38 = arith.constant 0 : index
    %c0_39 = arith.constant 0 : index
    %104 = vector.load %arg1[%103, %c0_37, %c0_38, %c0_39] : memref<8x4x2x32xf32, #tpu.memory_space<vmem>>, vector<1x4x2x32xf32>
    %105 = vector.shape_cast %104 : vector<1x4x2x32xf32> to vector<4x2x32xf32>
    %106 = arith.truncf %98 : vector<2x32xf32> to vector<2x32xbf16>
    %107 = vector.extract_strided_slice %105 {offsets = [0, 0, 0], sizes = [1, 2, 32], strides = [1, 1, 1]} : vector<4x2x32xf32> to vector<1x2x32xf32>
    %108 = vector.shape_cast %107 : vector<1x2x32xf32> to vector<2x32xf32>
    %cst_40 = arith.constant dense<0.000000e+00> : vector<2x32xf32>
    %109 = tpu.matmul %106, %4, %cst_40 {dimension_numbers = #tpu.dot_dimension_numbers<[1], [0], [0], [1], [0, 0, 1, 1], [], []>} : vector<2x32xbf16>, vector<32x32xbf16>, vector<2x32xf32> -> vector<2x32xf32>
    %110 = arith.addf %108, %109 : vector<2x32xf32>
    %111 = arith.negf %110 : vector<2x32xf32>
    %112 = math.exp %111 : vector<2x32xf32>
    %cst_41 = arith.constant 1.000000e+00 : f32
    %113 = vector.broadcast %cst_41 : f32 to vector<2x32xf32>
    %114 = arith.addf %113, %112 : vector<2x32xf32>
    %115 = arith.divf %113, %114 : vector<2x32xf32>
    %116 = vector.extract_strided_slice %105 {offsets = [1, 0, 0], sizes = [1, 2, 32], strides = [1, 1, 1]} : vector<4x2x32xf32> to vector<1x2x32xf32>
    %117 = vector.shape_cast %116 : vector<1x2x32xf32> to vector<2x32xf32>
    %cst_42 = arith.constant dense<0.000000e+00> : vector<2x32xf32>
    %118 = tpu.matmul %106, %6, %cst_42 {dimension_numbers = #tpu.dot_dimension_numbers<[1], [0], [0], [1], [0, 0, 1, 1], [], []>} : vector<2x32xbf16>, vector<32x32xbf16>, vector<2x32xf32> -> vector<2x32xf32>
    %119 = arith.addf %117, %118 : vector<2x32xf32>
    %120 = arith.negf %119 : vector<2x32xf32>
    %121 = math.exp %120 : vector<2x32xf32>
    %cst_43 = arith.constant 1.000000e+00 : f32
    %122 = vector.broadcast %cst_43 : f32 to vector<2x32xf32>
    %123 = arith.addf %122, %121 : vector<2x32xf32>
    %124 = arith.divf %122, %123 : vector<2x32xf32>
    %125 = vector.extract_strided_slice %105 {offsets = [2, 0, 0], sizes = [1, 2, 32], strides = [1, 1, 1]} : vector<4x2x32xf32> to vector<1x2x32xf32>
    %126 = vector.shape_cast %125 : vector<1x2x32xf32> to vector<2x32xf32>
    %cst_44 = arith.constant dense<0.000000e+00> : vector<2x32xf32>
    %127 = tpu.matmul %106, %8, %cst_44 {dimension_numbers = #tpu.dot_dimension_numbers<[1], [0], [0], [1], [0, 0, 1, 1], [], []>} : vector<2x32xbf16>, vector<32x32xbf16>, vector<2x32xf32> -> vector<2x32xf32>
    %128 = arith.addf %126, %127 : vector<2x32xf32>
    %129 = math.tanh %128 : vector<2x32xf32>
    %130 = vector.extract_strided_slice %105 {offsets = [3, 0, 0], sizes = [1, 2, 32], strides = [1, 1, 1]} : vector<4x2x32xf32> to vector<1x2x32xf32>
    %131 = vector.shape_cast %130 : vector<1x2x32xf32> to vector<2x32xf32>
    %cst_45 = arith.constant dense<0.000000e+00> : vector<2x32xf32>
    %132 = tpu.matmul %106, %10, %cst_45 {dimension_numbers = #tpu.dot_dimension_numbers<[1], [0], [0], [1], [0, 0, 1, 1], [], []>} : vector<2x32xbf16>, vector<32x32xbf16>, vector<2x32xf32> -> vector<2x32xf32>
    %133 = arith.addf %131, %132 : vector<2x32xf32>
    %134 = arith.negf %133 : vector<2x32xf32>
    %135 = math.exp %134 : vector<2x32xf32>
    %cst_46 = arith.constant 1.000000e+00 : f32
    %136 = vector.broadcast %cst_46 : f32 to vector<2x32xf32>
    %137 = arith.addf %136, %135 : vector<2x32xf32>
    %138 = arith.divf %136, %137 : vector<2x32xf32>
    %139 = arith.mulf %124, %96 : vector<2x32xf32>
    %140 = arith.mulf %115, %129 : vector<2x32xf32>
    %141 = arith.addf %139, %140 : vector<2x32xf32>
    %142 = math.tanh %141 : vector<2x32xf32>
    %143 = arith.mulf %138, %142 : vector<2x32xf32>
    %144 = arith.index_cast %c2_i32 : i32 to index
    %c0_47 = arith.constant 0 : index
    %c0_48 = arith.constant 0 : index
    %145 = vector.load %arg3[%144, %c0_47, %c0_48] : memref<8x2x32xf32, #tpu.memory_space<vmem>>, vector<1x2x32xf32>
    %146 = vector.shape_cast %145 : vector<1x2x32xf32> to vector<2x32xf32>
    %147 = vector.shape_cast %143 : vector<2x32xf32> to vector<1x2x32xf32>
    tpu.vector_store %arg3[%144, %c0_47, %c0_48], %147 {strides = array<i32>} : memref<8x2x32xf32, #tpu.memory_space<vmem>>, vector<1x2x32xf32>,
    %c3_i32 = arith.constant 3 : i32
    %148 = arith.index_cast %c3_i32 : i32 to index
    %c0_49 = arith.constant 0 : index
    %c0_50 = arith.constant 0 : index
    %c0_51 = arith.constant 0 : index
    %149 = vector.load %arg1[%148, %c0_49, %c0_50, %c0_51] : memref<8x4x2x32xf32, #tpu.memory_space<vmem>>, vector<1x4x2x32xf32>
    %150 = vector.shape_cast %149 : vector<1x4x2x32xf32> to vector<4x2x32xf32>
    %151 = arith.truncf %143 : vector<2x32xf32> to vector<2x32xbf16>
    %152 = vector.extract_strided_slice %150 {offsets = [0, 0, 0], sizes = [1, 2, 32], strides = [1, 1, 1]} : vector<4x2x32xf32> to vector<1x2x32xf32>
    %153 = vector.shape_cast %152 : vector<1x2x32xf32> to vector<2x32xf32>
    %cst_52 = arith.constant dense<0.000000e+00> : vector<2x32xf32>
    %154 = tpu.matmul %151, %4, %cst_52 {dimension_numbers = #tpu.dot_dimension_numbers<[1], [0], [0], [1], [0, 0, 1, 1], [], []>} : vector<2x32xbf16>, vector<32x32xbf16>, vector<2x32xf32> -> vector<2x32xf32>
    %155 = arith.addf %153, %154 : vector<2x32xf32>
    %156 = arith.negf %155 : vector<2x32xf32>
    %157 = math.exp %156 : vector<2x32xf32>
    %cst_53 = arith.constant 1.000000e+00 : f32
    %158 = vector.broadcast %cst_53 : f32 to vector<2x32xf32>
    %159 = arith.addf %158, %157 : vector<2x32xf32>
    %160 = arith.divf %158, %159 : vector<2x32xf32>
    %161 = vector.extract_strided_slice %150 {offsets = [1, 0, 0], sizes = [1, 2, 32], strides = [1, 1, 1]} : vector<4x2x32xf32> to vector<1x2x32xf32>
    %162 = vector.shape_cast %161 : vector<1x2x32xf32> to vector<2x32xf32>
    %cst_54 = arith.constant dense<0.000000e+00> : vector<2x32xf32>
    %163 = tpu.matmul %151, %6, %cst_54 {dimension_numbers = #tpu.dot_dimension_numbers<[1], [0], [0], [1], [0, 0, 1, 1], [], []>} : vector<2x32xbf16>, vector<32x32xbf16>, vector<2x32xf32> -> vector<2x32xf32>
    %164 = arith.addf %162, %163 : vector<2x32xf32>
    %165 = arith.negf %164 : vector<2x32xf32>
    %166 = math.exp %165 : vector<2x32xf32>
    %cst_55 = arith.constant 1.000000e+00 : f32
    %167 = vector.broadcast %cst_55 : f32 to vector<2x32xf32>
    %168 = arith.addf %167, %166 : vector<2x32xf32>
    %169 = arith.divf %167, %168 : vector<2x32xf32>
    %170 = vector.extract_strided_slice %150 {offsets = [2, 0, 0], sizes = [1, 2, 32], strides = [1, 1, 1]} : vector<4x2x32xf32> to vector<1x2x32xf32>
    %171 = vector.shape_cast %170 : vector<1x2x32xf32> to vector<2x32xf32>
    %cst_56 = arith.constant dense<0.000000e+00> : vector<2x32xf32>
    %172 = tpu.matmul %151, %8, %cst_56 {dimension_numbers = #tpu.dot_dimension_numbers<[1], [0], [0], [1], [0, 0, 1, 1], [], []>} : vector<2x32xbf16>, vector<32x32xbf16>, vector<2x32xf32> -> vector<2x32xf32>
    %173 = arith.addf %171, %172 : vector<2x32xf32>
    %174 = math.tanh %173 : vector<2x32xf32>
    %175 = vector.extract_strided_slice %150 {offsets = [3, 0, 0], sizes = [1, 2, 32], strides = [1, 1, 1]} : vector<4x2x32xf32> to vector<1x2x32xf32>
    %176 = vector.shape_cast %175 : vector<1x2x32xf32> to vector<2x32xf32>
    %cst_57 = arith.constant dense<0.000000e+00> : vector<2x32xf32>
    %177 = tpu.matmul %151, %10, %cst_57 {dimension_numbers = #tpu.dot_dimension_numbers<[1], [0], [0], [1], [0, 0, 1, 1], [], []>} : vector<2x32xbf16>, vector<32x32xbf16>, vector<2x32xf32> -> vector<2x32xf32>
    %178 = arith.addf %176, %177 : vector<2x32xf32>
    %179 = arith.negf %178 : vector<2x32xf32>
    %180 = math.exp %179 : vector<2x32xf32>
    %cst_58 = arith.constant 1.000000e+00 : f32
    %181 = vector.broadcast %cst_58 : f32 to vector<2x32xf32>
    %182 = arith.addf %181, %180 : vector<2x32xf32>
    %183 = arith.divf %181, %182 : vector<2x32xf32>
    %184 = arith.mulf %169, %141 : vector<2x32xf32>
    %185 = arith.mulf %160, %174 : vector<2x32xf32>
    %186 = arith.addf %184, %185 : vector<2x32xf32>
    %187 = math.tanh %186 : vector<2x32xf32>
    %188 = arith.mulf %183, %187 : vector<2x32xf32>
    %189 = arith.index_cast %c3_i32 : i32 to index
    %c0_59 = arith.constant 0 : index
    %c0_60 = arith.constant 0 : index
    %190 = vector.load %arg3[%189, %c0_59, %c0_60] : memref<8x2x32xf32, #tpu.memory_space<vmem>>, vector<1x2x32xf32>
    %191 = vector.shape_cast %190 : vector<1x2x32xf32> to vector<2x32xf32>
    %192 = vector.shape_cast %188 : vector<2x32xf32> to vector<1x2x32xf32>
    tpu.vector_store %arg3[%189, %c0_59, %c0_60], %192 {strides = array<i32>} : memref<8x2x32xf32, #tpu.memory_space<vmem>>, vector<1x2x32xf32>,
    %c4_i32 = arith.constant 4 : i32
    %193 = arith.index_cast %c4_i32 : i32 to index
    %c0_61 = arith.constant 0 : index
    %c0_62 = arith.constant 0 : index
    %c0_63 = arith.constant 0 : index
    %194 = vector.load %arg1[%193, %c0_61, %c0_62, %c0_63] : memref<8x4x2x32xf32, #tpu.memory_space<vmem>>, vector<1x4x2x32xf32>
    %195 = vector.shape_cast %194 : vector<1x4x2x32xf32> to vector<4x2x32xf32>
    %196 = arith.truncf %188 : vector<2x32xf32> to vector<2x32xbf16>
    %197 = vector.extract_strided_slice %195 {offsets = [0, 0, 0], sizes = [1, 2, 32], strides = [1, 1, 1]} : vector<4x2x32xf32> to vector<1x2x32xf32>
    %198 = vector.shape_cast %197 : vector<1x2x32xf32> to vector<2x32xf32>
    %cst_64 = arith.constant dense<0.000000e+00> : vector<2x32xf32>
    %199 = tpu.matmul %196, %4, %cst_64 {dimension_numbers = #tpu.dot_dimension_numbers<[1], [0], [0], [1], [0, 0, 1, 1], [], []>} : vector<2x32xbf16>, vector<32x32xbf16>, vector<2x32xf32> -> vector<2x32xf32>
    %200 = arith.addf %198, %199 : vector<2x32xf32>
    %201 = arith.negf %200 : vector<2x32xf32>
    %202 = math.exp %201 : vector<2x32xf32>
    %cst_65 = arith.constant 1.000000e+00 : f32
    %203 = vector.broadcast %cst_65 : f32 to vector<2x32xf32>
    %204 = arith.addf %203, %202 : vector<2x32xf32>
    %205 = arith.divf %203, %204 : vector<2x32xf32>
    %206 = vector.extract_strided_slice %195 {offsets = [1, 0, 0], sizes = [1, 2, 32], strides = [1, 1, 1]} : vector<4x2x32xf32> to vector<1x2x32xf32>
    %207 = vector.shape_cast %206 : vector<1x2x32xf32> to vector<2x32xf32>
    %cst_66 = arith.constant dense<0.000000e+00> : vector<2x32xf32>
    %208 = tpu.matmul %196, %6, %cst_66 {dimension_numbers = #tpu.dot_dimension_numbers<[1], [0], [0], [1], [0, 0, 1, 1], [], []>} : vector<2x32xbf16>, vector<32x32xbf16>, vector<2x32xf32> -> vector<2x32xf32>
    %209 = arith.addf %207, %208 : vector<2x32xf32>
    %210 = arith.negf %209 : vector<2x32xf32>
    %211 = math.exp %210 : vector<2x32xf32>
    %cst_67 = arith.constant 1.000000e+00 : f32
    %212 = vector.broadcast %cst_67 : f32 to vector<2x32xf32>
    %213 = arith.addf %212, %211 : vector<2x32xf32>
    %214 = arith.divf %212, %213 : vector<2x32xf32>
    %215 = vector.extract_strided_slice %195 {offsets = [2, 0, 0], sizes = [1, 2, 32], strides = [1, 1, 1]} : vector<4x2x32xf32> to vector<1x2x32xf32>
    %216 = vector.shape_cast %215 : vector<1x2x32xf32> to vector<2x32xf32>
    %cst_68 = arith.constant dense<0.000000e+00> : vector<2x32xf32>
    %217 = tpu.matmul %196, %8, %cst_68 {dimension_numbers = #tpu.dot_dimension_numbers<[1], [0], [0], [1], [0, 0, 1, 1], [], []>} : vector<2x32xbf16>, vector<32x32xbf16>, vector<2x32xf32> -> vector<2x32xf32>
    %218 = arith.addf %216, %217 : vector<2x32xf32>
    %219 = math.tanh %218 : vector<2x32xf32>
    %220 = vector.extract_strided_slice %195 {offsets = [3, 0, 0], sizes = [1, 2, 32], strides = [1, 1, 1]} : vector<4x2x32xf32> to vector<1x2x32xf32>
    %221 = vector.shape_cast %220 : vector<1x2x32xf32> to vector<2x32xf32>
    %cst_69 = arith.constant dense<0.000000e+00> : vector<2x32xf32>
    %222 = tpu.matmul %196, %10, %cst_69 {dimension_numbers = #tpu.dot_dimension_numbers<[1], [0], [0], [1], [0, 0, 1, 1], [], []>} : vector<2x32xbf16>, vector<32x32xbf16>, vector<2x32xf32> -> vector<2x32xf32>
    %223 = arith.addf %221, %222 : vector<2x32xf32>
    %224 = arith.negf %223 : vector<2x32xf32>
    %225 = math.exp %224 : vector<2x32xf32>
    %cst_70 = arith.constant 1.000000e+00 : f32
    %226 = vector.broadcast %cst_70 : f32 to vector<2x32xf32>
    %227 = arith.addf %226, %225 : vector<2x32xf32>
    %228 = arith.divf %226, %227 : vector<2x32xf32>
    %229 = arith.mulf %214, %186 : vector<2x32xf32>
    %230 = arith.mulf %205, %219 : vector<2x32xf32>
    %231 = arith.addf %229, %230 : vector<2x32xf32>
    %232 = math.tanh %231 : vector<2x32xf32>
    %233 = arith.mulf %228, %232 : vector<2x32xf32>
    %234 = arith.index_cast %c4_i32 : i32 to index
    %c0_71 = arith.constant 0 : index
    %c0_72 = arith.constant 0 : index
    %235 = vector.load %arg3[%234, %c0_71, %c0_72] : memref<8x2x32xf32, #tpu.memory_space<vmem>>, vector<1x2x32xf32>
    %236 = vector.shape_cast %235 : vector<1x2x32xf32> to vector<2x32xf32>
    %237 = vector.shape_cast %233 : vector<2x32xf32> to vector<1x2x32xf32>
    tpu.vector_store %arg3[%234, %c0_71, %c0_72], %237 {strides = array<i32>} : memref<8x2x32xf32, #tpu.memory_space<vmem>>, vector<1x2x32xf32>,
    %c5_i32 = arith.constant 5 : i32
    %238 = arith.index_cast %c5_i32 : i32 to index
    %c0_73 = arith.constant 0 : index
    %c0_74 = arith.constant 0 : index
    %c0_75 = arith.constant 0 : index
    %239 = vector.load %arg1[%238, %c0_73, %c0_74, %c0_75] : memref<8x4x2x32xf32, #tpu.memory_space<vmem>>, vector<1x4x2x32xf32>
    %240 = vector.shape_cast %239 : vector<1x4x2x32xf32> to vector<4x2x32xf32>
    %241 = arith.truncf %233 : vector<2x32xf32> to vector<2x32xbf16>
    %242 = vector.extract_strided_slice %240 {offsets = [0, 0, 0], sizes = [1, 2, 32], strides = [1, 1, 1]} : vector<4x2x32xf32> to vector<1x2x32xf32>
    %243 = vector.shape_cast %242 : vector<1x2x32xf32> to vector<2x32xf32>
    %cst_76 = arith.constant dense<0.000000e+00> : vector<2x32xf32>
    %244 = tpu.matmul %241, %4, %cst_76 {dimension_numbers = #tpu.dot_dimension_numbers<[1], [0], [0], [1], [0, 0, 1, 1], [], []>} : vector<2x32xbf16>, vector<32x32xbf16>, vector<2x32xf32> -> vector<2x32xf32>
    %245 = arith.addf %243, %244 : vector<2x32xf32>
    %246 = arith.negf %245 : vector<2x32xf32>
    %247 = math.exp %246 : vector<2x32xf32>
    %cst_77 = arith.constant 1.000000e+00 : f32
    %248 = vector.broadcast %cst_77 : f32 to vector<2x32xf32>
    %249 = arith.addf %248, %247 : vector<2x32xf32>
    %250 = arith.divf %248, %249 : vector<2x32xf32>
    %251 = vector.extract_strided_slice %240 {offsets = [1, 0, 0], sizes = [1, 2, 32], strides = [1, 1, 1]} : vector<4x2x32xf32> to vector<1x2x32xf32>
    %252 = vector.shape_cast %251 : vector<1x2x32xf32> to vector<2x32xf32>
    %cst_78 = arith.constant dense<0.000000e+00> : vector<2x32xf32>
    %253 = tpu.matmul %241, %6, %cst_78 {dimension_numbers = #tpu.dot_dimension_numbers<[1], [0], [0], [1], [0, 0, 1, 1], [], []>} : vector<2x32xbf16>, vector<32x32xbf16>, vector<2x32xf32> -> vector<2x32xf32>
    %254 = arith.addf %252, %253 : vector<2x32xf32>
    %255 = arith.negf %254 : vector<2x32xf32>
    %256 = math.exp %255 : vector<2x32xf32>
    %cst_79 = arith.constant 1.000000e+00 : f32
    %257 = vector.broadcast %cst_79 : f32 to vector<2x32xf32>
    %258 = arith.addf %257, %256 : vector<2x32xf32>
    %259 = arith.divf %257, %258 : vector<2x32xf32>
    %260 = vector.extract_strided_slice %240 {offsets = [2, 0, 0], sizes = [1, 2, 32], strides = [1, 1, 1]} : vector<4x2x32xf32> to vector<1x2x32xf32>
    %261 = vector.shape_cast %260 : vector<1x2x32xf32> to vector<2x32xf32>
    %cst_80 = arith.constant dense<0.000000e+00> : vector<2x32xf32>
    %262 = tpu.matmul %241, %8, %cst_80 {dimension_numbers = #tpu.dot_dimension_numbers<[1], [0], [0], [1], [0, 0, 1, 1], [], []>} : vector<2x32xbf16>, vector<32x32xbf16>, vector<2x32xf32> -> vector<2x32xf32>
    %263 = arith.addf %261, %262 : vector<2x32xf32>
    %264 = math.tanh %263 : vector<2x32xf32>
    %265 = vector.extract_strided_slice %240 {offsets = [3, 0, 0], sizes = [1, 2, 32], strides = [1, 1, 1]} : vector<4x2x32xf32> to vector<1x2x32xf32>
    %266 = vector.shape_cast %265 : vector<1x2x32xf32> to vector<2x32xf32>
    %cst_81 = arith.constant dense<0.000000e+00> : vector<2x32xf32>
    %267 = tpu.matmul %241, %10, %cst_81 {dimension_numbers = #tpu.dot_dimension_numbers<[1], [0], [0], [1], [0, 0, 1, 1], [], []>} : vector<2x32xbf16>, vector<32x32xbf16>, vector<2x32xf32> -> vector<2x32xf32>
    %268 = arith.addf %266, %267 : vector<2x32xf32>
    %269 = arith.negf %268 : vector<2x32xf32>
    %270 = math.exp %269 : vector<2x32xf32>
    %cst_82 = arith.constant 1.000000e+00 : f32
    %271 = vector.broadcast %cst_82 : f32 to vector<2x32xf32>
    %272 = arith.addf %271, %270 : vector<2x32xf32>
    %273 = arith.divf %271, %272 : vector<2x32xf32>
    %274 = arith.mulf %259, %231 : vector<2x32xf32>
    %275 = arith.mulf %250, %264 : vector<2x32xf32>
    %276 = arith.addf %274, %275 : vector<2x32xf32>
    %277 = math.tanh %276 : vector<2x32xf32>
    %278 = arith.mulf %273, %277 : vector<2x32xf32>
    %279 = arith.index_cast %c5_i32 : i32 to index
    %c0_83 = arith.constant 0 : index
    %c0_84 = arith.constant 0 : index
    %280 = vector.load %arg3[%279, %c0_83, %c0_84] : memref<8x2x32xf32, #tpu.memory_space<vmem>>, vector<1x2x32xf32>
    %281 = vector.shape_cast %280 : vector<1x2x32xf32> to vector<2x32xf32>
    %282 = vector.shape_cast %278 : vector<2x32xf32> to vector<1x2x32xf32>
    tpu.vector_store %arg3[%279, %c0_83, %c0_84], %282 {strides = array<i32>} : memref<8x2x32xf32, #tpu.memory_space<vmem>>, vector<1x2x32xf32>,
    %c6_i32 = arith.constant 6 : i32
    %283 = arith.index_cast %c6_i32 : i32 to index
    %c0_85 = arith.constant 0 : index
    %c0_86 = arith.constant 0 : index
    %c0_87 = arith.constant 0 : index
    %284 = vector.load %arg1[%283, %c0_85, %c0_86, %c0_87] : memref<8x4x2x32xf32, #tpu.memory_space<vmem>>, vector<1x4x2x32xf32>
    %285 = vector.shape_cast %284 : vector<1x4x2x32xf32> to vector<4x2x32xf32>
    %286 = arith.truncf %278 : vector<2x32xf32> to vector<2x32xbf16>
    %287 = vector.extract_strided_slice %285 {offsets = [0, 0, 0], sizes = [1, 2, 32], strides = [1, 1, 1]} : vector<4x2x32xf32> to vector<1x2x32xf32>
    %288 = vector.shape_cast %287 : vector<1x2x32xf32> to vector<2x32xf32>
    %cst_88 = arith.constant dense<0.000000e+00> : vector<2x32xf32>
    %289 = tpu.matmul %286, %4, %cst_88 {dimension_numbers = #tpu.dot_dimension_numbers<[1], [0], [0], [1], [0, 0, 1, 1], [], []>} : vector<2x32xbf16>, vector<32x32xbf16>, vector<2x32xf32> -> vector<2x32xf32>
    %290 = arith.addf %288, %289 : vector<2x32xf32>
    %291 = arith.negf %290 : vector<2x32xf32>
    %292 = math.exp %291 : vector<2x32xf32>
    %cst_89 = arith.constant 1.000000e+00 : f32
    %293 = vector.broadcast %cst_89 : f32 to vector<2x32xf32>
    %294 = arith.addf %293, %292 : vector<2x32xf32>
    %295 = arith.divf %293, %294 : vector<2x32xf32>
    %296 = vector.extract_strided_slice %285 {offsets = [1, 0, 0], sizes = [1, 2, 32], strides = [1, 1, 1]} : vector<4x2x32xf32> to vector<1x2x32xf32>
    %297 = vector.shape_cast %296 : vector<1x2x32xf32> to vector<2x32xf32>
    %cst_90 = arith.constant dense<0.000000e+00> : vector<2x32xf32>
    %298 = tpu.matmul %286, %6, %cst_90 {dimension_numbers = #tpu.dot_dimension_numbers<[1], [0], [0], [1], [0, 0, 1, 1], [], []>} : vector<2x32xbf16>, vector<32x32xbf16>, vector<2x32xf32> -> vector<2x32xf32>
    %299 = arith.addf %297, %298 : vector<2x32xf32>
    %300 = arith.negf %299 : vector<2x32xf32>
    %301 = math.exp %300 : vector<2x32xf32>
    %cst_91 = arith.constant 1.000000e+00 : f32
    %302 = vector.broadcast %cst_91 : f32 to vector<2x32xf32>
    %303 = arith.addf %302, %301 : vector<2x32xf32>
    %304 = arith.divf %302, %303 : vector<2x32xf32>
    %305 = vector.extract_strided_slice %285 {offsets = [2, 0, 0], sizes = [1, 2, 32], strides = [1, 1, 1]} : vector<4x2x32xf32> to vector<1x2x32xf32>
    %306 = vector.shape_cast %305 : vector<1x2x32xf32> to vector<2x32xf32>
    %cst_92 = arith.constant dense<0.000000e+00> : vector<2x32xf32>
    %307 = tpu.matmul %286, %8, %cst_92 {dimension_numbers = #tpu.dot_dimension_numbers<[1], [0], [0], [1], [0, 0, 1, 1], [], []>} : vector<2x32xbf16>, vector<32x32xbf16>, vector<2x32xf32> -> vector<2x32xf32>
    %308 = arith.addf %306, %307 : vector<2x32xf32>
    %309 = math.tanh %308 : vector<2x32xf32>
    %310 = vector.extract_strided_slice %285 {offsets = [3, 0, 0], sizes = [1, 2, 32], strides = [1, 1, 1]} : vector<4x2x32xf32> to vector<1x2x32xf32>
    %311 = vector.shape_cast %310 : vector<1x2x32xf32> to vector<2x32xf32>
    %cst_93 = arith.constant dense<0.000000e+00> : vector<2x32xf32>
    %312 = tpu.matmul %286, %10, %cst_93 {dimension_numbers = #tpu.dot_dimension_numbers<[1], [0], [0], [1], [0, 0, 1, 1], [], []>} : vector<2x32xbf16>, vector<32x32xbf16>, vector<2x32xf32> -> vector<2x32xf32>
    %313 = arith.addf %311, %312 : vector<2x32xf32>
    %314 = arith.negf %313 : vector<2x32xf32>
    %315 = math.exp %314 : vector<2x32xf32>
    %cst_94 = arith.constant 1.000000e+00 : f32
    %316 = vector.broadcast %cst_94 : f32 to vector<2x32xf32>
    %317 = arith.addf %316, %315 : vector<2x32xf32>
    %318 = arith.divf %316, %317 : vector<2x32xf32>
    %319 = arith.mulf %304, %276 : vector<2x32xf32>
    %320 = arith.mulf %295, %309 : vector<2x32xf32>
    %321 = arith.addf %319, %320 : vector<2x32xf32>
    %322 = math.tanh %321 : vector<2x32xf32>
    %323 = arith.mulf %318, %322 : vector<2x32xf32>
    %324 = arith.index_cast %c6_i32 : i32 to index
    %c0_95 = arith.constant 0 : index
    %c0_96 = arith.constant 0 : index
    %325 = vector.load %arg3[%324, %c0_95, %c0_96] : memref<8x2x32xf32, #tpu.memory_space<vmem>>, vector<1x2x32xf32>
    %326 = vector.shape_cast %325 : vector<1x2x32xf32> to vector<2x32xf32>
    %327 = vector.shape_cast %323 : vector<2x32xf32> to vector<1x2x32xf32>
    tpu.vector_store %arg3[%324, %c0_95, %c0_96], %327 {strides = array<i32>} : memref<8x2x32xf32, #tpu.memory_space<vmem>>, vector<1x2x32xf32>,
    %c7_i32 = arith.constant 7 : i32
    %328 = arith.index_cast %c7_i32 : i32 to index
    %c0_97 = arith.constant 0 : index
    %c0_98 = arith.constant 0 : index
    %c0_99 = arith.constant 0 : index
    %329 = vector.load %arg1[%328, %c0_97, %c0_98, %c0_99] : memref<8x4x2x32xf32, #tpu.memory_space<vmem>>, vector<1x4x2x32xf32>
    %330 = vector.shape_cast %329 : vector<1x4x2x32xf32> to vector<4x2x32xf32>
    %331 = arith.truncf %323 : vector<2x32xf32> to vector<2x32xbf16>
    %332 = vector.extract_strided_slice %330 {offsets = [0, 0, 0], sizes = [1, 2, 32], strides = [1, 1, 1]} : vector<4x2x32xf32> to vector<1x2x32xf32>
    %333 = vector.shape_cast %332 : vector<1x2x32xf32> to vector<2x32xf32>
    %cst_100 = arith.constant dense<0.000000e+00> : vector<2x32xf32>
    %334 = tpu.matmul %331, %4, %cst_100 {dimension_numbers = #tpu.dot_dimension_numbers<[1], [0], [0], [1], [0, 0, 1, 1], [], []>} : vector<2x32xbf16>, vector<32x32xbf16>, vector<2x32xf32> -> vector<2x32xf32>
    %335 = arith.addf %333, %334 : vector<2x32xf32>
    %336 = arith.negf %335 : vector<2x32xf32>
    %337 = math.exp %336 : vector<2x32xf32>
    %cst_101 = arith.constant 1.000000e+00 : f32
    %338 = vector.broadcast %cst_101 : f32 to vector<2x32xf32>
    %339 = arith.addf %338, %337 : vector<2x32xf32>
    %340 = arith.divf %338, %339 : vector<2x32xf32>
    %341 = vector.extract_strided_slice %330 {offsets = [1, 0, 0], sizes = [1, 2, 32], strides = [1, 1, 1]} : vector<4x2x32xf32> to vector<1x2x32xf32>
    %342 = vector.shape_cast %341 : vector<1x2x32xf32> to vector<2x32xf32>
    %cst_102 = arith.constant dense<0.000000e+00> : vector<2x32xf32>
    %343 = tpu.matmul %331, %6, %cst_102 {dimension_numbers = #tpu.dot_dimension_numbers<[1], [0], [0], [1], [0, 0, 1, 1], [], []>} : vector<2x32xbf16>, vector<32x32xbf16>, vector<2x32xf32> -> vector<2x32xf32>
    %344 = arith.addf %342, %343 : vector<2x32xf32>
    %345 = arith.negf %344 : vector<2x32xf32>
    %346 = math.exp %345 : vector<2x32xf32>
    %cst_103 = arith.constant 1.000000e+00 : f32
    %347 = vector.broadcast %cst_103 : f32 to vector<2x32xf32>
    %348 = arith.addf %347, %346 : vector<2x32xf32>
    %349 = arith.divf %347, %348 : vector<2x32xf32>
    %350 = vector.extract_strided_slice %330 {offsets = [2, 0, 0], sizes = [1, 2, 32], strides = [1, 1, 1]} : vector<4x2x32xf32> to vector<1x2x32xf32>
    %351 = vector.shape_cast %350 : vector<1x2x32xf32> to vector<2x32xf32>
    %cst_104 = arith.constant dense<0.000000e+00> : vector<2x32xf32>
    %352 = tpu.matmul %331, %8, %cst_104 {dimension_numbers = #tpu.dot_dimension_numbers<[1], [0], [0], [1], [0, 0, 1, 1], [], []>} : vector<2x32xbf16>, vector<32x32xbf16>, vector<2x32xf32> -> vector<2x32xf32>
    %353 = arith.addf %351, %352 : vector<2x32xf32>
    %354 = math.tanh %353 : vector<2x32xf32>
    %355 = vector.extract_strided_slice %330 {offsets = [3, 0, 0], sizes = [1, 2, 32], strides = [1, 1, 1]} : vector<4x2x32xf32> to vector<1x2x32xf32>
    %356 = vector.shape_cast %355 : vector<1x2x32xf32> to vector<2x32xf32>
    %cst_105 = arith.constant dense<0.000000e+00> : vector<2x32xf32>
    %357 = tpu.matmul %331, %10, %cst_105 {dimension_numbers = #tpu.dot_dimension_numbers<[1], [0], [0], [1], [0, 0, 1, 1], [], []>} : vector<2x32xbf16>, vector<32x32xbf16>, vector<2x32xf32> -> vector<2x32xf32>
    %358 = arith.addf %356, %357 : vector<2x32xf32>
    %359 = arith.negf %358 : vector<2x32xf32>
    %360 = math.exp %359 : vector<2x32xf32>
    %cst_106 = arith.constant 1.000000e+00 : f32
    %361 = vector.broadcast %cst_106 : f32 to vector<2x32xf32>
    %362 = arith.addf %361, %360 : vector<2x32xf32>
    %363 = arith.divf %361, %362 : vector<2x32xf32>
    %364 = arith.mulf %349, %321 : vector<2x32xf32>
    %365 = arith.mulf %340, %354 : vector<2x32xf32>
    %366 = arith.addf %364, %365 : vector<2x32xf32>
    %367 = math.tanh %366 : vector<2x32xf32>
    %368 = arith.mulf %363, %367 : vector<2x32xf32>
    %369 = arith.index_cast %c7_i32 : i32 to index
    %c0_107 = arith.constant 0 : index
    %c0_108 = arith.constant 0 : index
    %370 = vector.load %arg3[%369, %c0_107, %c0_108] : memref<8x2x32xf32, #tpu.memory_space<vmem>>, vector<1x2x32xf32>
    %371 = vector.shape_cast %370 : vector<1x2x32xf32> to vector<2x32xf32>
    %372 = vector.shape_cast %368 : vector<2x32xf32> to vector<1x2x32xf32>
    tpu.vector_store %arg3[%369, %c0_107, %c0_108], %372 {strides = array<i32>} : memref<8x2x32xf32, #tpu.memory_space<vmem>>, vector<1x2x32xf32>,
    %c8_i32 = arith.constant 8 : i32
    %c0_109 = arith.constant 0 : index
    %c0_110 = arith.constant 0 : index
    %373 = vector.load %arg4[%c0_109, %c0_110] : memref<2x32xf32, #tpu.memory_space<vmem>>, vector<2x32xf32>
    tpu.vector_store %arg4[%c0_109, %c0_110], %368 {strides = array<i32>} : memref<2x32xf32, #tpu.memory_space<vmem>>, vector<2x32xf32>,
    %c0_111 = arith.constant 0 : index
    %c0_112 = arith.constant 0 : index
    %374 = vector.load %arg5[%c0_111, %c0_112] : memref<2x32xf32, #tpu.memory_space<vmem>>, vector<2x32xf32>
    tpu.vector_store %arg5[%c0_111, %c0_112], %366 {strides = array<i32>} : memref<2x32xf32, #tpu.memory_space<vmem>>, vector<2x32xf32>,
    return
  }
  func.func @transform_0(%arg0: i32) -> (i32, i32, i32, i32) {
    %c0_i32 = arith.constant 0 : i32
    %c0_i32_0 = arith.constant 0 : i32
    %c0_i32_1 = arith.constant 0 : i32
    %c0_i32_2 = arith.constant 0 : i32
    return %arg0, %c0_i32, %c0_i32_0, %c0_i32_1 : i32, i32, i32, i32
  }
  func.func @transform_1(%arg0: i32) -> (i32, i32, i32) {
    %c0_i32 = arith.constant 0 : i32
    %c0_i32_0 = arith.constant 0 : i32
    %c0_i32_1 = arith.constant 0 : i32
    %c0_i32_2 = arith.constant 0 : i32
    return %c0_i32, %c0_i32_0, %c0_i32_1 : i32, i32, i32
  }
  func.func @transform_2(%arg0: i32) -> (i32, i32, i32) {
    %c0_i32 = arith.constant 0 : i32
    %c0_i32_0 = arith.constant 0 : i32
    %c0_i32_1 = arith.constant 0 : i32
    return %arg0, %c0_i32, %c0_i32_0 : i32, i32, i32
  }
}

</mosaic_0001>

<bundles_post_ra>
// kernel: bilstm_transformer_forward.5
= control target key start
LH: loop header
LB: loop body
LE: loop exit
PB: predicated region body
PF: predicated region fallthrough
CT: control target
= control target key end

     0   :  { %7 = vsyncpa [#allocation5], 0  ;;  %s2727_s0 = inlined_call_operand.hbm [shape: f32[8,4,2,32], index: 0, kind: input, shape index: {}]   ;;  %s2728_s1 = inlined_call_operand.hbm [shape: bf16[4,32,32], index: 1, kind: input, shape index: {}]   ;;  %s2729_s2 = inlined_call_operand.hbm [shape: f32[8,2,32], index: 2, kind: output, shape index: {}]  }
   0x1   :  { %8 = vsyncpa [#allocation8], 0 }
   0x2   :  { %9 = vsyncpa [#allocation6], 0  ;;  %s2383_s9 = smov [#allocation4]   ;;  %s2311_s13 = scalar_lea.hbm %s2727_s0, 1024 }
   0x3   :  { %s20_s10 = sshll.u32 %s2383_s9, 4  ;;  %p2312_p0 = scmp.ne.s32.totalorder %s2727_s0, %s2311_s13  ;;  %s21_s10 = int_to_ptr.vmem [resolvable:$true] %s20_s10 }
   0x4   :  { %p2315_p1 = scmp.lt.u32.totalorder %s2311_s13, %s2727_s0 }
   0x6   :  { %p2317_p2 = pnand %p2315_p1, %p2312_p0 }
   0x8   :  { %2320 = shalt.err (!%p2317_p2)
}
   0x9   :  { %s2321_s18 = scalar_lea.vmem %s21_s10, 1024  ;;  %p2326_p4 = scmp.lt.s32.totalorder %s21_s10, %s21_s10 }
   0xa   :  { %p2322_p3 = scmp.ne.s32.totalorder %s21_s10, %s2321_s18  ;;  %p2327_p5 = scmp.lt.s32.totalorder %s2321_s18, %s2321_s18 }
   0xc   :  { %p2328_p6 = por %p2327_p5, %p2326_p4 }
   0xe   :  { %p2329_p7 = pnand %p2328_p6, %p2322_p3 }
  0x10   :  { %2332 = shalt.err (!%p2329_p7)
}
  0x11   :  { %s2384_s19 = smov 32   ;;  %s2385_s20 = smov 2  }
  0x12   :  { %26 = dma.hbm_to_vmem [thread:$0]  %s2727_s0, 1024, %s21_s10, [#allocation5], %s2384_s19, %s2384_s19, %s2385_s20  }
  0x13   :  { %s2386_s23 = smov [#allocation7]   ;;  %s2333_s27 = scalar_lea.hbm %s2728_s1, 1024 }
  0x14   :  { %s32_s24 = sshll.u32 %s2386_s23, 4  ;;  %p2334_p8 = scmp.ne.s32.totalorder %s2728_s1, %s2333_s27  ;;  %s33_s24 = int_to_ptr.vmem [resolvable:$true] %s32_s24 }
  0x15   :  { %p2337_p9 = scmp.lt.u32.totalorder %s2333_s27, %s2728_s1 }
  0x17   :  { %p2339_p10 = pnand %p2337_p9, %p2334_p8 }
  0x19   :  { %2342 = shalt.err (!%p2339_p10)
}
  0x1a   :  { %s2343_s4 = scalar_lea.vmem %s33_s24, 1024  ;;  %p2348_p12 = scmp.lt.s32.totalorder %s33_s24, %s33_s24 }
  0x1b   :  { %p2344_p11 = scmp.ne.s32.totalorder %s33_s24, %s2343_s4  ;;  %p2349_p13 = scmp.lt.s32.totalorder %s2343_s4, %s2343_s4 }
  0x1d   :  { %p2350_p0 = por %p2349_p13, %p2348_p12 }
  0x1f   :  { %p2351_p1 = pnand %p2350_p0, %p2344_p11 }
  0x21   :  { %2354 = shalt.err (!%p2351_p1)
}
  0x22   :  { %s2387_s0 = smov 64   ;;  %s2388_s5 = smov 4  }
  0x23   :  { %38 = dma.hbm_to_vmem [thread:$0]  %s2728_s1, 1024, %s33_s24, [#allocation8], %s2387_s0, %s2387_s0, %s2388_s5  }
  0x24   :  { %2377 = dma.done.wait [#allocation5], 1024  }
  0x25   :  { %2378 = vsyncadd [#allocation5], 4294966272 }
  0x26   :  { %2379 = dma.done.wait [#allocation8], 1024  }
  0x27   :  { %2380 = vsyncadd [#allocation8], 4294966272  ;;  %vm54_vm0 = vcmask 254976   ;;  %v2389_v0 = vmov 0.0   ;;  %vm2390_vm1 = vmmov 0   ;;  %v2444_v1 = vld [vmem:[#allocation7] sm:$0xff]  }
  0x28   :  { %1906 = vmatprep.subr.bf16.mxu0 %v2389_v0  ;;  %1914 = vmatprep.subr.bf16.mxu1 %v2389_v0  ;;  %55 = vst.msk [vmem:[#allocation2] sm:$0x3] %vm54_vm0, %v2389_v0  ;;  %56 = vst.msk [vmem:[#allocation3] sm:$0x3] %vm54_vm0, %v2389_v0  ;;  %v2446_v2 = vld [vmem:[#allocation7 + $0x10] sm:$0xff]   ;;  %v2449_v3 = vld [vmem:[#allocation7 + $0x8] sm:$0xff]  }
  0x29   :  { %1910 = vmatprep.mubr.msk.bf16.mxu0 %vm2390_vm1, %v2389_v0  ;;  %1918 = vmatprep.mubr.msk.bf16.mxu1 %vm2390_vm1, %v2389_v0  ;;  %v2453_v4 = vld [vmem:[#allocation7 + $0x18] sm:$0xff]   ;;  %vm96_vm2 = vcmask 261120   ;;  %v2457_v7 = vld [vmem:[#allocation7 + $0x20] sm:$0xff]   ;;  %v2461_v8 = vld [vmem:[#allocation7 + $0x30] sm:$0xff]   ;;  %s2391_s1 = smov [#allocation9]  }
  0x2a   :  { %1907 = vmatpush3.bf16.msra.mxu0 %v2444_v1  ;;  %1915 = vmatpush3.bf16.msra.mxu1 %v2446_v2  ;;  %v2467_v9 = vld [vmem:[#allocation7 + $0x28] sm:$0xff]   ;;  %v2471_v10 = vld [vmem:[#allocation7 + $0x38] sm:$0xff]   ;;  %v328_v55 = vld [vmem:[#allocation4 + $0x30] sm:$0x3]  ;;  %s1729_s8 = sshll.u32 %s2391_s1, 4  ;;  %s1730_s8 = int_to_ptr.vmem [resolvable:$true] %s1729_s8 }
  0x2b   :  { %1908 = vmatprep.subr.bf16.mxu0 %v2389_v0  ;;  %1916 = vmatprep.subr.bf16.mxu1 %v2389_v0  ;;  %v79_v11 = vld [vmem:[#allocation4 + $0x38] sm:$0x3]  ;;  %v80_v12 = vld [vmem:[#allocation4 + $0x3a] sm:$0x3]  ;;  %v82_v25 = vld [vmem:[#allocation4 + $0x3e] sm:$0x3]  ;;  %p2360_p3 = scmp.lt.s32.totalorder %s1730_s8, %s1730_s8 }
  0x2c   :  { %v81_v27 = vld [vmem:[#allocation4 + $0x3c] sm:$0x3]  ;;  %v329_v56 = vld [vmem:[#allocation4 + $0x32] sm:$0x3]  ;;  %s2355_s9 = scalar_lea.vmem %s1730_s8, 256 }
  0x2d   :  { %p2356_p2 = scmp.ne.s32.totalorder %s1730_s8, %s2355_s9  ;;  %p2361_p4 = scmp.lt.s32.totalorder %s2355_s9, %s2355_s9 }
  0x2e   :  { %1909 = vmatpush3.bf16.msra.mxu0 %v2449_v3  ;;  %1917 = vmatpush3.bf16.msra.mxu1 %v2453_v4 }
  0x2f   :  { %v76_v5 = vld [vmem:[#allocation2] sm:$0x3]  ;;  %1922 = vmatprep.subr.bf16.mxu0 %v2389_v0  ;;  %1930 = vmatprep.subr.bf16.mxu1 %v2389_v0  ;;  %v77_v44 = vld [vmem:[#allocation3] sm:$0x3]  ;;  %p2362_p5 = por %p2361_p4, %p2360_p3 }
  0x30   :  { %v83_v6 = vpack.c.bf16 %v76_v5, %v76_v5 }
  0x31   :  { %p2363_p6 = pnand %p2362_p5, %p2356_p2 }
  0x32   :  { %1911 = vmatmul.mubr.msk.bf16.vlgmr.msra.gmra.mrb[0].mxu0 %vm96_vm2, %v83_v6  ;;  %1919 = vmatmul.mubr.msk.bf16.vlgmr.msra.gmra.mrb[0].mxu1 %vm96_vm2, %v83_v6 }
  0x33   :  { %1923 = vmatpush3.bf16.msra.mxu0 %v2457_v7  ;;  %1931 = vmatpush3.bf16.msra.mxu1 %v2461_v8 }
  0x34   :  { %1924 = vmatprep.subr.bf16.mxu0 %v2389_v0  ;;  %1932 = vmatprep.subr.bf16.mxu1 %v2389_v0 }
  0x35   :  { %1926 = vmatprep.mubr.msk.bf16.mxu0 %vm2390_vm1, %v2389_v0  ;;  %1934 = vmatprep.mubr.msk.bf16.mxu1 %vm2390_vm1, %v2389_v0 }
  0x37   :  { %1925 = vmatpush3.bf16.msra.mxu0 %v2467_v9  ;;  %1933 = vmatpush3.bf16.msra.mxu1 %v2471_v10 }
  0x38   :  { %1938 = vmatprep.subr.bf16.mxu0 %v2389_v0  ;;  %1946 = vmatprep.subr.bf16.mxu1 %v2389_v0 }
  0x3a   :  { %1927 = vmatmul.mubr.msk.bf16.vlgmr.msra.gmra.mrb[4].mxu0 %vm96_vm2, %v83_v6  ;;  %1935 = vmatmul.mubr.msk.bf16.vlgmr.msra.gmra.mrb[4].mxu1 %vm96_vm2, %v83_v6 }
  0x3b   :  { %1939 = vmatpush3.bf16.msra.mxu0 %v2444_v1  ;;  %1947 = vmatpush3.bf16.msra.mxu1 %v2446_v2 }
  0x3c   :  { %1940 = vmatprep.subr.bf16.mxu0 %v2389_v0  ;;  %1948 = vmatprep.subr.bf16.mxu1 %v2389_v0 }
  0x3d   :  { %1942 = vmatprep.mubr.msk.bf16.mxu0 %vm2390_vm1, %v2389_v0  ;;  %1950 = vmatprep.mubr.msk.bf16.mxu1 %vm2390_vm1, %v2389_v0 }
  0x3f   :  { %1941 = vmatpush3.bf16.msra.mxu0 %v2449_v3  ;;  %1949 = vmatpush3.bf16.msra.mxu1 %v2453_v4 }
  0x40   :  { %1954 = vmatprep.subr.bf16.mxu0 %v2389_v0  ;;  %1962 = vmatprep.subr.bf16.mxu1 %v2389_v0 }
 0x105   :  { %v134_v13 = vpop.f32.mrb[0].mxu0  ;;  %v193_v15 = vpop.f32.mrb[0].mxu1 }
 0x106   :  { %v140_v14 = vadd.f32 %v134_v13, %v79_v11  ;;  %v1912_v16 = vpop.f32.mrb[1].mxu0  ;;  %v199_v17 = vadd.f32 %v193_v15, %v80_v12  ;;  %v1920_v18 = vpop.f32.mrb[1].mxu1 }
 0x107   :  { %v137_v19 = vpop.f32.mrb[2].mxu0  ;;  %v196_v21 = vpop.f32.mrb[2].mxu1 }
 0x108   :  { %v1749_v20 = vmul.f32 -1.442695, %v140_v14  ;;  %v1913_v22 = vpop.f32.mrb[3].mxu0  ;;  %v1753_v23 = vmul.f32 -1.442695, %v199_v17  ;;  %v1921_v24 = vpop.f32.mrb[3].mxu1 }
 0x109   :  { %v331_v14 = vld [vmem:[#allocation4 + $0x36] sm:$0x3] }
 0x10a   :  { %2179 = vpow2.f32 %v1749_v20  ;;  %v330_v20 = vld [vmem:[#allocation4 + $0x34] sm:$0x3] }
 0x10b   :  { %2181 = vpow2.f32 %v1753_v23 }
 0x10d   :  { %v252_v26 = vpop.f32.mrb[4].mxu0  ;;  %v306_v28 = vpop.f32.mrb[4].mxu1 }
 0x10e   :  { %v1928_v29 = vpop.f32.mrb[5].mxu0  ;;  %v312_v30 = vadd.f32 %v306_v28, %v82_v25  ;;  %v1936_v31 = vpop.f32.mrb[5].mxu1  ;;  %v258_v35 = vadd.f32 %v252_v26, %v81_v27 }
 0x10f   :  { %v255_v32 = vpop.f32.mrb[6].mxu0  ;;  %v309_v33 = vpop.f32.mrb[6].mxu1 }
 0x110   :  { %v1929_v34 = vpop.f32.mrb[7].mxu0  ;;  %v1760_v36 = vmul.f32 -1.442695, %v312_v30  ;;  %v1937_v37 = vpop.f32.mrb[7].mxu1 }
 0x112   :  { %2183 = vpow2.f32 %v1760_v36 }
 0x113   :  { %2185 = vtanh.f32 %v258_v35 }
 0x114   :  { %v2180_v38 = vpop.eup %2179 }
 0x115   :  { %v2182_v39 = vpop.eup %2181  ;;  %v144_v40 = vadd.f32 1.0, %v2180_v38 }
 0x116   :  { %v203_v41 = vadd.f32 1.0, %v2182_v39 }
 0x117   :  { %2187 = vrcp.f32 %v144_v40 }
 0x118   :  { %2189 = vrcp.f32 %v203_v41 }
 0x11c   :  { %v2184_v42 = vpop.eup %2183 }
 0x11d   :  { %v2186_v43 = vpop.eup %2185  ;;  %v316_v46 = vadd.f32 1.0, %v2184_v42 }
 0x11f   :  { %2191 = vrcp.f32 %v316_v46 }
 0x121   :  { %v2188_v45 = vpop.eup %2187 }
 0x122   :  { %v2190_v47 = vpop.eup %2189  ;;  %v320_v48 = vmul.f32 %v2188_v45, %v2186_v43  ;;  %v527_v43 = vld [vmem:[#allocation4 + $0x28] sm:$0x3] }
 0x123   :  { %v319_v49 = vmul.f32 %v2190_v47, %v77_v44  ;;  %v528_v44 = vld [vmem:[#allocation4 + $0x2a] sm:$0x3] }
 0x125   :  { %v2496_v50 = vadd.f32 %v320_v48, %v319_v49 }
 0x127   :  { %2193 = vtanh.f32 %v2496_v50 }
 0x129   :  { %v2192_v51 = vpop.eup %2191 }
 0x131   :  { %v2194_v52 = vpop.eup %2193 }
 0x132   :  { %v323_v53 = vmul.f32 %v2194_v52, %v2192_v51 }
 0x134   :  { %326 = vst.msk [vmem:[#allocation9 + $0xe] sm:$0x3] %vm54_vm0, %v323_v53  ;;  %v332_v54 = vpack.c.bf16 %v323_v53, %v323_v53 }
 0x136   :  { %1943 = vmatmul.mubr.msk.bf16.vlgmr.msra.gmra.mrb[8].mxu0 %vm96_vm2, %v332_v54  ;;  %1951 = vmatmul.mubr.msk.bf16.vlgmr.msra.gmra.mrb[8].mxu1 %vm96_vm2, %v332_v54 }
 0x137   :  { %1955 = vmatpush3.bf16.msra.mxu0 %v2457_v7  ;;  %1963 = vmatpush3.bf16.msra.mxu1 %v2461_v8 }
 0x138   :  { %1956 = vmatprep.subr.bf16.mxu0 %v2389_v0  ;;  %1964 = vmatprep.subr.bf16.mxu1 %v2389_v0 }
 0x139   :  { %1958 = vmatprep.mubr.msk.bf16.mxu0 %vm2390_vm1, %v2389_v0  ;;  %1966 = vmatprep.mubr.msk.bf16.mxu1 %vm2390_vm1, %v2389_v0 }
 0x13b   :  { %1957 = vmatpush3.bf16.msra.mxu0 %v2467_v9  ;;  %1965 = vmatpush3.bf16.msra.mxu1 %v2471_v10 }
 0x13c   :  { %1970 = vmatprep.subr.bf16.mxu0 %v2389_v0  ;;  %1978 = vmatprep.subr.bf16.mxu1 %v2389_v0 }
 0x13e   :  { %1959 = vmatmul.mubr.msk.bf16.vlgmr.msra.gmra.mrb[12].mxu0 %vm96_vm2, %v332_v54  ;;  %1967 = vmatmul.mubr.msk.bf16.vlgmr.msra.gmra.mrb[12].mxu1 %vm96_vm2, %v332_v54 }
 0x13f   :  { %1971 = vmatpush3.bf16.msra.mxu0 %v2444_v1  ;;  %1979 = vmatpush3.bf16.msra.mxu1 %v2446_v2 }
 0x140   :  { %1972 = vmatprep.subr.bf16.mxu0 %v2389_v0  ;;  %1980 = vmatprep.subr.bf16.mxu1 %v2389_v0 }
 0x141   :  { %1974 = vmatprep.mubr.msk.bf16.mxu0 %vm2390_vm1, %v2389_v0  ;;  %1982 = vmatprep.mubr.msk.bf16.mxu1 %vm2390_vm1, %v2389_v0 }
 0x143   :  { %1973 = vmatpush3.bf16.msra.mxu0 %v2449_v3  ;;  %1981 = vmatpush3.bf16.msra.mxu1 %v2453_v4 }
 0x144   :  { %1986 = vmatprep.subr.bf16.mxu0 %v2389_v0  ;;  %1994 = vmatprep.subr.bf16.mxu1 %v2389_v0 }
 0x209   :  { %v370_v57 = vpop.f32.mrb[8].mxu0  ;;  %v417_v58 = vpop.f32.mrb[8].mxu1 }
 0x20a   :  { %v376_v59 = vadd.f32 %v370_v57, %v328_v55  ;;  %v423_v60 = vadd.f32 %v417_v58, %v329_v56  ;;  %v1944_v61 = vpop.f32.mrb[9].mxu0  ;;  %v1952_v62 = vpop.f32.mrb[9].mxu1  ;;  %v530_v57 = vld [vmem:[#allocation4 + $0x2e] sm:$0x3] }
 0x20b   :  { %v373_v63 = vpop.f32.mrb[10].mxu0  ;;  %v420_v5 = vpop.f32.mrb[10].mxu1 }
 0x20c   :  { %v1762_v6 = vmul.f32 -1.442695, %v376_v59  ;;  %v1764_v11 = vmul.f32 -1.442695, %v423_v60  ;;  %v1945_v12 = vpop.f32.mrb[11].mxu0  ;;  %v1953_v13 = vpop.f32.mrb[11].mxu1 }
 0x20d   :  { %v529_v63 = vld [vmem:[#allocation4 + $0x2c] sm:$0x3] }
 0x20e   :  { %2195 = vpow2.f32 %v1762_v6 }
 0x20f   :  { %2197 = vpow2.f32 %v1764_v11 }
 0x211   :  { %v464_v15 = vpop.f32.mrb[12].mxu0  ;;  %v506_v16 = vpop.f32.mrb[12].mxu1 }
 0x212   :  { %v512_v17 = vadd.f32 %v506_v16, %v331_v14  ;;  %v1960_v18 = vpop.f32.mrb[13].mxu0  ;;  %v1968_v19 = vpop.f32.mrb[13].mxu1  ;;  %v470_v26 = vadd.f32 %v464_v15, %v330_v20 }
 0x213   :  { %v467_v21 = vpop.f32.mrb[14].mxu0  ;;  %v509_v22 = vpop.f32.mrb[14].mxu1 }
 0x214   :  { %v1961_v23 = vpop.f32.mrb[15].mxu0  ;;  %v1969_v24 = vpop.f32.mrb[15].mxu1  ;;  %v1767_v25 = vmul.f32 -1.442695, %v512_v17 }
 0x216   :  { %2199 = vpow2.f32 %v1767_v25 }
 0x217   :  { %2201 = vtanh.f32 %v470_v26 }
 0x218   :  { %v2196_v27 = vpop.eup %2195 }
 0x219   :  { %v2198_v28 = vpop.eup %2197  ;;  %v380_v29 = vadd.f32 1.0, %v2196_v27 }
 0x21a   :  { %v427_v30 = vadd.f32 1.0, %v2198_v28 }
 0x21b   :  { %2203 = vrcp.f32 %v380_v29 }
 0x21c   :  { %2205 = vrcp.f32 %v427_v30 }
 0x220   :  { %v2200_v31 = vpop.eup %2199 }
 0x221   :  { %v2202_v32 = vpop.eup %2201  ;;  %v516_v36 = vadd.f32 1.0, %v2200_v31  ;;  %v726_v31 = vld [vmem:[#allocation4 + $0x20] sm:$0x3] }
 0x223   :  { %2207 = vrcp.f32 %v516_v36 }
 0x225   :  { %v2204_v33 = vpop.eup %2203 }
 0x226   :  { %v2206_v34 = vpop.eup %2205  ;;  %v520_v35 = vmul.f32 %v2204_v33, %v2202_v32  ;;  %v727_v32 = vld [vmem:[#allocation4 + $0x22] sm:$0x3] }
 0x227   :  { %v519_v37 = vmul.f32 %v2206_v34, %v2496_v50 }
 0x229   :  { %v2529_v38 = vadd.f32 %v520_v35, %v519_v37 }
 0x22b   :  { %2209 = vtanh.f32 %v2529_v38 }
 0x22d   :  { %v2208_v39 = vpop.eup %2207 }
 0x235   :  { %v2210_v40 = vpop.eup %2209 }
 0x236   :  { %v523_v41 = vmul.f32 %v2210_v40, %v2208_v39 }
 0x238   :  { %525 = vst.msk [vmem:[#allocation9 + $0xc] sm:$0x3] %vm54_vm0, %v523_v41  ;;  %v531_v42 = vpack.c.bf16 %v523_v41, %v523_v41 }
 0x23a   :  { %1975 = vmatmul.mubr.msk.bf16.vlgmr.msra.gmra.mrb[16].mxu0 %vm96_vm2, %v531_v42  ;;  %1983 = vmatmul.mubr.msk.bf16.vlgmr.msra.gmra.mrb[16].mxu1 %vm96_vm2, %v531_v42 }
 0x23b   :  { %1987 = vmatpush3.bf16.msra.mxu0 %v2457_v7  ;;  %1995 = vmatpush3.bf16.msra.mxu1 %v2461_v8 }
 0x23c   :  { %1988 = vmatprep.subr.bf16.mxu0 %v2389_v0  ;;  %1996 = vmatprep.subr.bf16.mxu1 %v2389_v0 }
 0x23d   :  { %1990 = vmatprep.mubr.msk.bf16.mxu0 %vm2390_vm1, %v2389_v0  ;;  %1998 = vmatprep.mubr.msk.bf16.mxu1 %vm2390_vm1, %v2389_v0 }
 0x23f   :  { %1989 = vmatpush3.bf16.msra.mxu0 %v2467_v9  ;;  %1997 = vmatpush3.bf16.msra.mxu1 %v2471_v10 }
 0x240   :  { %2002 = vmatprep.subr.bf16.mxu0 %v2389_v0  ;;  %2010 = vmatprep.subr.bf16.mxu1 %v2389_v0 }
 0x242   :  { %1991 = vmatmul.mubr.msk.bf16.vlgmr.msra.gmra.mrb[20].mxu0 %vm96_vm2, %v531_v42  ;;  %1999 = vmatmul.mubr.msk.bf16.vlgmr.msra.gmra.mrb[20].mxu1 %vm96_vm2, %v531_v42 }
 0x243   :  { %2003 = vmatpush3.bf16.msra.mxu0 %v2444_v1  ;;  %2011 = vmatpush3.bf16.msra.mxu1 %v2446_v2 }
 0x244   :  { %2004 = vmatprep.subr.bf16.mxu0 %v2389_v0  ;;  %2012 = vmatprep.subr.bf16.mxu1 %v2389_v0 }
 0x245   :  { %2006 = vmatprep.mubr.msk.bf16.mxu0 %vm2390_vm1, %v2389_v0  ;;  %2014 = vmatprep.mubr.msk.bf16.mxu1 %vm2390_vm1, %v2389_v0 }
 0x247   :  { %2005 = vmatpush3.bf16.msra.mxu0 %v2449_v3  ;;  %2013 = vmatpush3.bf16.msra.mxu1 %v2453_v4 }
 0x248   :  { %2018 = vmatprep.subr.bf16.mxu0 %v2389_v0  ;;  %2026 = vmatprep.subr.bf16.mxu1 %v2389_v0 }
 0x30d   :  { %v569_v45 = vpop.f32.mrb[16].mxu0  ;;  %v616_v46 = vpop.f32.mrb[16].mxu1 }
 0x30e   :  { %v575_v47 = vadd.f32 %v569_v45, %v527_v43  ;;  %v622_v48 = vadd.f32 %v616_v46, %v528_v44  ;;  %v1976_v49 = vpop.f32.mrb[17].mxu0  ;;  %v1984_v50 = vpop.f32.mrb[17].mxu1  ;;  %v729_v45 = vld [vmem:[#allocation4 + $0x26] sm:$0x3] }
 0x30f   :  { %v572_v51 = vpop.f32.mrb[18].mxu0  ;;  %v619_v52 = vpop.f32.mrb[18].mxu1 }
 0x310   :  { %v1769_v53 = vmul.f32 -1.442695, %v575_v47  ;;  %v1771_v54 = vmul.f32 -1.442695, %v622_v48  ;;  %v1977_v55 = vpop.f32.mrb[19].mxu0  ;;  %v1985_v56 = vpop.f32.mrb[19].mxu1 }
 0x311   :  { %v728_v51 = vld [vmem:[#allocation4 + $0x24] sm:$0x3] }
 0x312   :  { %2211 = vpow2.f32 %v1769_v53 }
 0x313   :  { %2213 = vpow2.f32 %v1771_v54 }
 0x315   :  { %v663_v58 = vpop.f32.mrb[20].mxu0  ;;  %v705_v59 = vpop.f32.mrb[20].mxu1 }
 0x316   :  { %v711_v60 = vadd.f32 %v705_v59, %v530_v57  ;;  %v1992_v61 = vpop.f32.mrb[21].mxu0  ;;  %v2000_v62 = vpop.f32.mrb[21].mxu1  ;;  %v669_v14 = vadd.f32 %v663_v58, %v529_v63 }
 0x317   :  { %v666_v5 = vpop.f32.mrb[22].mxu0  ;;  %v708_v6 = vpop.f32.mrb[22].mxu1 }
 0x318   :  { %v1993_v11 = vpop.f32.mrb[23].mxu0  ;;  %v2001_v12 = vpop.f32.mrb[23].mxu1  ;;  %v1774_v13 = vmul.f32 -1.442695, %v711_v60 }
 0x31a   :  { %2215 = vpow2.f32 %v1774_v13 }
 0x31b   :  { %2217 = vtanh.f32 %v669_v14 }
 0x31c   :  { %v2212_v15 = vpop.eup %2211 }
 0x31d   :  { %v2214_v16 = vpop.eup %2213  ;;  %v579_v17 = vadd.f32 1.0, %v2212_v15 }
 0x31e   :  { %v626_v18 = vadd.f32 1.0, %v2214_v16 }
 0x31f   :  { %2219 = vrcp.f32 %v579_v17 }
 0x320   :  { %2221 = vrcp.f32 %v626_v18 }
 0x324   :  { %v2216_v19 = vpop.eup %2215 }
 0x325   :  { %v2218_v20 = vpop.eup %2217  ;;  %v715_v24 = vadd.f32 1.0, %v2216_v19  ;;  %v925_v19 = vld [vmem:[#allocation4 + $0x18] sm:$0x3] }
 0x327   :  { %2223 = vrcp.f32 %v715_v24 }
 0x329   :  { %v2220_v21 = vpop.eup %2219 }
 0x32a   :  { %v2222_v22 = vpop.eup %2221  ;;  %v719_v23 = vmul.f32 %v2220_v21, %v2218_v20  ;;  %v926_v20 = vld [vmem:[#allocation4 + $0x1a] sm:$0x3] }
 0x32b   :  { %v718_v25 = vmul.f32 %v2222_v22, %v2529_v38 }
 0x32d   :  { %v2562_v26 = vadd.f32 %v719_v23, %v718_v25 }
 0x32f   :  { %2225 = vtanh.f32 %v2562_v26 }
 0x331   :  { %v2224_v27 = vpop.eup %2223 }
 0x339   :  { %v2226_v28 = vpop.eup %2225 }
 0x33a   :  { %v722_v29 = vmul.f32 %v2226_v28, %v2224_v27 }
 0x33c   :  { %724 = vst.msk [vmem:[#allocation9 + $0xa] sm:$0x3] %vm54_vm0, %v722_v29  ;;  %v730_v30 = vpack.c.bf16 %v722_v29, %v722_v29 }
 0x33e   :  { %2007 = vmatmul.mubr.msk.bf16.vlgmr.msra.gmra.mrb[24].mxu0 %vm96_vm2, %v730_v30  ;;  %2015 = vmatmul.mubr.msk.bf16.vlgmr.msra.gmra.mrb[24].mxu1 %vm96_vm2, %v730_v30 }
 0x33f   :  { %2019 = vmatpush3.bf16.msra.mxu0 %v2457_v7  ;;  %2027 = vmatpush3.bf16.msra.mxu1 %v2461_v8 }
 0x340   :  { %2020 = vmatprep.subr.bf16.mxu0 %v2389_v0  ;;  %2028 = vmatprep.subr.bf16.mxu1 %v2389_v0 }
 0x341   :  { %2022 = vmatprep.mubr.msk.bf16.mxu0 %vm2390_vm1, %v2389_v0  ;;  %2030 = vmatprep.mubr.msk.bf16.mxu1 %vm2390_vm1, %v2389_v0 }
 0x343   :  { %2021 = vmatpush3.bf16.msra.mxu0 %v2467_v9  ;;  %2029 = vmatpush3.bf16.msra.mxu1 %v2471_v10 }
 0x344   :  { %2034 = vmatprep.subr.bf16.mxu0 %v2389_v0  ;;  %2042 = vmatprep.subr.bf16.mxu1 %v2389_v0 }
 0x346   :  { %2023 = vmatmul.mubr.msk.bf16.vlgmr.msra.gmra.mrb[28].mxu0 %vm96_vm2, %v730_v30  ;;  %2031 = vmatmul.mubr.msk.bf16.vlgmr.msra.gmra.mrb[28].mxu1 %vm96_vm2, %v730_v30 }
 0x347   :  { %2035 = vmatpush3.bf16.msra.mxu0 %v2444_v1  ;;  %2043 = vmatpush3.bf16.msra.mxu1 %v2446_v2 }
 0x348   :  { %2036 = vmatprep.subr.bf16.mxu0 %v2389_v0  ;;  %2044 = vmatprep.subr.bf16.mxu1 %v2389_v0 }
 0x349   :  { %2038 = vmatprep.mubr.msk.bf16.mxu0 %vm2390_vm1, %v2389_v0  ;;  %2046 = vmatprep.mubr.msk.bf16.mxu1 %vm2390_vm1, %v2389_v0 }
 0x34b   :  { %2037 = vmatpush3.bf16.msra.mxu0 %v2449_v3  ;;  %2045 = vmatpush3.bf16.msra.mxu1 %v2453_v4 }
 0x34c   :  { %2050 = vmatprep.subr.bf16.mxu0 %v2389_v0  ;;  %2058 = vmatprep.subr.bf16.mxu1 %v2389_v0 }
 0x411   :  { %v768_v33 = vpop.f32.mrb[24].mxu0  ;;  %v815_v34 = vpop.f32.mrb[24].mxu1 }
 0x412   :  { %v774_v35 = vadd.f32 %v768_v33, %v726_v31  ;;  %v821_v36 = vadd.f32 %v815_v34, %v727_v32  ;;  %v2008_v37 = vpop.f32.mrb[25].mxu0  ;;  %v2016_v38 = vpop.f32.mrb[25].mxu1  ;;  %v928_v33 = vld [vmem:[#allocation4 + $0x1e] sm:$0x3] }
 0x413   :  { %v771_v39 = vpop.f32.mrb[26].mxu0  ;;  %v818_v40 = vpop.f32.mrb[26].mxu1 }
 0x414   :  { %v1776_v41 = vmul.f32 -1.442695, %v774_v35  ;;  %v1778_v42 = vmul.f32 -1.442695, %v821_v36  ;;  %v2009_v43 = vpop.f32.mrb[27].mxu0  ;;  %v2017_v44 = vpop.f32.mrb[27].mxu1 }
 0x415   :  { %v927_v39 = vld [vmem:[#allocation4 + $0x1c] sm:$0x3] }
 0x416   :  { %2227 = vpow2.f32 %v1776_v41 }
 0x417   :  { %2229 = vpow2.f32 %v1778_v42 }
 0x419   :  { %v862_v46 = vpop.f32.mrb[28].mxu0  ;;  %v904_v47 = vpop.f32.mrb[28].mxu1 }
 0x41a   :  { %v910_v48 = vadd.f32 %v904_v47, %v729_v45  ;;  %v2024_v49 = vpop.f32.mrb[29].mxu0  ;;  %v2032_v50 = vpop.f32.mrb[29].mxu1  ;;  %v868_v57 = vadd.f32 %v862_v46, %v728_v51 }
 0x41b   :  { %v865_v52 = vpop.f32.mrb[30].mxu0  ;;  %v907_v53 = vpop.f32.mrb[30].mxu1 }
 0x41c   :  { %v2025_v54 = vpop.f32.mrb[31].mxu0  ;;  %v2033_v55 = vpop.f32.mrb[31].mxu1  ;;  %v1781_v56 = vmul.f32 -1.442695, %v910_v48 }
 0x41e   :  { %2231 = vpow2.f32 %v1781_v56 }
 0x41f   :  { %2233 = vtanh.f32 %v868_v57 }
 0x420   :  { %v2228_v58 = vpop.eup %2227 }
 0x421   :  { %v2230_v59 = vpop.eup %2229  ;;  %v778_v60 = vadd.f32 1.0, %v2228_v58 }
 0x422   :  { %v825_v61 = vadd.f32 1.0, %v2230_v59 }
 0x423   :  { %2235 = vrcp.f32 %v778_v60 }
 0x424   :  { %2237 = vrcp.f32 %v825_v61 }
 0x428   :  { %v2232_v62 = vpop.eup %2231 }
 0x429   :  { %v2234_v63 = vpop.eup %2233  ;;  %v914_v12 = vadd.f32 1.0, %v2232_v62  ;;  %v1124_v62 = vld [vmem:[#allocation4 + $0x10] sm:$0x3] }
 0x42b   :  { %2239 = vrcp.f32 %v914_v12 }
 0x42d   :  { %v2236_v5 = vpop.eup %2235 }
 0x42e   :  { %v2238_v6 = vpop.eup %2237  ;;  %v918_v11 = vmul.f32 %v2236_v5, %v2234_v63  ;;  %v1125_v63 = vld [vmem:[#allocation4 + $0x12] sm:$0x3] }
 0x42f   :  { %v917_v13 = vmul.f32 %v2238_v6, %v2562_v26 }
 0x431   :  { %v2595_v14 = vadd.f32 %v918_v11, %v917_v13 }
 0x433   :  { %2241 = vtanh.f32 %v2595_v14 }
 0x435   :  { %v2240_v15 = vpop.eup %2239 }
 0x43d   :  { %v2242_v16 = vpop.eup %2241 }
 0x43e   :  { %v921_v17 = vmul.f32 %v2242_v16, %v2240_v15 }
 0x440   :  { %923 = vst.msk [vmem:[#allocation9 + $0x8] sm:$0x3] %vm54_vm0, %v921_v17  ;;  %v929_v18 = vpack.c.bf16 %v921_v17, %v921_v17 }
 0x442   :  { %2039 = vmatmul.mubr.msk.bf16.vlgmr.msra.gmra.mrb[32].mxu0 %vm96_vm2, %v929_v18  ;;  %2047 = vmatmul.mubr.msk.bf16.vlgmr.msra.gmra.mrb[32].mxu1 %vm96_vm2, %v929_v18 }
 0x443   :  { %2051 = vmatpush3.bf16.msra.mxu0 %v2457_v7  ;;  %2059 = vmatpush3.bf16.msra.mxu1 %v2461_v8 }
 0x444   :  { %2052 = vmatprep.subr.bf16.mxu0 %v2389_v0  ;;  %2060 = vmatprep.subr.bf16.mxu1 %v2389_v0 }
 0x445   :  { %2054 = vmatprep.mubr.msk.bf16.mxu0 %vm2390_vm1, %v2389_v0  ;;  %2062 = vmatprep.mubr.msk.bf16.mxu1 %vm2390_vm1, %v2389_v0 }
 0x447   :  { %2053 = vmatpush3.bf16.msra.mxu0 %v2467_v9  ;;  %2061 = vmatpush3.bf16.msra.mxu1 %v2471_v10 }
 0x448   :  { %2066 = vmatprep.subr.bf16.mxu0 %v2389_v0  ;;  %2074 = vmatprep.subr.bf16.mxu1 %v2389_v0 }
 0x44a   :  { %2055 = vmatmul.mubr.msk.bf16.vlgmr.msra.gmra.mrb[36].mxu0 %vm96_vm2, %v929_v18  ;;  %2063 = vmatmul.mubr.msk.bf16.vlgmr.msra.gmra.mrb[36].mxu1 %vm96_vm2, %v929_v18 }
 0x44b   :  { %2067 = vmatpush3.bf16.msra.mxu0 %v2444_v1  ;;  %2075 = vmatpush3.bf16.msra.mxu1 %v2446_v2 }
 0x44c   :  { %2068 = vmatprep.subr.bf16.mxu0 %v2389_v0  ;;  %2076 = vmatprep.subr.bf16.mxu1 %v2389_v0 }
 0x44d   :  { %2070 = vmatprep.mubr.msk.bf16.mxu0 %vm2390_vm1, %v2389_v0  ;;  %2078 = vmatprep.mubr.msk.bf16.mxu1 %vm2390_vm1, %v2389_v0 }
 0x44f   :  { %2069 = vmatpush3.bf16.msra.mxu0 %v2449_v3  ;;  %2077 = vmatpush3.bf16.msra.mxu1 %v2453_v4 }
 0x450   :  { %2082 = vmatprep.subr.bf16.mxu0 %v2389_v0  ;;  %2090 = vmatprep.subr.bf16.mxu1 %v2389_v0 }
 0x515   :  { %v967_v21 = vpop.f32.mrb[32].mxu0  ;;  %v1014_v22 = vpop.f32.mrb[32].mxu1 }
 0x516   :  { %v973_v23 = vadd.f32 %v967_v21, %v925_v19  ;;  %v1020_v24 = vadd.f32 %v1014_v22, %v926_v20  ;;  %v2040_v25 = vpop.f32.mrb[33].mxu0  ;;  %v2048_v26 = vpop.f32.mrb[33].mxu1  ;;  %v1127_v21 = vld [vmem:[#allocation4 + $0x16] sm:$0x3] }
 0x517   :  { %v970_v27 = vpop.f32.mrb[34].mxu0  ;;  %v1017_v28 = vpop.f32.mrb[34].mxu1 }
 0x518   :  { %v1783_v29 = vmul.f32 -1.442695, %v973_v23  ;;  %v1785_v30 = vmul.f32 -1.442695, %v1020_v24  ;;  %v2041_v31 = vpop.f32.mrb[35].mxu0  ;;  %v2049_v32 = vpop.f32.mrb[35].mxu1 }
 0x519   :  { %v1126_v27 = vld [vmem:[#allocation4 + $0x14] sm:$0x3] }
 0x51a   :  { %2243 = vpow2.f32 %v1783_v29 }
 0x51b   :  { %2245 = vpow2.f32 %v1785_v30 }
 0x51d   :  { %v1061_v34 = vpop.f32.mrb[36].mxu0  ;;  %v1103_v35 = vpop.f32.mrb[36].mxu1 }
 0x51e   :  { %v1109_v36 = vadd.f32 %v1103_v35, %v928_v33  ;;  %v2056_v37 = vpop.f32.mrb[37].mxu0  ;;  %v2064_v38 = vpop.f32.mrb[37].mxu1  ;;  %v1067_v45 = vadd.f32 %v1061_v34, %v927_v39 }
 0x51f   :  { %v1064_v40 = vpop.f32.mrb[38].mxu0  ;;  %v1106_v41 = vpop.f32.mrb[38].mxu1 }
 0x520   :  { %v2057_v42 = vpop.f32.mrb[39].mxu0  ;;  %v2065_v43 = vpop.f32.mrb[39].mxu1  ;;  %v1788_v44 = vmul.f32 -1.442695, %v1109_v36 }
 0x522   :  { %2247 = vpow2.f32 %v1788_v44 }
 0x523   :  { %2249 = vtanh.f32 %v1067_v45 }
 0x524   :  { %v2244_v46 = vpop.eup %2243 }
 0x525   :  { %v2246_v47 = vpop.eup %2245  ;;  %v977_v48 = vadd.f32 1.0, %v2244_v46 }
 0x526   :  { %v1024_v49 = vadd.f32 1.0, %v2246_v47 }
 0x527   :  { %2251 = vrcp.f32 %v977_v48 }
 0x528   :  { %2253 = vrcp.f32 %v1024_v49 }
 0x52c   :  { %v2248_v50 = vpop.eup %2247 }
 0x52d   :  { %v2250_v51 = vpop.eup %2249  ;;  %v1113_v55 = vadd.f32 1.0, %v2248_v50 }
 0x52f   :  { %2255 = vrcp.f32 %v1113_v55 }
 0x531   :  { %v2252_v52 = vpop.eup %2251 }
 0x532   :  { %v2254_v53 = vpop.eup %2253  ;;  %v1117_v54 = vmul.f32 %v2252_v52, %v2250_v51 }
 0x533   :  { %v1116_v56 = vmul.f32 %v2254_v53, %v2595_v14 }
 0x535   :  { %v2628_v57 = vadd.f32 %v1117_v54, %v1116_v56 }
 0x537   :  { %2257 = vtanh.f32 %v2628_v57 }
 0x539   :  { %v2256_v58 = vpop.eup %2255 }
 0x541   :  { %v2258_v59 = vpop.eup %2257 }
 0x542   :  { %v1120_v60 = vmul.f32 %v2258_v59, %v2256_v58 }
 0x544   :  { %1122 = vst.msk [vmem:[#allocation9 + $0x6] sm:$0x3] %vm54_vm0, %v1120_v60  ;;  %v1128_v61 = vpack.c.bf16 %v1120_v60, %v1120_v60 }
 0x546   :  { %2071 = vmatmul.mubr.msk.bf16.vlgmr.msra.gmra.mrb[40].mxu0 %vm96_vm2, %v1128_v61  ;;  %2079 = vmatmul.mubr.msk.bf16.vlgmr.msra.gmra.mrb[40].mxu1 %vm96_vm2, %v1128_v61 }
 0x547   :  { %2083 = vmatpush3.bf16.msra.mxu0 %v2457_v7  ;;  %2091 = vmatpush3.bf16.msra.mxu1 %v2461_v8 }
 0x548   :  { %2084 = vmatprep.subr.bf16.mxu0 %v2389_v0  ;;  %2092 = vmatprep.subr.bf16.mxu1 %v2389_v0 }
 0x549   :  { %2086 = vmatprep.mubr.msk.bf16.mxu0 %vm2390_vm1, %v2389_v0  ;;  %2094 = vmatprep.mubr.msk.bf16.mxu1 %vm2390_vm1, %v2389_v0 }
 0x54b   :  { %2085 = vmatpush3.bf16.msra.mxu0 %v2467_v9  ;;  %2093 = vmatpush3.bf16.msra.mxu1 %v2471_v10 }
 0x54c   :  { %2098 = vmatprep.subr.bf16.mxu0 %v2389_v0  ;;  %2106 = vmatprep.subr.bf16.mxu1 %v2389_v0 }
 0x54e   :  { %2087 = vmatmul.mubr.msk.bf16.vlgmr.msra.gmra.mrb[44].mxu0 %vm96_vm2, %v1128_v61  ;;  %2095 = vmatmul.mubr.msk.bf16.vlgmr.msra.gmra.mrb[44].mxu1 %vm96_vm2, %v1128_v61 }
 0x54f   :  { %2099 = vmatpush3.bf16.msra.mxu0 %v2444_v1  ;;  %2107 = vmatpush3.bf16.msra.mxu1 %v2446_v2 }
 0x550   :  { %2100 = vmatprep.subr.bf16.mxu0 %v2389_v0  ;;  %2108 = vmatprep.subr.bf16.mxu1 %v2389_v0 }
 0x551   :  { %2102 = vmatprep.mubr.msk.bf16.mxu0 %vm2390_vm1, %v2389_v0  ;;  %2110 = vmatprep.mubr.msk.bf16.mxu1 %vm2390_vm1, %v2389_v0 }
 0x553   :  { %2101 = vmatpush3.bf16.msra.mxu0 %v2449_v3  ;;  %2109 = vmatpush3.bf16.msra.mxu1 %v2453_v4 }
 0x554   :  { %2114 = vmatprep.subr.bf16.mxu0 %v2389_v0  ;;  %2122 = vmatprep.subr.bf16.mxu1 %v2389_v0 }
 0x619   :  { %v1166_v5 = vpop.f32.mrb[40].mxu0  ;;  %v1213_v6 = vpop.f32.mrb[40].mxu1 }
 0x61a   :  { %v1172_v11 = vadd.f32 %v1166_v5, %v1124_v62  ;;  %v1219_v12 = vadd.f32 %v1213_v6, %v1125_v63  ;;  %v2072_v13 = vpop.f32.mrb[41].mxu0  ;;  %v2080_v14 = vpop.f32.mrb[41].mxu1  ;;  %v1325_v62 = vld [vmem:[#allocation4 + $0xc] sm:$0x3] }
 0x61b   :  { %v1169_v15 = vpop.f32.mrb[42].mxu0  ;;  %v1216_v16 = vpop.f32.mrb[42].mxu1 }
 0x61c   :  { %v1790_v17 = vmul.f32 -1.442695, %v1172_v11  ;;  %v1792_v18 = vmul.f32 -1.442695, %v1219_v12  ;;  %v2073_v19 = vpop.f32.mrb[43].mxu0  ;;  %v2081_v20 = vpop.f32.mrb[43].mxu1 }
 0x61e   :  { %2259 = vpow2.f32 %v1790_v17 }
 0x61f   :  { %2261 = vpow2.f32 %v1792_v18 }
 0x621   :  { %v1260_v22 = vpop.f32.mrb[44].mxu0  ;;  %v1302_v23 = vpop.f32.mrb[44].mxu1 }
 0x622   :  { %v1308_v24 = vadd.f32 %v1302_v23, %v1127_v21  ;;  %v2088_v25 = vpop.f32.mrb[45].mxu0  ;;  %v2096_v26 = vpop.f32.mrb[45].mxu1  ;;  %v1266_v33 = vadd.f32 %v1260_v22, %v1126_v27 }
 0x623   :  { %v1263_v28 = vpop.f32.mrb[46].mxu0  ;;  %v1305_v29 = vpop.f32.mrb[46].mxu1 }
 0x624   :  { %v2089_v30 = vpop.f32.mrb[47].mxu0  ;;  %v2097_v31 = vpop.f32.mrb[47].mxu1  ;;  %v1795_v32 = vmul.f32 -1.442695, %v1308_v24 }
 0x625   :  { %v2307_v30 = vld [vmem:[#allocation7 + $0x20] sm:$0xff]   ;;  %v2308_v31 = vld [vmem:[#allocation7 + $0x30] sm:$0xff]  }
 0x626   :  { %2263 = vpow2.f32 %v1795_v32  ;;  %v2309_v32 = vld [vmem:[#allocation7 + $0x28] sm:$0xff]  }
 0x627   :  { %2265 = vtanh.f32 %v1266_v33  ;;  %v2310_v33 = vld [vmem:[#allocation7 + $0x38] sm:$0xff]  }
 0x628   :  { %v2260_v34 = vpop.eup %2259 }
 0x629   :  { %v2262_v35 = vpop.eup %2261  ;;  %v1176_v36 = vadd.f32 1.0, %v2260_v34  ;;  %v1521_v34 = vld [vmem:[#allocation4] sm:$0x3] }
 0x62a   :  { %v1223_v37 = vadd.f32 1.0, %v2262_v35  ;;  %v1522_v35 = vld [vmem:[#allocation4 + $0x2] sm:$0x3] }
 0x62b   :  { %2267 = vrcp.f32 %v1176_v36 }
 0x62c   :  { %2269 = vrcp.f32 %v1223_v37 }
 0x630   :  { %v2264_v38 = vpop.eup %2263 }
 0x631   :  { %v2266_v39 = vpop.eup %2265  ;;  %v1312_v43 = vadd.f32 1.0, %v2264_v38 }
 0x633   :  { %2271 = vrcp.f32 %v1312_v43 }
 0x635   :  { %v2268_v40 = vpop.eup %2267 }
 0x636   :  { %v2270_v41 = vpop.eup %2269  ;;  %v1316_v42 = vmul.f32 %v2268_v40, %v2266_v39 }
 0x637   :  { %v1315_v44 = vmul.f32 %v2270_v41, %v2628_v57 }
 0x639   :  { %v2661_v45 = vadd.f32 %v1316_v42, %v1315_v44 }
 0x63b   :  { %2273 = vtanh.f32 %v2661_v45 }
 0x63d   :  { %v2272_v46 = vpop.eup %2271 }
 0x645   :  { %v2274_v47 = vpop.eup %2273 }
 0x646   :  { %v1319_v48 = vmul.f32 %v2274_v47, %v2272_v46  ;;  %v1524_v47 = vld [vmem:[#allocation4 + $0x6] sm:$0x3] }
 0x648   :  { %1321 = vst.msk [vmem:[#allocation9 + $0x4] sm:$0x3] %vm54_vm0, %v1319_v48  ;;  %v1327_v49 = vpack.c.bf16 %v1319_v48, %v1319_v48 }
 0x64a   :  { %2103 = vmatmul.mubr.msk.bf16.vlgmr.msra.gmra.mrb[48].mxu0 %vm96_vm2, %v1327_v49  ;;  %2111 = vmatmul.mubr.msk.bf16.vlgmr.msra.gmra.mrb[48].mxu1 %vm96_vm2, %v1327_v49 }
 0x64b   :  { %2115 = vmatpush3.bf16.msra.mxu0 %v2457_v7  ;;  %2123 = vmatpush3.bf16.msra.mxu1 %v2461_v8 }
 0x64c   :  { %2116 = vmatprep.subr.bf16.mxu0 %v2389_v0  ;;  %2124 = vmatprep.subr.bf16.mxu1 %v2389_v0 }
 0x64d   :  { %2118 = vmatprep.mubr.msk.bf16.mxu0 %vm2390_vm1, %v2389_v0  ;;  %2126 = vmatprep.mubr.msk.bf16.mxu1 %vm2390_vm1, %v2389_v0 }
 0x64f   :  { %2117 = vmatpush3.bf16.msra.mxu0 %v2467_v9  ;;  %2125 = vmatpush3.bf16.msra.mxu1 %v2471_v10 }
 0x650   :  { %2130 = vmatprep.subr.bf16.mxu0 %v2389_v0  ;;  %2138 = vmatprep.subr.bf16.mxu1 %v2389_v0 }
 0x652   :  { %2119 = vmatmul.mubr.msk.bf16.vlgmr.msra.gmra.mrb[52].mxu0 %vm96_vm2, %v1327_v49  ;;  %2127 = vmatmul.mubr.msk.bf16.vlgmr.msra.gmra.mrb[52].mxu1 %vm96_vm2, %v1327_v49 }
 0x653   :  { %2131 = vmatpush3.bf16.msra.mxu0 %v2444_v1  ;;  %2139 = vmatpush3.bf16.msra.mxu1 %v2446_v2  ;;  %v1323_v1 = vld [vmem:[#allocation4 + $0x8] sm:$0x3]  ;;  %v1324_v2 = vld [vmem:[#allocation4 + $0xa] sm:$0x3] }
 0x654   :  { %2132 = vmatprep.subr.bf16.mxu0 %v2389_v0  ;;  %2140 = vmatprep.subr.bf16.mxu1 %v2389_v0 }
 0x655   :  { %2134 = vmatprep.mubr.msk.bf16.mxu0 %vm2390_vm1, %v2389_v0  ;;  %2142 = vmatprep.mubr.msk.bf16.mxu1 %vm2390_vm1, %v2389_v0 }
 0x657   :  { %2133 = vmatpush3.bf16.msra.mxu0 %v2449_v3  ;;  %2141 = vmatpush3.bf16.msra.mxu1 %v2453_v4  ;;  %v1326_v4 = vld [vmem:[#allocation4 + $0xe] sm:$0x3] }
 0x658   :  { %2146 = vmatprep.subr.bf16.mxu0 %v2389_v0  ;;  %2154 = vmatprep.subr.bf16.mxu1 %v2389_v0 }
 0x71d   :  { %v1365_v7 = vpop.f32.mrb[48].mxu0  ;;  %v1412_v8 = vpop.f32.mrb[48].mxu1 }
 0x71e   :  { %v1371_v9 = vadd.f32 %v1365_v7, %v1323_v1  ;;  %v1418_v10 = vadd.f32 %v1412_v8, %v1324_v2  ;;  %v2104_v50 = vpop.f32.mrb[49].mxu0  ;;  %v2112_v51 = vpop.f32.mrb[49].mxu1  ;;  %v1523_v8 = vld [vmem:[#allocation4 + $0x4] sm:$0x3] }
 0x71f   :  { %v1368_v52 = vpop.f32.mrb[50].mxu0  ;;  %v1415_v53 = vpop.f32.mrb[50].mxu1 }
 0x720   :  { %v1797_v54 = vmul.f32 -1.442695, %v1371_v9  ;;  %v1799_v55 = vmul.f32 -1.442695, %v1418_v10  ;;  %v2105_v56 = vpop.f32.mrb[51].mxu0  ;;  %v2113_v3 = vpop.f32.mrb[51].mxu1 }
 0x722   :  { %2275 = vpow2.f32 %v1797_v54 }
 0x723   :  { %2277 = vpow2.f32 %v1799_v55 }
 0x725   :  { %v1459_v57 = vpop.f32.mrb[52].mxu0  ;;  %v1501_v58 = vpop.f32.mrb[52].mxu1 }
 0x726   :  { %v1507_v59 = vadd.f32 %v1501_v58, %v1326_v4  ;;  %v2120_v60 = vpop.f32.mrb[53].mxu0  ;;  %v2128_v61 = vpop.f32.mrb[53].mxu1  ;;  %v1465_v13 = vadd.f32 %v1459_v57, %v1325_v62 }
 0x727   :  { %v1462_v63 = vpop.f32.mrb[54].mxu0  ;;  %v1504_v5 = vpop.f32.mrb[54].mxu1 }
 0x728   :  { %v2121_v6 = vpop.f32.mrb[55].mxu0  ;;  %v2129_v11 = vpop.f32.mrb[55].mxu1  ;;  %v1802_v12 = vmul.f32 -1.442695, %v1507_v59 }
 0x72a   :  { %2279 = vpow2.f32 %v1802_v12 }
 0x72b   :  { %2281 = vtanh.f32 %v1465_v13 }
 0x72c   :  { %v2276_v14 = vpop.eup %2275 }
 0x72d   :  { %v2278_v15 = vpop.eup %2277  ;;  %v1375_v16 = vadd.f32 1.0, %v2276_v14 }
 0x72e   :  { %v1422_v17 = vadd.f32 1.0, %v2278_v15 }
 0x72f   :  { %2283 = vrcp.f32 %v1375_v16 }
 0x730   :  { %2285 = vrcp.f32 %v1422_v17 }
 0x734   :  { %v2280_v18 = vpop.eup %2279 }
 0x735   :  { %v2282_v19 = vpop.eup %2281  ;;  %v1511_v23 = vadd.f32 1.0, %v2280_v18 }
 0x737   :  { %2287 = vrcp.f32 %v1511_v23 }
 0x739   :  { %v2284_v20 = vpop.eup %2283 }
 0x73a   :  { %v2286_v21 = vpop.eup %2285  ;;  %v1515_v22 = vmul.f32 %v2284_v20, %v2282_v19 }
 0x73b   :  { %v1514_v24 = vmul.f32 %v2286_v21, %v2661_v45 }
 0x73d   :  { %v2694_v25 = vadd.f32 %v1515_v22, %v1514_v24 }
 0x73f   :  { %2289 = vtanh.f32 %v2694_v25 }
 0x741   :  { %v2288_v26 = vpop.eup %2287 }
 0x749   :  { %v2290_v27 = vpop.eup %2289 }
 0x74a   :  { %v1518_v28 = vmul.f32 %v2290_v27, %v2288_v26 }
 0x74c   :  { %1520 = vst.msk [vmem:[#allocation9 + $0x2] sm:$0x3] %vm54_vm0, %v1518_v28  ;;  %v1525_v29 = vpack.c.bf16 %v1518_v28, %v1518_v28 }
 0x74e   :  { %2135 = vmatmul.mubr.msk.bf16.vlgmr.msra.gmra.mrb[56].mxu0 %vm96_vm2, %v1525_v29  ;;  %2143 = vmatmul.mubr.msk.bf16.vlgmr.msra.gmra.mrb[56].mxu1 %vm96_vm2, %v1525_v29 }
 0x74f   :  { %2147 = vmatpush3.bf16.msra.mxu0 %v2307_v30  ;;  %2155 = vmatpush3.bf16.msra.mxu1 %v2308_v31 }
 0x750   :  { %2148 = vmatprep.subr.bf16.mxu0 %v2389_v0  ;;  %2156 = vmatprep.subr.bf16.mxu1 %v2389_v0 }
 0x751   :  { %2150 = vmatprep.mubr.msk.bf16.mxu0 %vm2390_vm1, %v2389_v0  ;;  %2158 = vmatprep.mubr.msk.bf16.mxu1 %vm2390_vm1, %v2389_v0 }
 0x753   :  { %2149 = vmatpush3.bf16.msra.mxu0 %v2309_v32  ;;  %2157 = vmatpush3.bf16.msra.mxu1 %v2310_v33 }
 0x756   :  { %2151 = vmatmul.mubr.msk.bf16.vlgmr.msra.gmra.mrb[60].mxu0 %vm96_vm2, %v1525_v29  ;;  %2159 = vmatmul.mubr.msk.bf16.vlgmr.msra.gmra.mrb[60].mxu1 %vm96_vm2, %v1525_v29 }
 0x821   :  { %v1563_v36 = vpop.f32.mrb[56].mxu0  ;;  %v1610_v37 = vpop.f32.mrb[56].mxu1 }
 0x822   :  { %v1569_v38 = vadd.f32 %v1563_v36, %v1521_v34  ;;  %v1616_v39 = vadd.f32 %v1610_v37, %v1522_v35  ;;  %v2136_v40 = vpop.f32.mrb[57].mxu0  ;;  %v2144_v41 = vpop.f32.mrb[57].mxu1 }
 0x823   :  { %v1566_v42 = vpop.f32.mrb[58].mxu0  ;;  %v1613_v43 = vpop.f32.mrb[58].mxu1 }
 0x824   :  { %v1804_v44 = vmul.f32 -1.442695, %v1569_v38  ;;  %v1806_v0 = vmul.f32 -1.442695, %v1616_v39  ;;  %v2137_v45 = vpop.f32.mrb[59].mxu0  ;;  %v2145_v46 = vpop.f32.mrb[59].mxu1 }
 0x826   :  { %2291 = vpow2.f32 %v1804_v44 }
 0x827   :  { %2293 = vpow2.f32 %v1806_v0 }
 0x829   :  { %v1657_v48 = vpop.f32.mrb[60].mxu0  ;;  %v1699_v49 = vpop.f32.mrb[60].mxu1 }
 0x82a   :  { %v1705_v1 = vadd.f32 %v1699_v49, %v1524_v47  ;;  %v2152_v2 = vpop.f32.mrb[61].mxu0  ;;  %v2160_v7 = vpop.f32.mrb[61].mxu1  ;;  %v1663_v53 = vadd.f32 %v1657_v48, %v1523_v8 }
 0x82b   :  { %v1660_v9 = vpop.f32.mrb[62].mxu0  ;;  %v1702_v10 = vpop.f32.mrb[62].mxu1 }
 0x82c   :  { %v2153_v50 = vpop.f32.mrb[63].mxu0  ;;  %v2161_v51 = vpop.f32.mrb[63].mxu1  ;;  %v1809_v52 = vmul.f32 -1.442695, %v1705_v1 }
 0x82e   :  { %2295 = vpow2.f32 %v1809_v52 }
 0x82f   :  { %2297 = vtanh.f32 %v1663_v53 }
 0x830   :  { %v2292_v54 = vpop.eup %2291 }
 0x831   :  { %v2294_v55 = vpop.eup %2293  ;;  %v1573_v56 = vadd.f32 1.0, %v2292_v54 }
 0x832   :  { %v1620_v3 = vadd.f32 1.0, %v2294_v55 }
 0x833   :  { %2299 = vrcp.f32 %v1573_v56 }
 0x834   :  { %2301 = vrcp.f32 %v1620_v3 }
 0x838   :  { %v2296_v4 = vpop.eup %2295 }
 0x839   :  { %v2298_v57 = vpop.eup %2297  ;;  %v1709_v61 = vadd.f32 1.0, %v2296_v4 }
 0x83b   :  { %2303 = vrcp.f32 %v1709_v61 }
 0x83d   :  { %v2300_v58 = vpop.eup %2299 }
 0x83e   :  { %v2302_v59 = vpop.eup %2301  ;;  %v1713_v60 = vmul.f32 %v2300_v58, %v2298_v57 }
 0x83f   :  { %v1712_v62 = vmul.f32 %v2302_v59, %v2694_v25 }
 0x841   :  { %v1714_v63 = vadd.f32 %v1713_v60, %v1712_v62 }
 0x843   :  { %2305 = vtanh.f32 %v1714_v63  ;;  %1719 = vst.msk [vmem:[#allocation3] sm:$0x3] %vm54_vm0, %v1714_v63 }
 0x845   :  { %v2304_v5 = vpop.eup %2303 }
 0x84d   :  { %v2306_v6 = vpop.eup %2305 }
 0x84e   :  { %v1716_v11 = vmul.f32 %v2306_v6, %v2304_v5 }
 0x850   :  { %1717 = vst.msk [vmem:[#allocation9] sm:$0x3] %vm54_vm0, %v1716_v11  ;;  %1718 = vst.msk [vmem:[#allocation2] sm:$0x3] %vm54_vm0, %v1716_v11 }
 0x851   :  { %2366 = shalt.err (!%p2363_p6)
}
 0x852   :  { %s2367_s12 = scalar_lea.hbm %s2729_s2, 256 }
 0x853   :  { %p2368_p7 = scmp.ne.s32.totalorder %s2729_s2, %s2367_s12  ;;  %p2371_p8 = scmp.lt.u32.totalorder %s2367_s12, %s2729_s2 }
 0x855   :  { %p2373_p9 = pnand %p2371_p8, %p2368_p7 }
 0x857   :  { %2376 = shalt.err (!%p2373_p9)
}
 0x858   :  { %1735 = dma.vmem_to_hbm [thread:$0]  %s1730_s8, 256, %s2729_s2, [#allocation6], %s2384_s19, %s2384_s19, %s2385_s20  }
 0x859   :  { %2381 = dma.done.wait [#allocation6], 256  }
 0x85a   :  { %2382 = vsyncadd [#allocation6], 4294967040 }
 0x85b   :  { %1739 = vsyncpa [#allocation5], 1 }
 0x85c   :  { %1740 = vsyncpa [#allocation8], 1 }
 0x85d   :  { %1741 = vsyncpa [#allocation6], 1 }

// kernel: bilstm_transformer_forward.4
= control target key start
LH: loop header
LB: loop body
LE: loop exit
PB: predicated region body
PF: predicated region fallthrough
CT: control target
= control target key end

     0   :  { %7 = vsyncpa [#allocation5], 0  ;;  %s2710_s0 = inlined_call_operand.hbm [shape: f32[8,4,2,32], index: 0, kind: input, shape index: {}]   ;;  %s2711_s1 = inlined_call_operand.hbm [shape: bf16[4,32,32], index: 1, kind: input, shape index: {}]   ;;  %s2712_s2 = inlined_call_operand.hbm [shape: f32[8,2,32], index: 2, kind: output, shape index: {}]  }
   0x1   :  { %8 = vsyncpa [#allocation8], 0 }
   0x2   :  { %9 = vsyncpa [#allocation6], 0  ;;  %s2366_s9 = smov [#allocation4]   ;;  %s2294_s13 = scalar_lea.hbm %s2710_s0, 1024 }
   0x3   :  { %s15_s10 = sshll.u32 %s2366_s9, 4  ;;  %p2295_p0 = scmp.ne.s32.totalorder %s2710_s0, %s2294_s13  ;;  %s16_s10 = int_to_ptr.vmem [resolvable:$true] %s15_s10 }
   0x4   :  { %p2298_p1 = scmp.lt.u32.totalorder %s2294_s13, %s2710_s0 }
   0x6   :  { %p2300_p2 = pnand %p2298_p1, %p2295_p0 }
   0x8   :  { %2303 = shalt.err (!%p2300_p2)
}
   0x9   :  { %s2304_s18 = scalar_lea.vmem %s16_s10, 1024  ;;  %p2309_p4 = scmp.lt.s32.totalorder %s16_s10, %s16_s10 }
   0xa   :  { %p2305_p3 = scmp.ne.s32.totalorder %s16_s10, %s2304_s18  ;;  %p2310_p5 = scmp.lt.s32.totalorder %s2304_s18, %s2304_s18 }
   0xc   :  { %p2311_p6 = por %p2310_p5, %p2309_p4 }
   0xe   :  { %p2312_p7 = pnand %p2311_p6, %p2305_p3 }
  0x10   :  { %2315 = shalt.err (!%p2312_p7)
}
  0x11   :  { %s2367_s19 = smov 32   ;;  %s2368_s20 = smov 2  }
  0x12   :  { %21 = dma.hbm_to_vmem [thread:$0]  %s2710_s0, 1024, %s16_s10, [#allocation5], %s2367_s19, %s2367_s19, %s2368_s20  }
  0x13   :  { %s2369_s23 = smov [#allocation7]   ;;  %s2316_s27 = scalar_lea.hbm %s2711_s1, 1024 }
  0x14   :  { %s27_s24 = sshll.u32 %s2369_s23, 4  ;;  %p2317_p8 = scmp.ne.s32.totalorder %s2711_s1, %s2316_s27  ;;  %s28_s24 = int_to_ptr.vmem [resolvable:$true] %s27_s24 }
  0x15   :  { %p2320_p9 = scmp.lt.u32.totalorder %s2316_s27, %s2711_s1 }
  0x17   :  { %p2322_p10 = pnand %p2320_p9, %p2317_p8 }
  0x19   :  { %2325 = shalt.err (!%p2322_p10)
}
  0x1a   :  { %s2326_s4 = scalar_lea.vmem %s28_s24, 1024  ;;  %p2331_p12 = scmp.lt.s32.totalorder %s28_s24, %s28_s24 }
  0x1b   :  { %p2327_p11 = scmp.ne.s32.totalorder %s28_s24, %s2326_s4  ;;  %p2332_p13 = scmp.lt.s32.totalorder %s2326_s4, %s2326_s4 }
  0x1d   :  { %p2333_p0 = por %p2332_p13, %p2331_p12 }
  0x1f   :  { %p2334_p1 = pnand %p2333_p0, %p2327_p11 }
  0x21   :  { %2337 = shalt.err (!%p2334_p1)
}
  0x22   :  { %s2370_s0 = smov 64   ;;  %s2371_s5 = smov 4  }
  0x23   :  { %33 = dma.hbm_to_vmem [thread:$0]  %s2711_s1, 1024, %s28_s24, [#allocation8], %s2370_s0, %s2370_s0, %s2371_s5  }
  0x24   :  { %2360 = dma.done.wait [#allocation5], 1024  }
  0x25   :  { %2361 = vsyncadd [#allocation5], 4294966272 }
  0x26   :  { %2362 = dma.done.wait [#allocation8], 1024  }
  0x27   :  { %2363 = vsyncadd [#allocation8], 4294966272  ;;  %vm45_vm0 = vcmask 254976   ;;  %v2372_v0 = vmov 0.0   ;;  %vm2373_vm1 = vmmov 0   ;;  %v2427_v1 = vld [vmem:[#allocation7] sm:$0xff]  }
  0x28   :  { %1889 = vmatprep.subr.bf16.mxu0 %v2372_v0  ;;  %1897 = vmatprep.subr.bf16.mxu1 %v2372_v0  ;;  %46 = vst.msk [vmem:[#allocation2] sm:$0x3] %vm45_vm0, %v2372_v0  ;;  %47 = vst.msk [vmem:[#allocation3] sm:$0x3] %vm45_vm0, %v2372_v0  ;;  %v2429_v2 = vld [vmem:[#allocation7 + $0x10] sm:$0xff]   ;;  %v2432_v3 = vld [vmem:[#allocation7 + $0x8] sm:$0xff]  }
  0x29   :  { %1893 = vmatprep.mubr.msk.bf16.mxu0 %vm2373_vm1, %v2372_v0  ;;  %1901 = vmatprep.mubr.msk.bf16.mxu1 %vm2373_vm1, %v2372_v0  ;;  %v2436_v4 = vld [vmem:[#allocation7 + $0x18] sm:$0xff]   ;;  %vm86_vm2 = vcmask 261120   ;;  %v2440_v7 = vld [vmem:[#allocation7 + $0x20] sm:$0xff]   ;;  %v2444_v8 = vld [vmem:[#allocation7 + $0x30] sm:$0xff]   ;;  %s2374_s1 = smov [#allocation9]  }
  0x2a   :  { %1890 = vmatpush3.bf16.msra.mxu0 %v2427_v1  ;;  %1898 = vmatpush3.bf16.msra.mxu1 %v2429_v2  ;;  %v2450_v9 = vld [vmem:[#allocation7 + $0x28] sm:$0xff]   ;;  %v2454_v10 = vld [vmem:[#allocation7 + $0x38] sm:$0xff]   ;;  %v69_v11 = vld [vmem:[#allocation4] sm:$0x3]  ;;  %s1716_s8 = sshll.u32 %s2374_s1, 4  ;;  %s1717_s8 = int_to_ptr.vmem [resolvable:$true] %s1716_s8 }
  0x2b   :  { %1891 = vmatprep.subr.bf16.mxu0 %v2372_v0  ;;  %1899 = vmatprep.subr.bf16.mxu1 %v2372_v0  ;;  %v70_v12 = vld [vmem:[#allocation4 + $0x2] sm:$0x3]  ;;  %v72_v25 = vld [vmem:[#allocation4 + $0x6] sm:$0x3]  ;;  %v71_v27 = vld [vmem:[#allocation4 + $0x4] sm:$0x3]  ;;  %p2343_p3 = scmp.lt.s32.totalorder %s1717_s8, %s1717_s8 }
  0x2c   :  { %v317_v55 = vld [vmem:[#allocation4 + $0x8] sm:$0x3]  ;;  %v318_v56 = vld [vmem:[#allocation4 + $0xa] sm:$0x3]  ;;  %s2338_s9 = scalar_lea.vmem %s1717_s8, 256 }
  0x2d   :  { %p2339_p2 = scmp.ne.s32.totalorder %s1717_s8, %s2338_s9  ;;  %p2344_p4 = scmp.lt.s32.totalorder %s2338_s9, %s2338_s9 }
  0x2e   :  { %1892 = vmatpush3.bf16.msra.mxu0 %v2432_v3  ;;  %1900 = vmatpush3.bf16.msra.mxu1 %v2436_v4 }
  0x2f   :  { %v67_v5 = vld [vmem:[#allocation2] sm:$0x3]  ;;  %1905 = vmatprep.subr.bf16.mxu0 %v2372_v0  ;;  %1913 = vmatprep.subr.bf16.mxu1 %v2372_v0  ;;  %v68_v44 = vld [vmem:[#allocation3] sm:$0x3]  ;;  %p2345_p5 = por %p2344_p4, %p2343_p3 }
  0x30   :  { %v73_v6 = vpack.c.bf16 %v67_v5, %v67_v5 }
  0x31   :  { %p2346_p6 = pnand %p2345_p5, %p2339_p2 }
  0x32   :  { %1894 = vmatmul.mubr.msk.bf16.vlgmr.msra.gmra.mrb[0].mxu0 %vm86_vm2, %v73_v6  ;;  %1902 = vmatmul.mubr.msk.bf16.vlgmr.msra.gmra.mrb[0].mxu1 %vm86_vm2, %v73_v6 }
  0x33   :  { %1906 = vmatpush3.bf16.msra.mxu0 %v2440_v7  ;;  %1914 = vmatpush3.bf16.msra.mxu1 %v2444_v8 }
  0x34   :  { %1907 = vmatprep.subr.bf16.mxu0 %v2372_v0  ;;  %1915 = vmatprep.subr.bf16.mxu1 %v2372_v0 }
  0x35   :  { %1909 = vmatprep.mubr.msk.bf16.mxu0 %vm2373_vm1, %v2372_v0  ;;  %1917 = vmatprep.mubr.msk.bf16.mxu1 %vm2373_vm1, %v2372_v0 }
  0x37   :  { %1908 = vmatpush3.bf16.msra.mxu0 %v2450_v9  ;;  %1916 = vmatpush3.bf16.msra.mxu1 %v2454_v10 }
  0x38   :  { %1921 = vmatprep.subr.bf16.mxu0 %v2372_v0  ;;  %1929 = vmatprep.subr.bf16.mxu1 %v2372_v0 }
  0x3a   :  { %1910 = vmatmul.mubr.msk.bf16.vlgmr.msra.gmra.mrb[4].mxu0 %vm86_vm2, %v73_v6  ;;  %1918 = vmatmul.mubr.msk.bf16.vlgmr.msra.gmra.mrb[4].mxu1 %vm86_vm2, %v73_v6 }
  0x3b   :  { %1922 = vmatpush3.bf16.msra.mxu0 %v2427_v1  ;;  %1930 = vmatpush3.bf16.msra.mxu1 %v2429_v2 }
  0x3c   :  { %1923 = vmatprep.subr.bf16.mxu0 %v2372_v0  ;;  %1931 = vmatprep.subr.bf16.mxu1 %v2372_v0 }
  0x3d   :  { %1925 = vmatprep.mubr.msk.bf16.mxu0 %vm2373_vm1, %v2372_v0  ;;  %1933 = vmatprep.mubr.msk.bf16.mxu1 %vm2373_vm1, %v2372_v0 }
  0x3f   :  { %1924 = vmatpush3.bf16.msra.mxu0 %v2432_v3  ;;  %1932 = vmatpush3.bf16.msra.mxu1 %v2436_v4 }
  0x40   :  { %1937 = vmatprep.subr.bf16.mxu0 %v2372_v0  ;;  %1945 = vmatprep.subr.bf16.mxu1 %v2372_v0 }
 0x105   :  { %v124_v13 = vpop.f32.mrb[0].mxu0  ;;  %v183_v15 = vpop.f32.mrb[0].mxu1 }
 0x106   :  { %v130_v14 = vadd.f32 %v124_v13, %v69_v11  ;;  %v1895_v16 = vpop.f32.mrb[1].mxu0  ;;  %v189_v17 = vadd.f32 %v183_v15, %v70_v12  ;;  %v1903_v18 = vpop.f32.mrb[1].mxu1 }
 0x107   :  { %v127_v19 = vpop.f32.mrb[2].mxu0  ;;  %v186_v21 = vpop.f32.mrb[2].mxu1 }
 0x108   :  { %v1732_v20 = vmul.f32 -1.442695, %v130_v14  ;;  %v1896_v22 = vpop.f32.mrb[3].mxu0  ;;  %v1736_v23 = vmul.f32 -1.442695, %v189_v17  ;;  %v1904_v24 = vpop.f32.mrb[3].mxu1 }
 0x109   :  { %v320_v14 = vld [vmem:[#allocation4 + $0xe] sm:$0x3] }
 0x10a   :  { %2162 = vpow2.f32 %v1732_v20  ;;  %v319_v20 = vld [vmem:[#allocation4 + $0xc] sm:$0x3] }
 0x10b   :  { %2164 = vpow2.f32 %v1736_v23 }
 0x10d   :  { %v242_v26 = vpop.f32.mrb[4].mxu0  ;;  %v296_v28 = vpop.f32.mrb[4].mxu1 }
 0x10e   :  { %v1911_v29 = vpop.f32.mrb[5].mxu0  ;;  %v302_v30 = vadd.f32 %v296_v28, %v72_v25  ;;  %v1919_v31 = vpop.f32.mrb[5].mxu1  ;;  %v248_v35 = vadd.f32 %v242_v26, %v71_v27 }
 0x10f   :  { %v245_v32 = vpop.f32.mrb[6].mxu0  ;;  %v299_v33 = vpop.f32.mrb[6].mxu1 }
 0x110   :  { %v1912_v34 = vpop.f32.mrb[7].mxu0  ;;  %v1743_v36 = vmul.f32 -1.442695, %v302_v30  ;;  %v1920_v37 = vpop.f32.mrb[7].mxu1 }
 0x112   :  { %2166 = vpow2.f32 %v1743_v36 }
 0x113   :  { %2168 = vtanh.f32 %v248_v35 }
 0x114   :  { %v2163_v38 = vpop.eup %2162 }
 0x115   :  { %v2165_v39 = vpop.eup %2164  ;;  %v134_v40 = vadd.f32 1.0, %v2163_v38 }
 0x116   :  { %v193_v41 = vadd.f32 1.0, %v2165_v39 }
 0x117   :  { %2170 = vrcp.f32 %v134_v40 }
 0x118   :  { %2172 = vrcp.f32 %v193_v41 }
 0x11c   :  { %v2167_v42 = vpop.eup %2166 }
 0x11d   :  { %v2169_v43 = vpop.eup %2168  ;;  %v306_v46 = vadd.f32 1.0, %v2167_v42 }
 0x11f   :  { %2174 = vrcp.f32 %v306_v46 }
 0x121   :  { %v2171_v45 = vpop.eup %2170 }
 0x122   :  { %v2173_v47 = vpop.eup %2172  ;;  %v310_v48 = vmul.f32 %v2171_v45, %v2169_v43  ;;  %v516_v43 = vld [vmem:[#allocation4 + $0x10] sm:$0x3] }
 0x123   :  { %v309_v49 = vmul.f32 %v2173_v47, %v68_v44  ;;  %v517_v44 = vld [vmem:[#allocation4 + $0x12] sm:$0x3] }
 0x125   :  { %v2479_v50 = vadd.f32 %v310_v48, %v309_v49 }
 0x127   :  { %2176 = vtanh.f32 %v2479_v50 }
 0x129   :  { %v2175_v51 = vpop.eup %2174 }
 0x131   :  { %v2177_v52 = vpop.eup %2176 }
 0x132   :  { %v313_v53 = vmul.f32 %v2177_v52, %v2175_v51 }
 0x134   :  { %315 = vst.msk [vmem:[#allocation9] sm:$0x3] %vm45_vm0, %v313_v53  ;;  %v321_v54 = vpack.c.bf16 %v313_v53, %v313_v53 }
 0x136   :  { %1926 = vmatmul.mubr.msk.bf16.vlgmr.msra.gmra.mrb[8].mxu0 %vm86_vm2, %v321_v54  ;;  %1934 = vmatmul.mubr.msk.bf16.vlgmr.msra.gmra.mrb[8].mxu1 %vm86_vm2, %v321_v54 }
 0x137   :  { %1938 = vmatpush3.bf16.msra.mxu0 %v2440_v7  ;;  %1946 = vmatpush3.bf16.msra.mxu1 %v2444_v8 }
 0x138   :  { %1939 = vmatprep.subr.bf16.mxu0 %v2372_v0  ;;  %1947 = vmatprep.subr.bf16.mxu1 %v2372_v0 }
 0x139   :  { %1941 = vmatprep.mubr.msk.bf16.mxu0 %vm2373_vm1, %v2372_v0  ;;  %1949 = vmatprep.mubr.msk.bf16.mxu1 %vm2373_vm1, %v2372_v0 }
 0x13b   :  { %1940 = vmatpush3.bf16.msra.mxu0 %v2450_v9  ;;  %1948 = vmatpush3.bf16.msra.mxu1 %v2454_v10 }
 0x13c   :  { %1953 = vmatprep.subr.bf16.mxu0 %v2372_v0  ;;  %1961 = vmatprep.subr.bf16.mxu1 %v2372_v0 }
 0x13e   :  { %1942 = vmatmul.mubr.msk.bf16.vlgmr.msra.gmra.mrb[12].mxu0 %vm86_vm2, %v321_v54  ;;  %1950 = vmatmul.mubr.msk.bf16.vlgmr.msra.gmra.mrb[12].mxu1 %vm86_vm2, %v321_v54 }
 0x13f   :  { %1954 = vmatpush3.bf16.msra.mxu0 %v2427_v1  ;;  %1962 = vmatpush3.bf16.msra.mxu1 %v2429_v2 }
 0x140   :  { %1955 = vmatprep.subr.bf16.mxu0 %v2372_v0  ;;  %1963 = vmatprep.subr.bf16.mxu1 %v2372_v0 }
 0x141   :  { %1957 = vmatprep.mubr.msk.bf16.mxu0 %vm2373_vm1, %v2372_v0  ;;  %1965 = vmatprep.mubr.msk.bf16.mxu1 %vm2373_vm1, %v2372_v0 }
 0x143   :  { %1956 = vmatpush3.bf16.msra.mxu0 %v2432_v3  ;;  %1964 = vmatpush3.bf16.msra.mxu1 %v2436_v4 }
 0x144   :  { %1969 = vmatprep.subr.bf16.mxu0 %v2372_v0  ;;  %1977 = vmatprep.subr.bf16.mxu1 %v2372_v0 }
 0x209   :  { %v359_v57 = vpop.f32.mrb[8].mxu0  ;;  %v406_v58 = vpop.f32.mrb[8].mxu1 }
 0x20a   :  { %v365_v59 = vadd.f32 %v359_v57, %v317_v55  ;;  %v412_v60 = vadd.f32 %v406_v58, %v318_v56  ;;  %v1927_v61 = vpop.f32.mrb[9].mxu0  ;;  %v1935_v62 = vpop.f32.mrb[9].mxu1  ;;  %v519_v57 = vld [vmem:[#allocation4 + $0x16] sm:$0x3] }
 0x20b   :  { %v362_v63 = vpop.f32.mrb[10].mxu0  ;;  %v409_v5 = vpop.f32.mrb[10].mxu1 }
 0x20c   :  { %v1745_v6 = vmul.f32 -1.442695, %v365_v59  ;;  %v1747_v11 = vmul.f32 -1.442695, %v412_v60  ;;  %v1928_v12 = vpop.f32.mrb[11].mxu0  ;;  %v1936_v13 = vpop.f32.mrb[11].mxu1 }
 0x20d   :  { %v518_v63 = vld [vmem:[#allocation4 + $0x14] sm:$0x3] }
 0x20e   :  { %2178 = vpow2.f32 %v1745_v6 }
 0x20f   :  { %2180 = vpow2.f32 %v1747_v11 }
 0x211   :  { %v453_v15 = vpop.f32.mrb[12].mxu0  ;;  %v495_v16 = vpop.f32.mrb[12].mxu1 }
 0x212   :  { %v501_v17 = vadd.f32 %v495_v16, %v320_v14  ;;  %v1943_v18 = vpop.f32.mrb[13].mxu0  ;;  %v1951_v19 = vpop.f32.mrb[13].mxu1  ;;  %v459_v26 = vadd.f32 %v453_v15, %v319_v20 }
 0x213   :  { %v456_v21 = vpop.f32.mrb[14].mxu0  ;;  %v498_v22 = vpop.f32.mrb[14].mxu1 }
 0x214   :  { %v1944_v23 = vpop.f32.mrb[15].mxu0  ;;  %v1952_v24 = vpop.f32.mrb[15].mxu1  ;;  %v1750_v25 = vmul.f32 -1.442695, %v501_v17 }
 0x216   :  { %2182 = vpow2.f32 %v1750_v25 }
 0x217   :  { %2184 = vtanh.f32 %v459_v26 }
 0x218   :  { %v2179_v27 = vpop.eup %2178 }
 0x219   :  { %v2181_v28 = vpop.eup %2180  ;;  %v369_v29 = vadd.f32 1.0, %v2179_v27 }
 0x21a   :  { %v416_v30 = vadd.f32 1.0, %v2181_v28 }
 0x21b   :  { %2186 = vrcp.f32 %v369_v29 }
 0x21c   :  { %2188 = vrcp.f32 %v416_v30 }
 0x220   :  { %v2183_v31 = vpop.eup %2182 }
 0x221   :  { %v2185_v32 = vpop.eup %2184  ;;  %v505_v36 = vadd.f32 1.0, %v2183_v31  ;;  %v715_v31 = vld [vmem:[#allocation4 + $0x18] sm:$0x3] }
 0x223   :  { %2190 = vrcp.f32 %v505_v36 }
 0x225   :  { %v2187_v33 = vpop.eup %2186 }
 0x226   :  { %v2189_v34 = vpop.eup %2188  ;;  %v509_v35 = vmul.f32 %v2187_v33, %v2185_v32  ;;  %v716_v32 = vld [vmem:[#allocation4 + $0x1a] sm:$0x3] }
 0x227   :  { %v508_v37 = vmul.f32 %v2189_v34, %v2479_v50 }
 0x229   :  { %v2512_v38 = vadd.f32 %v509_v35, %v508_v37 }
 0x22b   :  { %2192 = vtanh.f32 %v2512_v38 }
 0x22d   :  { %v2191_v39 = vpop.eup %2190 }
 0x235   :  { %v2193_v40 = vpop.eup %2192 }
 0x236   :  { %v512_v41 = vmul.f32 %v2193_v40, %v2191_v39 }
 0x238   :  { %514 = vst.msk [vmem:[#allocation9 + $0x2] sm:$0x3] %vm45_vm0, %v512_v41  ;;  %v520_v42 = vpack.c.bf16 %v512_v41, %v512_v41 }
 0x23a   :  { %1958 = vmatmul.mubr.msk.bf16.vlgmr.msra.gmra.mrb[16].mxu0 %vm86_vm2, %v520_v42  ;;  %1966 = vmatmul.mubr.msk.bf16.vlgmr.msra.gmra.mrb[16].mxu1 %vm86_vm2, %v520_v42 }
 0x23b   :  { %1970 = vmatpush3.bf16.msra.mxu0 %v2440_v7  ;;  %1978 = vmatpush3.bf16.msra.mxu1 %v2444_v8 }
 0x23c   :  { %1971 = vmatprep.subr.bf16.mxu0 %v2372_v0  ;;  %1979 = vmatprep.subr.bf16.mxu1 %v2372_v0 }
 0x23d   :  { %1973 = vmatprep.mubr.msk.bf16.mxu0 %vm2373_vm1, %v2372_v0  ;;  %1981 = vmatprep.mubr.msk.bf16.mxu1 %vm2373_vm1, %v2372_v0 }
 0x23f   :  { %1972 = vmatpush3.bf16.msra.mxu0 %v2450_v9  ;;  %1980 = vmatpush3.bf16.msra.mxu1 %v2454_v10 }
 0x240   :  { %1985 = vmatprep.subr.bf16.mxu0 %v2372_v0  ;;  %1993 = vmatprep.subr.bf16.mxu1 %v2372_v0 }
 0x242   :  { %1974 = vmatmul.mubr.msk.bf16.vlgmr.msra.gmra.mrb[20].mxu0 %vm86_vm2, %v520_v42  ;;  %1982 = vmatmul.mubr.msk.bf16.vlgmr.msra.gmra.mrb[20].mxu1 %vm86_vm2, %v520_v42 }
 0x243   :  { %1986 = vmatpush3.bf16.msra.mxu0 %v2427_v1  ;;  %1994 = vmatpush3.bf16.msra.mxu1 %v2429_v2 }
 0x244   :  { %1987 = vmatprep.subr.bf16.mxu0 %v2372_v0  ;;  %1995 = vmatprep.subr.bf16.mxu1 %v2372_v0 }
 0x245   :  { %1989 = vmatprep.mubr.msk.bf16.mxu0 %vm2373_vm1, %v2372_v0  ;;  %1997 = vmatprep.mubr.msk.bf16.mxu1 %vm2373_vm1, %v2372_v0 }
 0x247   :  { %1988 = vmatpush3.bf16.msra.mxu0 %v2432_v3  ;;  %1996 = vmatpush3.bf16.msra.mxu1 %v2436_v4 }
 0x248   :  { %2001 = vmatprep.subr.bf16.mxu0 %v2372_v0  ;;  %2009 = vmatprep.subr.bf16.mxu1 %v2372_v0 }
 0x30d   :  { %v558_v45 = vpop.f32.mrb[16].mxu0  ;;  %v605_v46 = vpop.f32.mrb[16].mxu1 }
 0x30e   :  { %v564_v47 = vadd.f32 %v558_v45, %v516_v43  ;;  %v611_v48 = vadd.f32 %v605_v46, %v517_v44  ;;  %v1959_v49 = vpop.f32.mrb[17].mxu0  ;;  %v1967_v50 = vpop.f32.mrb[17].mxu1  ;;  %v718_v45 = vld [vmem:[#allocation4 + $0x1e] sm:$0x3] }
 0x30f   :  { %v561_v51 = vpop.f32.mrb[18].mxu0  ;;  %v608_v52 = vpop.f32.mrb[18].mxu1 }
 0x310   :  { %v1752_v53 = vmul.f32 -1.442695, %v564_v47  ;;  %v1754_v54 = vmul.f32 -1.442695, %v611_v48  ;;  %v1960_v55 = vpop.f32.mrb[19].mxu0  ;;  %v1968_v56 = vpop.f32.mrb[19].mxu1 }
 0x311   :  { %v717_v51 = vld [vmem:[#allocation4 + $0x1c] sm:$0x3] }
 0x312   :  { %2194 = vpow2.f32 %v1752_v53 }
 0x313   :  { %2196 = vpow2.f32 %v1754_v54 }
 0x315   :  { %v652_v58 = vpop.f32.mrb[20].mxu0  ;;  %v694_v59 = vpop.f32.mrb[20].mxu1 }
 0x316   :  { %v700_v60 = vadd.f32 %v694_v59, %v519_v57  ;;  %v1975_v61 = vpop.f32.mrb[21].mxu0  ;;  %v1983_v62 = vpop.f32.mrb[21].mxu1  ;;  %v658_v14 = vadd.f32 %v652_v58, %v518_v63 }
 0x317   :  { %v655_v5 = vpop.f32.mrb[22].mxu0  ;;  %v697_v6 = vpop.f32.mrb[22].mxu1 }
 0x318   :  { %v1976_v11 = vpop.f32.mrb[23].mxu0  ;;  %v1984_v12 = vpop.f32.mrb[23].mxu1  ;;  %v1757_v13 = vmul.f32 -1.442695, %v700_v60 }
 0x31a   :  { %2198 = vpow2.f32 %v1757_v13 }
 0x31b   :  { %2200 = vtanh.f32 %v658_v14 }
 0x31c   :  { %v2195_v15 = vpop.eup %2194 }
 0x31d   :  { %v2197_v16 = vpop.eup %2196  ;;  %v568_v17 = vadd.f32 1.0, %v2195_v15 }
 0x31e   :  { %v615_v18 = vadd.f32 1.0, %v2197_v16 }
 0x31f   :  { %2202 = vrcp.f32 %v568_v17 }
 0x320   :  { %2204 = vrcp.f32 %v615_v18 }
 0x324   :  { %v2199_v19 = vpop.eup %2198 }
 0x325   :  { %v2201_v20 = vpop.eup %2200  ;;  %v704_v24 = vadd.f32 1.0, %v2199_v19  ;;  %v914_v19 = vld [vmem:[#allocation4 + $0x20] sm:$0x3] }
 0x327   :  { %2206 = vrcp.f32 %v704_v24 }
 0x329   :  { %v2203_v21 = vpop.eup %2202 }
 0x32a   :  { %v2205_v22 = vpop.eup %2204  ;;  %v708_v23 = vmul.f32 %v2203_v21, %v2201_v20  ;;  %v915_v20 = vld [vmem:[#allocation4 + $0x22] sm:$0x3] }
 0x32b   :  { %v707_v25 = vmul.f32 %v2205_v22, %v2512_v38 }
 0x32d   :  { %v2545_v26 = vadd.f32 %v708_v23, %v707_v25 }
 0x32f   :  { %2208 = vtanh.f32 %v2545_v26 }
 0x331   :  { %v2207_v27 = vpop.eup %2206 }
 0x339   :  { %v2209_v28 = vpop.eup %2208 }
 0x33a   :  { %v711_v29 = vmul.f32 %v2209_v28, %v2207_v27 }
 0x33c   :  { %713 = vst.msk [vmem:[#allocation9 + $0x4] sm:$0x3] %vm45_vm0, %v711_v29  ;;  %v719_v30 = vpack.c.bf16 %v711_v29, %v711_v29 }
 0x33e   :  { %1990 = vmatmul.mubr.msk.bf16.vlgmr.msra.gmra.mrb[24].mxu0 %vm86_vm2, %v719_v30  ;;  %1998 = vmatmul.mubr.msk.bf16.vlgmr.msra.gmra.mrb[24].mxu1 %vm86_vm2, %v719_v30 }
 0x33f   :  { %2002 = vmatpush3.bf16.msra.mxu0 %v2440_v7  ;;  %2010 = vmatpush3.bf16.msra.mxu1 %v2444_v8 }
 0x340   :  { %2003 = vmatprep.subr.bf16.mxu0 %v2372_v0  ;;  %2011 = vmatprep.subr.bf16.mxu1 %v2372_v0 }
 0x341   :  { %2005 = vmatprep.mubr.msk.bf16.mxu0 %vm2373_vm1, %v2372_v0  ;;  %2013 = vmatprep.mubr.msk.bf16.mxu1 %vm2373_vm1, %v2372_v0 }
 0x343   :  { %2004 = vmatpush3.bf16.msra.mxu0 %v2450_v9  ;;  %2012 = vmatpush3.bf16.msra.mxu1 %v2454_v10 }
 0x344   :  { %2017 = vmatprep.subr.bf16.mxu0 %v2372_v0  ;;  %2025 = vmatprep.subr.bf16.mxu1 %v2372_v0 }
 0x346   :  { %2006 = vmatmul.mubr.msk.bf16.vlgmr.msra.gmra.mrb[28].mxu0 %vm86_vm2, %v719_v30  ;;  %2014 = vmatmul.mubr.msk.bf16.vlgmr.msra.gmra.mrb[28].mxu1 %vm86_vm2, %v719_v30 }
 0x347   :  { %2018 = vmatpush3.bf16.msra.mxu0 %v2427_v1  ;;  %2026 = vmatpush3.bf16.msra.mxu1 %v2429_v2 }
 0x348   :  { %2019 = vmatprep.subr.bf16.mxu0 %v2372_v0  ;;  %2027 = vmatprep.subr.bf16.mxu1 %v2372_v0 }
 0x349   :  { %2021 = vmatprep.mubr.msk.bf16.mxu0 %vm2373_vm1, %v2372_v0  ;;  %2029 = vmatprep.mubr.msk.bf16.mxu1 %vm2373_vm1, %v2372_v0 }
 0x34b   :  { %2020 = vmatpush3.bf16.msra.mxu0 %v2432_v3  ;;  %2028 = vmatpush3.bf16.msra.mxu1 %v2436_v4 }
 0x34c   :  { %2033 = vmatprep.subr.bf16.mxu0 %v2372_v0  ;;  %2041 = vmatprep.subr.bf16.mxu1 %v2372_v0 }
 0x411   :  { %v757_v33 = vpop.f32.mrb[24].mxu0  ;;  %v804_v34 = vpop.f32.mrb[24].mxu1 }
 0x412   :  { %v763_v35 = vadd.f32 %v757_v33, %v715_v31  ;;  %v810_v36 = vadd.f32 %v804_v34, %v716_v32  ;;  %v1991_v37 = vpop.f32.mrb[25].mxu0  ;;  %v1999_v38 = vpop.f32.mrb[25].mxu1  ;;  %v917_v33 = vld [vmem:[#allocation4 + $0x26] sm:$0x3] }
 0x413   :  { %v760_v39 = vpop.f32.mrb[26].mxu0  ;;  %v807_v40 = vpop.f32.mrb[26].mxu1 }
 0x414   :  { %v1759_v41 = vmul.f32 -1.442695, %v763_v35  ;;  %v1761_v42 = vmul.f32 -1.442695, %v810_v36  ;;  %v1992_v43 = vpop.f32.mrb[27].mxu0  ;;  %v2000_v44 = vpop.f32.mrb[27].mxu1 }
 0x415   :  { %v916_v39 = vld [vmem:[#allocation4 + $0x24] sm:$0x3] }
 0x416   :  { %2210 = vpow2.f32 %v1759_v41 }
 0x417   :  { %2212 = vpow2.f32 %v1761_v42 }
 0x419   :  { %v851_v46 = vpop.f32.mrb[28].mxu0  ;;  %v893_v47 = vpop.f32.mrb[28].mxu1 }
 0x41a   :  { %v899_v48 = vadd.f32 %v893_v47, %v718_v45  ;;  %v2007_v49 = vpop.f32.mrb[29].mxu0  ;;  %v2015_v50 = vpop.f32.mrb[29].mxu1  ;;  %v857_v57 = vadd.f32 %v851_v46, %v717_v51 }
 0x41b   :  { %v854_v52 = vpop.f32.mrb[30].mxu0  ;;  %v896_v53 = vpop.f32.mrb[30].mxu1 }
 0x41c   :  { %v2008_v54 = vpop.f32.mrb[31].mxu0  ;;  %v2016_v55 = vpop.f32.mrb[31].mxu1  ;;  %v1764_v56 = vmul.f32 -1.442695, %v899_v48 }
 0x41e   :  { %2214 = vpow2.f32 %v1764_v56 }
 0x41f   :  { %2216 = vtanh.f32 %v857_v57 }
 0x420   :  { %v2211_v58 = vpop.eup %2210 }
 0x421   :  { %v2213_v59 = vpop.eup %2212  ;;  %v767_v60 = vadd.f32 1.0, %v2211_v58 }
 0x422   :  { %v814_v61 = vadd.f32 1.0, %v2213_v59 }
 0x423   :  { %2218 = vrcp.f32 %v767_v60 }
 0x424   :  { %2220 = vrcp.f32 %v814_v61 }
 0x428   :  { %v2215_v62 = vpop.eup %2214 }
 0x429   :  { %v2217_v63 = vpop.eup %2216  ;;  %v903_v12 = vadd.f32 1.0, %v2215_v62  ;;  %v1113_v62 = vld [vmem:[#allocation4 + $0x28] sm:$0x3] }
 0x42b   :  { %2222 = vrcp.f32 %v903_v12 }
 0x42d   :  { %v2219_v5 = vpop.eup %2218 }
 0x42e   :  { %v2221_v6 = vpop.eup %2220  ;;  %v907_v11 = vmul.f32 %v2219_v5, %v2217_v63  ;;  %v1114_v63 = vld [vmem:[#allocation4 + $0x2a] sm:$0x3] }
 0x42f   :  { %v906_v13 = vmul.f32 %v2221_v6, %v2545_v26 }
 0x431   :  { %v2578_v14 = vadd.f32 %v907_v11, %v906_v13 }
 0x433   :  { %2224 = vtanh.f32 %v2578_v14 }
 0x435   :  { %v2223_v15 = vpop.eup %2222 }
 0x43d   :  { %v2225_v16 = vpop.eup %2224 }
 0x43e   :  { %v910_v17 = vmul.f32 %v2225_v16, %v2223_v15 }
 0x440   :  { %912 = vst.msk [vmem:[#allocation9 + $0x6] sm:$0x3] %vm45_vm0, %v910_v17  ;;  %v918_v18 = vpack.c.bf16 %v910_v17, %v910_v17 }
 0x442   :  { %2022 = vmatmul.mubr.msk.bf16.vlgmr.msra.gmra.mrb[32].mxu0 %vm86_vm2, %v918_v18  ;;  %2030 = vmatmul.mubr.msk.bf16.vlgmr.msra.gmra.mrb[32].mxu1 %vm86_vm2, %v918_v18 }
 0x443   :  { %2034 = vmatpush3.bf16.msra.mxu0 %v2440_v7  ;;  %2042 = vmatpush3.bf16.msra.mxu1 %v2444_v8 }
 0x444   :  { %2035 = vmatprep.subr.bf16.mxu0 %v2372_v0  ;;  %2043 = vmatprep.subr.bf16.mxu1 %v2372_v0 }
 0x445   :  { %2037 = vmatprep.mubr.msk.bf16.mxu0 %vm2373_vm1, %v2372_v0  ;;  %2045 = vmatprep.mubr.msk.bf16.mxu1 %vm2373_vm1, %v2372_v0 }
 0x447   :  { %2036 = vmatpush3.bf16.msra.mxu0 %v2450_v9  ;;  %2044 = vmatpush3.bf16.msra.mxu1 %v2454_v10 }
 0x448   :  { %2049 = vmatprep.subr.bf16.mxu0 %v2372_v0  ;;  %2057 = vmatprep.subr.bf16.mxu1 %v2372_v0 }
 0x44a   :  { %2038 = vmatmul.mubr.msk.bf16.vlgmr.msra.gmra.mrb[36].mxu0 %vm86_vm2, %v918_v18  ;;  %2046 = vmatmul.mubr.msk.bf16.vlgmr.msra.gmra.mrb[36].mxu1 %vm86_vm2, %v918_v18 }
 0x44b   :  { %2050 = vmatpush3.bf16.msra.mxu0 %v2427_v1  ;;  %2058 = vmatpush3.bf16.msra.mxu1 %v2429_v2 }
 0x44c   :  { %2051 = vmatprep.subr.bf16.mxu0 %v2372_v0  ;;  %2059 = vmatprep.subr.bf16.mxu1 %v2372_v0 }
 0x44d   :  { %2053 = vmatprep.mubr.msk.bf16.mxu0 %vm2373_vm1, %v2372_v0  ;;  %2061 = vmatprep.mubr.msk.bf16.mxu1 %vm2373_vm1, %v2372_v0 }
 0x44f   :  { %2052 = vmatpush3.bf16.msra.mxu0 %v2432_v3  ;;  %2060 = vmatpush3.bf16.msra.mxu1 %v2436_v4 }
 0x450   :  { %2065 = vmatprep.subr.bf16.mxu0 %v2372_v0  ;;  %2073 = vmatprep.subr.bf16.mxu1 %v2372_v0 }
 0x515   :  { %v956_v21 = vpop.f32.mrb[32].mxu0  ;;  %v1003_v22 = vpop.f32.mrb[32].mxu1 }
 0x516   :  { %v962_v23 = vadd.f32 %v956_v21, %v914_v19  ;;  %v1009_v24 = vadd.f32 %v1003_v22, %v915_v20  ;;  %v2023_v25 = vpop.f32.mrb[33].mxu0  ;;  %v2031_v26 = vpop.f32.mrb[33].mxu1  ;;  %v1116_v21 = vld [vmem:[#allocation4 + $0x2e] sm:$0x3] }
 0x517   :  { %v959_v27 = vpop.f32.mrb[34].mxu0  ;;  %v1006_v28 = vpop.f32.mrb[34].mxu1 }
 0x518   :  { %v1766_v29 = vmul.f32 -1.442695, %v962_v23  ;;  %v1768_v30 = vmul.f32 -1.442695, %v1009_v24  ;;  %v2024_v31 = vpop.f32.mrb[35].mxu0  ;;  %v2032_v32 = vpop.f32.mrb[35].mxu1 }
 0x519   :  { %v1115_v27 = vld [vmem:[#allocation4 + $0x2c] sm:$0x3] }
 0x51a   :  { %2226 = vpow2.f32 %v1766_v29 }
 0x51b   :  { %2228 = vpow2.f32 %v1768_v30 }
 0x51d   :  { %v1050_v34 = vpop.f32.mrb[36].mxu0  ;;  %v1092_v35 = vpop.f32.mrb[36].mxu1 }
 0x51e   :  { %v1098_v36 = vadd.f32 %v1092_v35, %v917_v33  ;;  %v2039_v37 = vpop.f32.mrb[37].mxu0  ;;  %v2047_v38 = vpop.f32.mrb[37].mxu1  ;;  %v1056_v45 = vadd.f32 %v1050_v34, %v916_v39 }
 0x51f   :  { %v1053_v40 = vpop.f32.mrb[38].mxu0  ;;  %v1095_v41 = vpop.f32.mrb[38].mxu1 }
 0x520   :  { %v2040_v42 = vpop.f32.mrb[39].mxu0  ;;  %v2048_v43 = vpop.f32.mrb[39].mxu1  ;;  %v1771_v44 = vmul.f32 -1.442695, %v1098_v36 }
 0x522   :  { %2230 = vpow2.f32 %v1771_v44 }
 0x523   :  { %2232 = vtanh.f32 %v1056_v45 }
 0x524   :  { %v2227_v46 = vpop.eup %2226 }
 0x525   :  { %v2229_v47 = vpop.eup %2228  ;;  %v966_v48 = vadd.f32 1.0, %v2227_v46 }
 0x526   :  { %v1013_v49 = vadd.f32 1.0, %v2229_v47 }
 0x527   :  { %2234 = vrcp.f32 %v966_v48 }
 0x528   :  { %2236 = vrcp.f32 %v1013_v49 }
 0x52c   :  { %v2231_v50 = vpop.eup %2230 }
 0x52d   :  { %v2233_v51 = vpop.eup %2232  ;;  %v1102_v55 = vadd.f32 1.0, %v2231_v50 }
 0x52f   :  { %2238 = vrcp.f32 %v1102_v55 }
 0x531   :  { %v2235_v52 = vpop.eup %2234 }
 0x532   :  { %v2237_v53 = vpop.eup %2236  ;;  %v1106_v54 = vmul.f32 %v2235_v52, %v2233_v51 }
 0x533   :  { %v1105_v56 = vmul.f32 %v2237_v53, %v2578_v14 }
 0x535   :  { %v2611_v57 = vadd.f32 %v1106_v54, %v1105_v56 }
 0x537   :  { %2240 = vtanh.f32 %v2611_v57 }
 0x539   :  { %v2239_v58 = vpop.eup %2238 }
 0x541   :  { %v2241_v59 = vpop.eup %2240 }
 0x542   :  { %v1109_v60 = vmul.f32 %v2241_v59, %v2239_v58 }
 0x544   :  { %1111 = vst.msk [vmem:[#allocation9 + $0x8] sm:$0x3] %vm45_vm0, %v1109_v60  ;;  %v1117_v61 = vpack.c.bf16 %v1109_v60, %v1109_v60 }
 0x546   :  { %2054 = vmatmul.mubr.msk.bf16.vlgmr.msra.gmra.mrb[40].mxu0 %vm86_vm2, %v1117_v61  ;;  %2062 = vmatmul.mubr.msk.bf16.vlgmr.msra.gmra.mrb[40].mxu1 %vm86_vm2, %v1117_v61 }
 0x547   :  { %2066 = vmatpush3.bf16.msra.mxu0 %v2440_v7  ;;  %2074 = vmatpush3.bf16.msra.mxu1 %v2444_v8 }
 0x548   :  { %2067 = vmatprep.subr.bf16.mxu0 %v2372_v0  ;;  %2075 = vmatprep.subr.bf16.mxu1 %v2372_v0 }
 0x549   :  { %2069 = vmatprep.mubr.msk.bf16.mxu0 %vm2373_vm1, %v2372_v0  ;;  %2077 = vmatprep.mubr.msk.bf16.mxu1 %vm2373_vm1, %v2372_v0 }
 0x54b   :  { %2068 = vmatpush3.bf16.msra.mxu0 %v2450_v9  ;;  %2076 = vmatpush3.bf16.msra.mxu1 %v2454_v10 }
 0x54c   :  { %2081 = vmatprep.subr.bf16.mxu0 %v2372_v0  ;;  %2089 = vmatprep.subr.bf16.mxu1 %v2372_v0 }
 0x54e   :  { %2070 = vmatmul.mubr.msk.bf16.vlgmr.msra.gmra.mrb[44].mxu0 %vm86_vm2, %v1117_v61  ;;  %2078 = vmatmul.mubr.msk.bf16.vlgmr.msra.gmra.mrb[44].mxu1 %vm86_vm2, %v1117_v61 }
 0x54f   :  { %2082 = vmatpush3.bf16.msra.mxu0 %v2427_v1  ;;  %2090 = vmatpush3.bf16.msra.mxu1 %v2429_v2 }
 0x550   :  { %2083 = vmatprep.subr.bf16.mxu0 %v2372_v0  ;;  %2091 = vmatprep.subr.bf16.mxu1 %v2372_v0 }
 0x551   :  { %2085 = vmatprep.mubr.msk.bf16.mxu0 %vm2373_vm1, %v2372_v0  ;;  %2093 = vmatprep.mubr.msk.bf16.mxu1 %vm2373_vm1, %v2372_v0 }
 0x553   :  { %2084 = vmatpush3.bf16.msra.mxu0 %v2432_v3  ;;  %2092 = vmatpush3.bf16.msra.mxu1 %v2436_v4 }
 0x554   :  { %2097 = vmatprep.subr.bf16.mxu0 %v2372_v0  ;;  %2105 = vmatprep.subr.bf16.mxu1 %v2372_v0 }
 0x619   :  { %v1155_v5 = vpop.f32.mrb[40].mxu0  ;;  %v1202_v6 = vpop.f32.mrb[40].mxu1 }
 0x61a   :  { %v1161_v11 = vadd.f32 %v1155_v5, %v1113_v62  ;;  %v1208_v12 = vadd.f32 %v1202_v6, %v1114_v63  ;;  %v2055_v13 = vpop.f32.mrb[41].mxu0  ;;  %v2063_v14 = vpop.f32.mrb[41].mxu1  ;;  %v1314_v62 = vld [vmem:[#allocation4 + $0x34] sm:$0x3] }
 0x61b   :  { %v1158_v15 = vpop.f32.mrb[42].mxu0  ;;  %v1205_v16 = vpop.f32.mrb[42].mxu1 }
 0x61c   :  { %v1773_v17 = vmul.f32 -1.442695, %v1161_v11  ;;  %v1775_v18 = vmul.f32 -1.442695, %v1208_v12  ;;  %v2056_v19 = vpop.f32.mrb[43].mxu0  ;;  %v2064_v20 = vpop.f32.mrb[43].mxu1 }
 0x61e   :  { %2242 = vpow2.f32 %v1773_v17 }
 0x61f   :  { %2244 = vpow2.f32 %v1775_v18 }
 0x621   :  { %v1249_v22 = vpop.f32.mrb[44].mxu0  ;;  %v1291_v23 = vpop.f32.mrb[44].mxu1 }
 0x622   :  { %v1297_v24 = vadd.f32 %v1291_v23, %v1116_v21  ;;  %v2071_v25 = vpop.f32.mrb[45].mxu0  ;;  %v2079_v26 = vpop.f32.mrb[45].mxu1  ;;  %v1255_v33 = vadd.f32 %v1249_v22, %v1115_v27 }
 0x623   :  { %v1252_v28 = vpop.f32.mrb[46].mxu0  ;;  %v1294_v29 = vpop.f32.mrb[46].mxu1 }
 0x624   :  { %v2072_v30 = vpop.f32.mrb[47].mxu0  ;;  %v2080_v31 = vpop.f32.mrb[47].mxu1  ;;  %v1778_v32 = vmul.f32 -1.442695, %v1297_v24 }
 0x625   :  { %v2290_v30 = vld [vmem:[#allocation7 + $0x20] sm:$0xff]   ;;  %v2291_v31 = vld [vmem:[#allocation7 + $0x30] sm:$0xff]  }
 0x626   :  { %2246 = vpow2.f32 %v1778_v32  ;;  %v2292_v32 = vld [vmem:[#allocation7 + $0x28] sm:$0xff]  }
 0x627   :  { %2248 = vtanh.f32 %v1255_v33  ;;  %v2293_v33 = vld [vmem:[#allocation7 + $0x38] sm:$0xff]  }
 0x628   :  { %v2243_v34 = vpop.eup %2242 }
 0x629   :  { %v2245_v35 = vpop.eup %2244  ;;  %v1165_v36 = vadd.f32 1.0, %v2243_v34  ;;  %v1511_v34 = vld [vmem:[#allocation4 + $0x38] sm:$0x3] }
 0x62a   :  { %v1212_v37 = vadd.f32 1.0, %v2245_v35  ;;  %v1512_v35 = vld [vmem:[#allocation4 + $0x3a] sm:$0x3] }
 0x62b   :  { %2250 = vrcp.f32 %v1165_v36 }
 0x62c   :  { %2252 = vrcp.f32 %v1212_v37 }
 0x630   :  { %v2247_v38 = vpop.eup %2246 }
 0x631   :  { %v2249_v39 = vpop.eup %2248  ;;  %v1301_v43 = vadd.f32 1.0, %v2247_v38 }
 0x633   :  { %2254 = vrcp.f32 %v1301_v43 }
 0x635   :  { %v2251_v40 = vpop.eup %2250 }
 0x636   :  { %v2253_v41 = vpop.eup %2252  ;;  %v1305_v42 = vmul.f32 %v2251_v40, %v2249_v39 }
 0x637   :  { %v1304_v44 = vmul.f32 %v2253_v41, %v2611_v57 }
 0x639   :  { %v2644_v45 = vadd.f32 %v1305_v42, %v1304_v44 }
 0x63b   :  { %2256 = vtanh.f32 %v2644_v45 }
 0x63d   :  { %v2255_v46 = vpop.eup %2254 }
 0x645   :  { %v2257_v47 = vpop.eup %2256 }
 0x646   :  { %v1308_v48 = vmul.f32 %v2257_v47, %v2255_v46  ;;  %v1514_v47 = vld [vmem:[#allocation4 + $0x3e] sm:$0x3] }
 0x648   :  { %1310 = vst.msk [vmem:[#allocation9 + $0xa] sm:$0x3] %vm45_vm0, %v1308_v48  ;;  %v1316_v49 = vpack.c.bf16 %v1308_v48, %v1308_v48 }
 0x64a   :  { %2086 = vmatmul.mubr.msk.bf16.vlgmr.msra.gmra.mrb[48].mxu0 %vm86_vm2, %v1316_v49  ;;  %2094 = vmatmul.mubr.msk.bf16.vlgmr.msra.gmra.mrb[48].mxu1 %vm86_vm2, %v1316_v49 }
 0x64b   :  { %2098 = vmatpush3.bf16.msra.mxu0 %v2440_v7  ;;  %2106 = vmatpush3.bf16.msra.mxu1 %v2444_v8 }
 0x64c   :  { %2099 = vmatprep.subr.bf16.mxu0 %v2372_v0  ;;  %2107 = vmatprep.subr.bf16.mxu1 %v2372_v0 }
 0x64d   :  { %2101 = vmatprep.mubr.msk.bf16.mxu0 %vm2373_vm1, %v2372_v0  ;;  %2109 = vmatprep.mubr.msk.bf16.mxu1 %vm2373_vm1, %v2372_v0 }
 0x64f   :  { %2100 = vmatpush3.bf16.msra.mxu0 %v2450_v9  ;;  %2108 = vmatpush3.bf16.msra.mxu1 %v2454_v10 }
 0x650   :  { %2113 = vmatprep.subr.bf16.mxu0 %v2372_v0  ;;  %2121 = vmatprep.subr.bf16.mxu1 %v2372_v0 }
 0x652   :  { %2102 = vmatmul.mubr.msk.bf16.vlgmr.msra.gmra.mrb[52].mxu0 %vm86_vm2, %v1316_v49  ;;  %2110 = vmatmul.mubr.msk.bf16.vlgmr.msra.gmra.mrb[52].mxu1 %vm86_vm2, %v1316_v49 }
 0x653   :  { %2114 = vmatpush3.bf16.msra.mxu0 %v2427_v1  ;;  %2122 = vmatpush3.bf16.msra.mxu1 %v2429_v2  ;;  %v1312_v1 = vld [vmem:[#allocation4 + $0x30] sm:$0x3]  ;;  %v1313_v2 = vld [vmem:[#allocation4 + $0x32] sm:$0x3] }
 0x654   :  { %2115 = vmatprep.subr.bf16.mxu0 %v2372_v0  ;;  %2123 = vmatprep.subr.bf16.mxu1 %v2372_v0 }
 0x655   :  { %2117 = vmatprep.mubr.msk.bf16.mxu0 %vm2373_vm1, %v2372_v0  ;;  %2125 = vmatprep.mubr.msk.bf16.mxu1 %vm2373_vm1, %v2372_v0 }
 0x657   :  { %2116 = vmatpush3.bf16.msra.mxu0 %v2432_v3  ;;  %2124 = vmatpush3.bf16.msra.mxu1 %v2436_v4  ;;  %v1315_v4 = vld [vmem:[#allocation4 + $0x36] sm:$0x3] }
 0x658   :  { %2129 = vmatprep.subr.bf16.mxu0 %v2372_v0  ;;  %2137 = vmatprep.subr.bf16.mxu1 %v2372_v0 }
 0x71d   :  { %v1354_v7 = vpop.f32.mrb[48].mxu0  ;;  %v1401_v8 = vpop.f32.mrb[48].mxu1 }
 0x71e   :  { %v1360_v9 = vadd.f32 %v1354_v7, %v1312_v1  ;;  %v1407_v10 = vadd.f32 %v1401_v8, %v1313_v2  ;;  %v2087_v50 = vpop.f32.mrb[49].mxu0  ;;  %v2095_v51 = vpop.f32.mrb[49].mxu1  ;;  %v1513_v8 = vld [vmem:[#allocation4 + $0x3c] sm:$0x3] }
 0x71f   :  { %v1357_v52 = vpop.f32.mrb[50].mxu0  ;;  %v1404_v53 = vpop.f32.mrb[50].mxu1 }
 0x720   :  { %v1780_v54 = vmul.f32 -1.442695, %v1360_v9  ;;  %v1782_v55 = vmul.f32 -1.442695, %v1407_v10  ;;  %v2088_v56 = vpop.f32.mrb[51].mxu0  ;;  %v2096_v3 = vpop.f32.mrb[51].mxu1 }
 0x722   :  { %2258 = vpow2.f32 %v1780_v54 }
 0x723   :  { %2260 = vpow2.f32 %v1782_v55 }
 0x725   :  { %v1448_v57 = vpop.f32.mrb[52].mxu0  ;;  %v1490_v58 = vpop.f32.mrb[52].mxu1 }
 0x726   :  { %v1496_v59 = vadd.f32 %v1490_v58, %v1315_v4  ;;  %v2103_v60 = vpop.f32.mrb[53].mxu0  ;;  %v2111_v61 = vpop.f32.mrb[53].mxu1  ;;  %v1454_v13 = vadd.f32 %v1448_v57, %v1314_v62 }
 0x727   :  { %v1451_v63 = vpop.f32.mrb[54].mxu0  ;;  %v1493_v5 = vpop.f32.mrb[54].mxu1 }
 0x728   :  { %v2104_v6 = vpop.f32.mrb[55].mxu0  ;;  %v2112_v11 = vpop.f32.mrb[55].mxu1  ;;  %v1785_v12 = vmul.f32 -1.442695, %v1496_v59 }
 0x72a   :  { %2262 = vpow2.f32 %v1785_v12 }
 0x72b   :  { %2264 = vtanh.f32 %v1454_v13 }
 0x72c   :  { %v2259_v14 = vpop.eup %2258 }
 0x72d   :  { %v2261_v15 = vpop.eup %2260  ;;  %v1364_v16 = vadd.f32 1.0, %v2259_v14 }
 0x72e   :  { %v1411_v17 = vadd.f32 1.0, %v2261_v15 }
 0x72f   :  { %2266 = vrcp.f32 %v1364_v16 }
 0x730   :  { %2268 = vrcp.f32 %v1411_v17 }
 0x734   :  { %v2263_v18 = vpop.eup %2262 }
 0x735   :  { %v2265_v19 = vpop.eup %2264  ;;  %v1500_v23 = vadd.f32 1.0, %v2263_v18 }
 0x737   :  { %2270 = vrcp.f32 %v1500_v23 }
 0x739   :  { %v2267_v20 = vpop.eup %2266 }
 0x73a   :  { %v2269_v21 = vpop.eup %2268  ;;  %v1504_v22 = vmul.f32 %v2267_v20, %v2265_v19 }
 0x73b   :  { %v1503_v24 = vmul.f32 %v2269_v21, %v2644_v45 }
 0x73d   :  { %v2677_v25 = vadd.f32 %v1504_v22, %v1503_v24 }
 0x73f   :  { %2272 = vtanh.f32 %v2677_v25 }
 0x741   :  { %v2271_v26 = vpop.eup %2270 }
 0x749   :  { %v2273_v27 = vpop.eup %2272 }
 0x74a   :  { %v1507_v28 = vmul.f32 %v2273_v27, %v2271_v26 }
 0x74c   :  { %1509 = vst.msk [vmem:[#allocation9 + $0xc] sm:$0x3] %vm45_vm0, %v1507_v28  ;;  %v1515_v29 = vpack.c.bf16 %v1507_v28, %v1507_v28 }
 0x74e   :  { %2118 = vmatmul.mubr.msk.bf16.vlgmr.msra.gmra.mrb[56].mxu0 %vm86_vm2, %v1515_v29  ;;  %2126 = vmatmul.mubr.msk.bf16.vlgmr.msra.gmra.mrb[56].mxu1 %vm86_vm2, %v1515_v29 }
 0x74f   :  { %2130 = vmatpush3.bf16.msra.mxu0 %v2290_v30  ;;  %2138 = vmatpush3.bf16.msra.mxu1 %v2291_v31 }
 0x750   :  { %2131 = vmatprep.subr.bf16.mxu0 %v2372_v0  ;;  %2139 = vmatprep.subr.bf16.mxu1 %v2372_v0 }
 0x751   :  { %2133 = vmatprep.mubr.msk.bf16.mxu0 %vm2373_vm1, %v2372_v0  ;;  %2141 = vmatprep.mubr.msk.bf16.mxu1 %vm2373_vm1, %v2372_v0 }
 0x753   :  { %2132 = vmatpush3.bf16.msra.mxu0 %v2292_v32  ;;  %2140 = vmatpush3.bf16.msra.mxu1 %v2293_v33 }
 0x756   :  { %2134 = vmatmul.mubr.msk.bf16.vlgmr.msra.gmra.mrb[60].mxu0 %vm86_vm2, %v1515_v29  ;;  %2142 = vmatmul.mubr.msk.bf16.vlgmr.msra.gmra.mrb[60].mxu1 %vm86_vm2, %v1515_v29 }
 0x821   :  { %v1553_v36 = vpop.f32.mrb[56].mxu0  ;;  %v1600_v37 = vpop.f32.mrb[56].mxu1 }
 0x822   :  { %v1559_v38 = vadd.f32 %v1553_v36, %v1511_v34  ;;  %v1606_v39 = vadd.f32 %v1600_v37, %v1512_v35  ;;  %v2119_v40 = vpop.f32.mrb[57].mxu0  ;;  %v2127_v41 = vpop.f32.mrb[57].mxu1 }
 0x823   :  { %v1556_v42 = vpop.f32.mrb[58].mxu0  ;;  %v1603_v43 = vpop.f32.mrb[58].mxu1 }
 0x824   :  { %v1787_v44 = vmul.f32 -1.442695, %v1559_v38  ;;  %v1789_v0 = vmul.f32 -1.442695, %v1606_v39  ;;  %v2120_v45 = vpop.f32.mrb[59].mxu0  ;;  %v2128_v46 = vpop.f32.mrb[59].mxu1 }
 0x826   :  { %2274 = vpow2.f32 %v1787_v44 }
 0x827   :  { %2276 = vpow2.f32 %v1789_v0 }
 0x829   :  { %v1647_v48 = vpop.f32.mrb[60].mxu0  ;;  %v1689_v49 = vpop.f32.mrb[60].mxu1 }
 0x82a   :  { %v1695_v1 = vadd.f32 %v1689_v49, %v1514_v47  ;;  %v2135_v2 = vpop.f32.mrb[61].mxu0  ;;  %v2143_v7 = vpop.f32.mrb[61].mxu1  ;;  %v1653_v53 = vadd.f32 %v1647_v48, %v1513_v8 }
 0x82b   :  { %v1650_v9 = vpop.f32.mrb[62].mxu0  ;;  %v1692_v10 = vpop.f32.mrb[62].mxu1 }
 0x82c   :  { %v2136_v50 = vpop.f32.mrb[63].mxu0  ;;  %v2144_v51 = vpop.f32.mrb[63].mxu1  ;;  %v1792_v52 = vmul.f32 -1.442695, %v1695_v1 }
 0x82e   :  { %2278 = vpow2.f32 %v1792_v52 }
 0x82f   :  { %2280 = vtanh.f32 %v1653_v53 }
 0x830   :  { %v2275_v54 = vpop.eup %2274 }
 0x831   :  { %v2277_v55 = vpop.eup %2276  ;;  %v1563_v56 = vadd.f32 1.0, %v2275_v54 }
 0x832   :  { %v1610_v3 = vadd.f32 1.0, %v2277_v55 }
 0x833   :  { %2282 = vrcp.f32 %v1563_v56 }
 0x834   :  { %2284 = vrcp.f32 %v1610_v3 }
 0x838   :  { %v2279_v4 = vpop.eup %2278 }
 0x839   :  { %v2281_v57 = vpop.eup %2280  ;;  %v1699_v61 = vadd.f32 1.0, %v2279_v4 }
 0x83b   :  { %2286 = vrcp.f32 %v1699_v61 }
 0x83d   :  { %v2283_v58 = vpop.eup %2282 }
 0x83e   :  { %v2285_v59 = vpop.eup %2284  ;;  %v1703_v60 = vmul.f32 %v2283_v58, %v2281_v57 }
 0x83f   :  { %v1702_v62 = vmul.f32 %v2285_v59, %v2677_v25 }
 0x841   :  { %v1704_v63 = vadd.f32 %v1703_v60, %v1702_v62 }
 0x843   :  { %2288 = vtanh.f32 %v1704_v63  ;;  %1710 = vst.msk [vmem:[#allocation3] sm:$0x3] %vm45_vm0, %v1704_v63 }
 0x845   :  { %v2287_v5 = vpop.eup %2286 }
 0x84d   :  { %v2289_v6 = vpop.eup %2288 }
 0x84e   :  { %v1706_v11 = vmul.f32 %v2289_v6, %v2287_v5 }
 0x850   :  { %1708 = vst.msk [vmem:[#allocation9 + $0xe] sm:$0x3] %vm45_vm0, %v1706_v11  ;;  %1709 = vst.msk [vmem:[#allocation2] sm:$0x3] %vm45_vm0, %v1706_v11 }
 0x851   :  { %2349 = shalt.err (!%p2346_p6)
}
 0x852   :  { %s2350_s12 = scalar_lea.hbm %s2712_s2, 256 }
 0x853   :  { %p2351_p7 = scmp.ne.s32.totalorder %s2712_s2, %s2350_s12  ;;  %p2354_p8 = scmp.lt.u32.totalorder %s2350_s12, %s2712_s2 }
 0x855   :  { %p2356_p9 = pnand %p2354_p8, %p2351_p7 }
 0x857   :  { %2359 = shalt.err (!%p2356_p9)
}
 0x858   :  { %1722 = dma.vmem_to_hbm [thread:$0]  %s1717_s8, 256, %s2712_s2, [#allocation6], %s2367_s19, %s2367_s19, %s2368_s20  }
 0x859   :  { %2364 = dma.done.wait [#allocation6], 256  }
 0x85a   :  { %2365 = vsyncadd [#allocation6], 4294967040 }
 0x85b   :  { %1726 = vsyncpa [#allocation5], 1 }
 0x85c   :  { %1727 = vsyncpa [#allocation8], 1 }
 0x85d   :  { %1728 = vsyncpa [#allocation6], 1 }

</bundles_post_ra>
